<compile_context>
chip_gen: v6e
topology: v6e:2x2x1
jax: 0.10.0
libtpu: 0.0.40
codegen_flags: <defaults>
</compile_context>

<pallas_src>
import math

import jax
import jax.numpy as jnp
from jax.experimental import pallas as pl
from jax.experimental.pallas import tpu as pltpu

EPS = 1e-4


def _round_up(x, m):
    return ((x + m - 1) // m) * m


def _point_embed_kernel(x_ref, basis_ref, w_ref, o_ref):
    # x_ref:     (TN, C)        points tile (C = 3 + other_dim)
    # basis_ref: (3, H/2)       fourier basis (resident, full block)
    # w_ref:     (H + C, dim)   pre-normalized, pre-transposed MPConv weight
    # o_ref:     (TN, dim)
    x = x_ref[...].astype(jnp.float32)                      # (TN, C)
    xyz = x[:, :3]                                          # (TN, 3)

    # Fourier projection on the MXU, then sin/cos on the EUP (kept as two
    # explicit transcendental passes over the half-width projection — same
    # total work as the fused variant, but numerically exact).
    proj = jnp.dot(xyz, basis_ref[...],
                   preferred_element_type=jnp.float32)      # (TN, H/2)

    # feats = [sin | cos | x] built in VMEM (lane concat), then ONE matmul
    # against the pre-concatenated weight — replaces the previous two dots.
    feats = jnp.concatenate([jnp.sin(proj), jnp.cos(proj), x], axis=1)

    o_ref[...] = jnp.dot(feats, w_ref[...],
                         preferred_element_type=jnp.float32).astype(o_ref.dtype)


def point_embed_forward(x, basis, weight, *, tile_n=4096):
    """x: (N, C) float32, basis: (3, hidden/2), weight: (dim, hidden + C)."""
    n, c = x.shape
    hidden_half = basis.shape[1]
    h = 2 * hidden_half
    dim, in_dim = weight.shape
    assert in_dim == h + c

    # --- Grid-invariant preprocessing (hoisted out of the kernel) -----------
    # MPConv forced-weight-norm (eval path) + gain=1/sqrt(fan_in), transpose
    # to (in_dim, dim). Columns of `weight` are ordered [sin | cos | x], so
    # the transposed rows already match the in-kernel feature layout.
    # NOTE: if weight/basis are static across calls, precompute this once (or
    # jit the whole wrapper so these tiny ops fuse — done in the test below).
    w = weight.astype(jnp.float32)
    row_norm = jnp.sqrt(jnp.sum(w * w, axis=1, keepdims=True))           # (dim, 1)
    w_n = w / (EPS + row_norm * (1.0 / math.sqrt(in_dim)))
    w_n = w_n * (1.0 / math.sqrt(in_dim))
    w_t = jnp.transpose(w_n)                                             # (in_dim, dim)
    basis_f32 = basis.astype(jnp.float32)                                # (3, H/2)

    # --- Row tiling: ragged final block, no padding / slicing ---------------
    tile_n = max(8, min(tile_n, _round_up(n, 8)))        # don't over-tile tiny inputs
    # v7x has 2 TensorCores fed by the "parallel" grid axis: if there is
    # enough work, make sure the grid has at least 2 steps.
    if n >= 2048 and pl.cdiv(n, tile_n) < 2:
        tile_n = _round_up(pl.cdiv(n, 2), 8)
    grid = (pl.cdiv(n, tile_n),)

    # Scoped-VMEM budget: double-buffered x / out blocks (lane-padded to 128)
    # plus the resident constants. Floor at the 16 MiB default (v5e), cap
    # below v7x's 64 MiB physical VMEM.
    lane_pad = lambda v: _round_up(v, 128)
    blk_bytes = 2 * tile_n * (lane_pad(c) + lane_pad(dim)) * 4
    const_bytes = 2 * (8 * lane_pad(hidden_half) +
                       _round_up(in_dim, 8) * lane_pad(dim)) * 4
    vmem_limit = int(min(max(blk_bytes + const_bytes + (2 << 20), 16 << 20),
                         56 << 20))

    out = pl.pallas_call(
        _point_embed_kernel,
        out_shape=jax.ShapeDtypeStruct((n, dim), x.dtype),
        grid_spec=pltpu.PrefetchScalarGridSpec(
            num_scalar_prefetch=0,
            grid=grid,
            in_specs=[
                pl.BlockSpec((tile_n, c), lambda i: (i, 0)),          # points tile
                pl.BlockSpec((3, hidden_half), lambda i: (0, 0)),     # basis (full)
                pl.BlockSpec((in_dim, dim), lambda i: (0, 0)),        # weight (full)
            ],
            out_specs=pl.BlockSpec((tile_n, dim), lambda i: (i, 0)),
        ),
        compiler_params=pltpu.CompilerParams(
            dimension_semantics=("parallel",),
            vmem_limit_bytes=vmem_limit,
        ),
    )(x, basis_f32, w_t)
    return out


def make_basis(hidden_dim):
    k = hidden_dim // 6
    e = (2.0 ** jnp.arange(k, dtype=jnp.float32)) * jnp.float32(math.pi)
    z = jnp.zeros((k,), jnp.float32)
    return jnp.stack([
        jnp.concatenate([e, z, z]),
        jnp.concatenate([z, e, z]),
        jnp.concatenate([z, z, e]),
    ])  # (3, hidden_dim // 2)


def reference_forward(x, basis, weight):
    # Plain-JAX mirror of the PyTorch forward (eval mode, gain=1).
    proj = x[:, :3] @ basis
    feats = jnp.concatenate([jnp.sin(proj), jnp.cos(proj), x], axis=1)
    in_dim = weight.shape[1]
    row_norm = jnp.sqrt(jnp.sum(weight * weight, axis=1, keepdims=True))
    w_n = weight / (EPS + row_norm / math.sqrt(in_dim))
    w_n = w_n / math.sqrt(in_dim)
    return feats @ w_n.T


if __name__ == "__main__":
    key = jax.random.PRNGKey(0)
    fwd = jax.jit(point_embed_forward, static_argnames=("tile_n",))

    # Case 1: module defaults (hidden_dim=48, dim=128, other_dim=0); N=200 is
    # not a multiple of 8 -> exercises the ragged (masked) final output block
    # with no padding / slicing round-trip.
    hidden_dim, dim, other_dim, n = 48, 128, 0, 200
    kx, kw, key = jax.random.split(key, 3)
    x = jax.random.normal(kx, (n, 3 + other_dim), dtype=jnp.float32)
    basis = make_basis(hidden_dim)                                    # (3, 24)
    weight = jax.random.normal(kw, (dim, hidden_dim + 3 + other_dim),
                               dtype=jnp.float32)                     # (128, 51)
    out = jax.block_until_ready(fwd(x, basis, weight))
    ref = reference_forward(x, basis, weight)
    assert out.shape == (n, dim)
    assert jnp.allclose(out, ref, atol=2e-4, rtol=2e-4), \
        float(jnp.max(jnp.abs(out - ref)))

    # Case 2: extra passthrough channels (other_dim=5) and a multi-step grid
    # (explicit small tile) with a ragged last block.
    hidden_dim, dim, other_dim, n = 48, 128, 5, 1000
    kx, kw, key = jax.random.split(key, 3)
    x = jax.random.normal(kx, (n, 3 + other_dim), dtype=jnp.float32)
    basis = make_basis(hidden_dim)                                    # (3, 24)
    weight = jax.random.normal(kw, (dim, hidden_dim + 3 + other_dim),
                               dtype=jnp.float32)                     # (128, 56)
    out = jax.block_until_ready(fwd(x, basis, weight, tile_n=256))
    ref = reference_forward(x, basis, weight)
    assert out.shape == (n, dim)
    assert jnp.allclose(out, ref, atol=2e-4, rtol=2e-4), \
        float(jnp.max(jnp.abs(out - ref)))

    print("KERNEL_OK")
</pallas_src>

<mosaic_0001>
module attributes {stable_mosaic.version = 11 : i64} {
  func.func @_point_embed_kernel(%arg0: i32, %arg1: memref<200x3xf32, #tpu.memory_space<vmem>>, %arg2: memref<3x24xf32, #tpu.memory_space<vmem>>, %arg3: memref<51x128xf32, #tpu.memory_space<vmem>>, %arg4: memref<200x128xf32, #tpu.memory_space<vmem>>) attributes {dimension_semantics = [#tpu.dimension_semantics<parallel>], iteration_bounds = array<i64: 1>, scalar_prefetch = 0 : i64, scratch_operands = 0 : i64, tpu.core_type = #tpu.core_type<tc>, window_params = [{transform_indices = @transform_0, window_bounds = array<i64: 200, 3>}, {pipeline_mode = #tpu.pipeline_mode<synchronous>, transform_indices = @transform_1, window_bounds = array<i64: 3, 24>}, {pipeline_mode = #tpu.pipeline_mode<synchronous>, transform_indices = @transform_2, window_bounds = array<i64: 51, 128>}, {transform_indices = @transform_3, window_bounds = array<i64: 200, 128>}]} {
    %c0 = arith.constant 0 : index
    %c0_0 = arith.constant 0 : index
    %0 = vector.load %arg1[%c0, %c0_0] : memref<200x3xf32, #tpu.memory_space<vmem>>, vector<200x3xf32>
    %c0_1 = arith.constant 0 : index
    %c0_2 = arith.constant 0 : index
    %1 = vector.load %arg2[%c0_1, %c0_2] : memref<3x24xf32, #tpu.memory_space<vmem>>, vector<3x24xf32>
    %cst = arith.constant dense<0.000000e+00> : vector<200x24xf32>
    %2 = tpu.matmul %0, %1, %cst {dimension_numbers = #tpu.dot_dimension_numbers<[1], [0], [0], [1], [0, 0, 1, 1], [], []>} : vector<200x3xf32>, vector<3x24xf32>, vector<200x24xf32> -> vector<200x24xf32>
    %3 = math.sin %2 : vector<200x24xf32>
    %4 = math.cos %2 : vector<200x24xf32>
    %5 = tpu.concatenate %3, %4, %0 in 1 : vector<200x24xf32>, vector<200x24xf32>, vector<200x3xf32> -> vector<200x51xf32>
    %c0_3 = arith.constant 0 : index
    %c0_4 = arith.constant 0 : index
    %6 = vector.load %arg3[%c0_3, %c0_4] : memref<51x128xf32, #tpu.memory_space<vmem>>, vector<51x128xf32>
    %cst_5 = arith.constant dense<0.000000e+00> : vector<200x128xf32>
    %7 = tpu.matmul %5, %6, %cst_5 {dimension_numbers = #tpu.dot_dimension_numbers<[1], [0], [0], [1], [0, 0, 1, 1], [], []>} : vector<200x51xf32>, vector<51x128xf32>, vector<200x128xf32> -> vector<200x128xf32>
    %c0_6 = arith.constant 0 : index
    %c0_7 = arith.constant 0 : index
    %8 = vector.load %arg4[%c0_6, %c0_7] : memref<200x128xf32, #tpu.memory_space<vmem>>, vector<200x128xf32>
    tpu.vector_store %arg4[%c0_6, %c0_7], %7 {strides = array<i32>} : memref<200x128xf32, #tpu.memory_space<vmem>>, vector<200x128xf32>,
    return
  }
  func.func @transform_0(%arg0: i32) -> (i32, i32) {
    %c0_i32 = arith.constant 0 : i32
    %c0_i32_0 = arith.constant 0 : i32
    return %arg0, %c0_i32 : i32, i32
  }
  func.func @transform_1(%arg0: i32) -> (i32, i32) {
    %c0_i32 = arith.constant 0 : i32
    %c0_i32_0 = arith.constant 0 : i32
    %c0_i32_1 = arith.constant 0 : i32
    return %c0_i32, %c0_i32_0 : i32, i32
  }
  func.func @transform_2(%arg0: i32) -> (i32, i32) {
    %c0_i32 = arith.constant 0 : i32
    %c0_i32_0 = arith.constant 0 : i32
    %c0_i32_1 = arith.constant 0 : i32
    return %c0_i32, %c0_i32_0 : i32, i32
  }
  func.func @transform_3(%arg0: i32) -> (i32, i32) {
    %c0_i32 = arith.constant 0 : i32
    %c0_i32_0 = arith.constant 0 : i32
    return %arg0, %c0_i32 : i32, i32
  }
}

</mosaic_0001>

<bundles_post_ra>
// kernel: point_embed_forward.1
= control target key start
LH: loop header
LB: loop body
LE: loop exit
PB: predicated region body
PF: predicated region fallthrough
CT: control target
= control target key end

     0   :  { %vm9960_vm0 = vcmask 1042432   ;;  %v9893_v2 = vmov 0.0   ;;  %vm9936_vm1 = vmmov 0   ;;  %vm41_vm2 = vcmask 23552   ;;  %s9889_s0 = inlined_call_operand.vmem [shape: f32[200,3], index: 0, kind: input, shape index: {}]   ;;  %s9890_s1 = inlined_call_operand.vmem [shape: f32[3,24], index: 1, kind: input, shape index: {}]   ;;  %s9891_s2 = inlined_call_operand.vmem [shape: f32[51,128], index: 2, kind: input, shape index: {}]   ;;  %s9892_s3 = inlined_call_operand.hbm [shape: f32[200,128], index: 3, kind: output, shape index: {}]  }
   0x1   :  { %v40_v0 = vld [vmem:[%s9890_s1] sm:$0x7]  ;;  %6340 = vmatprep.subr.mxu0 %v9893_v2  ;;  %6342 = vmatprep.mubr.msk.f32.mxu0 %vm9936_vm1, %v9893_v2  ;;  %v16_v3 = vld [vmem:[%s9889_s0 + $0x8] sm:$0xff]  ;;  %v17_v4 = vld [vmem:[%s9889_s0 + $0x10] sm:$0xff] }
   0x2   :  { %v15_v1 = vld [vmem:[%s9889_s0] sm:$0xff]  ;;  %6341 = vmatpush3.msk.msra.mxu0 %vm9960_vm0, %v40_v0  ;;  %6506 = vmatprep.subr.mxu1 %v9893_v2 }
   0x3   :  { %6343 = vmatmul.mubr.msk.f32.vlgmr.msra.gmra.mxu0 %vm41_vm2, %v15_v1  ;;  %6417 = vmatprep.subr.mxu0 %v9893_v2 }
   0x4   :  { %6345 = vmatprep.mubr.msk.f32.mxu0 %vm9936_vm1, %v9893_v2  ;;  %6434 = vmatprep.mubr.msk.f32.mxu1 %vm9936_vm1, %v9893_v2 }
   0x7   :  { %6346 = vmatmul.mubr.msk.f32.gmra.mxu0 %vm41_vm2, %v16_v3 }
   0x8   :  { %6348 = vmatprep.mubr.msk.f32.mxu0 %vm9936_vm1, %v9893_v2 }
   0x9   :  { %8 = vsyncpa [#allocation3], 0  ;;  %v18_v5 = vld [vmem:[%s9889_s0 + $0x18] sm:$0xff]  ;;  %v19_v6 = vld [vmem:[%s9889_s0 + $0x20] sm:$0xff]  ;;  %v9907_v54 = vmov 683565275  }
   0xa   :  { %v20_v7 = vld [vmem:[%s9889_s0 + $0x28] sm:$0xff]  ;;  %v21_v8 = vld [vmem:[%s9889_s0 + $0x30] sm:$0xff]  ;;  %v22_v9 = vld [vmem:[%s9889_s0 + $0x38] sm:$0xff]  ;;  %v9903_v56 = vmov 2475754826   ;;  %s6788_s10 = smov 48  }
   0xb   :  { %6349 = vmatmul.mubr.msk.f32.gmra.mxu0 %vm41_vm2, %v17_v4  ;;  %v23_v10 = vld [vmem:[%s9889_s0 + $0x40] sm:$0xff]  ;;  %v24_v11 = vld [vmem:[%s9889_s0 + $0x48] sm:$0xff]  ;;  %v25_v12 = vld [vmem:[%s9889_s0 + $0x50] sm:$0xff]  ;;  %v9900_v59 = vmov 2131351028   ;;  %s6789_s11 = smov 24  }
   0xc   :  { %6351 = vmatprep.mubr.msk.f32.mxu0 %vm9936_vm1, %v9893_v2  ;;  %v26_v13 = vld [vmem:[%s9889_s0 + $0x58] sm:$0xff]  ;;  %v27_v14 = vld [vmem:[%s9889_s0 + $0x60] sm:$0xff]  ;;  %v28_v15 = vld [vmem:[%s9889_s0 + $0x68] sm:$0xff]  ;;  %v9905_v61 = vmov 2102212464  }
   0xd   :  { %v29_v16 = vld [vmem:[%s9889_s0 + $0x70] sm:$0xff]  ;;  %v30_v17 = vld [vmem:[%s9889_s0 + $0x78] sm:$0xff]  ;;  %v31_v18 = vld [vmem:[%s9889_s0 + $0x80] sm:$0xff]  ;;  %v9915_v63 = vmov 920167782  }
   0xe   :  { %v32_v19 = vld [vmem:[%s9889_s0 + $0x88] sm:$0xff]  ;;  %v33_v20 = vld [vmem:[%s9889_s0 + $0x90] sm:$0xff]  ;;  %v34_v21 = vld [vmem:[%s9889_s0 + $0x98] sm:$0xff] }
   0xf   :  { %6352 = vmatmul.mubr.msk.f32.gmra.mxu0 %vm41_vm2, %v18_v5  ;;  %v35_v22 = vld [vmem:[%s9889_s0 + $0xa0] sm:$0xff]  ;;  %v36_v23 = vld [vmem:[%s9889_s0 + $0xa8] sm:$0xff]  ;;  %v37_v24 = vld [vmem:[%s9889_s0 + $0xb0] sm:$0xff] }
  0x10   :  { %6354 = vmatprep.mubr.msk.f32.mxu0 %vm9936_vm1, %v9893_v2  ;;  %v38_v25 = vld [vmem:[%s9889_s0 + $0xb8] sm:$0xff]  ;;  %v39_v26 = vld [vmem:[%s9889_s0 + $0xc0] sm:$0xff] }
  0x13   :  { %6355 = vmatmul.mubr.msk.f32.gmra.mxu0 %vm41_vm2, %v19_v6 }
  0x14   :  { %6357 = vmatprep.mubr.msk.f32.mxu0 %vm9936_vm1, %v9893_v2 }
  0x17   :  { %6358 = vmatmul.mubr.msk.f32.gmra.mxu0 %vm41_vm2, %v20_v7 }
  0x18   :  { %6360 = vmatprep.mubr.msk.f32.mxu0 %vm9936_vm1, %v9893_v2 }
  0x1b   :  { %6361 = vmatmul.mubr.msk.f32.gmra.mxu0 %vm41_vm2, %v21_v8  ;;  %v9910_v8 = vmov 1326507024  }
  0x1c   :  { %6363 = vmatprep.mubr.msk.f32.mxu0 %vm9936_vm1, %v9893_v2 }
  0x1f   :  { %6364 = vmatmul.mubr.msk.f32.gmra.mxu0 %vm41_vm2, %v22_v9 }
  0x20   :  { %6366 = vmatprep.mubr.msk.f32.mxu0 %vm9936_vm1, %v9893_v2 }
  0x23   :  { %6367 = vmatmul.mubr.msk.f32.gmra.mxu0 %vm41_vm2, %v23_v10 }
  0x24   :  { %6369 = vmatprep.mubr.msk.f32.mxu0 %vm9936_vm1, %v9893_v2 }
  0x27   :  { %6370 = vmatmul.mubr.msk.f32.gmra.mxu0 %vm41_vm2, %v24_v11 }
  0x28   :  { %6372 = vmatprep.mubr.msk.f32.mxu0 %vm9936_vm1, %v9893_v2 }
  0x2b   :  { %6373 = vmatmul.mubr.msk.f32.gmra.mxu0 %vm41_vm2, %v25_v12 }
  0x2c   :  { %6375 = vmatprep.mubr.msk.f32.mxu0 %vm9936_vm1, %v9893_v2 }
  0x2f   :  { %6376 = vmatmul.mubr.msk.f32.gmra.mxu0 %vm41_vm2, %v26_v13 }
  0x30   :  { %6378 = vmatprep.mubr.msk.f32.mxu0 %vm9936_vm1, %v9893_v2 }
  0x33   :  { %6379 = vmatmul.mubr.msk.f32.gmra.mxu0 %vm41_vm2, %v27_v14 }
  0x34   :  { %6381 = vmatprep.mubr.msk.f32.mxu0 %vm9936_vm1, %v9893_v2 }
  0x37   :  { %6382 = vmatmul.mubr.msk.f32.gmra.mxu0 %vm41_vm2, %v28_v15 }
  0x38   :  { %6384 = vmatprep.mubr.msk.f32.mxu0 %vm9936_vm1, %v9893_v2 }
  0x3b   :  { %6385 = vmatmul.mubr.msk.f32.gmra.mxu0 %vm41_vm2, %v29_v16 }
  0x3c   :  { %6387 = vmatprep.mubr.msk.f32.mxu0 %vm9936_vm1, %v9893_v2 }
  0x3f   :  { %6388 = vmatmul.mubr.msk.f32.gmra.mxu0 %vm41_vm2, %v30_v17 }
  0x40   :  { %6390 = vmatprep.mubr.msk.f32.mxu0 %vm9936_vm1, %v9893_v2 }
  0x43   :  { %6391 = vmatmul.mubr.msk.f32.gmra.mxu0 %vm41_vm2, %v31_v18 }
  0x44   :  { %6393 = vmatprep.mubr.msk.f32.mxu0 %vm9936_vm1, %v9893_v2 }
  0x47   :  { %6394 = vmatmul.mubr.msk.f32.gmra.mxu0 %vm41_vm2, %v32_v19 }
  0x48   :  { %6396 = vmatprep.mubr.msk.f32.mxu0 %vm9936_vm1, %v9893_v2 }
  0x4b   :  { %6397 = vmatmul.mubr.msk.f32.gmra.mxu0 %vm41_vm2, %v33_v20 }
  0x4c   :  { %6399 = vmatprep.mubr.msk.f32.mxu0 %vm9936_vm1, %v9893_v2 }
  0x4f   :  { %6400 = vmatmul.mubr.msk.f32.gmra.mxu0 %vm41_vm2, %v34_v21 }
  0x50   :  { %6402 = vmatprep.mubr.msk.f32.mxu0 %vm9936_vm1, %v9893_v2 }
  0x53   :  { %6403 = vmatmul.mubr.msk.f32.gmra.mxu0 %vm41_vm2, %v35_v22 }
  0x54   :  { %6405 = vmatprep.mubr.msk.f32.mxu0 %vm9936_vm1, %v9893_v2 }
  0x57   :  { %6406 = vmatmul.mubr.msk.f32.gmra.mxu0 %vm41_vm2, %v36_v23 }
  0x58   :  { %6408 = vmatprep.mubr.msk.f32.mxu0 %vm9936_vm1, %v9893_v2 }
  0x5b   :  { %6409 = vmatmul.mubr.msk.f32.gmra.mxu0 %vm41_vm2, %v37_v24 }
  0x5c   :  { %6411 = vmatprep.mubr.msk.f32.mxu0 %vm9936_vm1, %v9893_v2 }
  0x5f   :  { %6412 = vmatmul.mubr.msk.f32.gmra.mxu0 %vm41_vm2, %v38_v25 }
  0x60   :  { %6414 = vmatprep.mubr.msk.f32.mxu0 %vm9936_vm1, %v9893_v2 }
  0x63   :  { %6415 = vmatmul.mubr.msk.f32.gmra.mxu0 %vm41_vm2, %v39_v26 }
  0x64   :  { %6431 = vmatprep.mubr.msk.f32.mxu0 %vm9936_vm1, %v9893_v2 }
  0xc3   :  { %v6974_v27 = vpop.f32.mrf.mxu0 }
  0xc4   :  { %10026 = vst [vmem:[#allocation5_spill] sm:$0xff] %v6974_v27  ;;  %v311_v28 = vand.u32 2147483647, %v6974_v27  ;;  %v314_v29 = vand.u32 2139095040, %v6974_v27 }
  0xc5   :  { %v6344_v30 = vpop.f32.mrf.mxu0 }
  0xc6   :  { %v315_v31 = vshrl.u32 %v314_v29, 23  ;;  %v318_v32 = vand.u32 8388607, %v311_v28 }
  0xc7   :  { %v6980_v33 = vpop.f32.mrf.mxu0 }
  0xc8   :  { %10027 = vst [vmem:[#allocation6_spill] sm:$0xff] %v6980_v33  ;;  %v6056_v34 = vadd.s32 4294967169, %v315_v31  ;;  %v9898_v35 = vand.u32 2147483647, %v6980_v33  ;;  %v418_v36 = vand.u32 2139095040, %v6980_v33  ;;  %v319_v39 = vor.u32 8388608, %v318_v32 }
  0xc9   :  { %v6347_v37 = vpop.f32.mrf.mxu0 }
  0xca   :  { %v321_v38 = vadd.s32 1, %v6056_v34  ;;  %v419_v40 = vshrl.u32 %v418_v36, 23  ;;  %v6986_v41 = vand.u32 8388607, %v9898_v35  ;;  %v6991_v49 = vshll.u32 %v319_v39, 8 }
  0xcb   :  { %v6988_v42 = vpop.f32.mrf.mxu0 }
  0xcc   :  { %10028 = vst [vmem:[#allocation7_spill] sm:$0xff] %v6988_v42  ;;  %vm322_vm3 = vcmp.gt.s32.totalorder %v321_v38, 0  ;;  %v6060_v44 = vadd.s32 4294967169, %v419_v40  ;;  %v522_v45 = vand.u32 2139095040, %v6988_v42  ;;  %v423_v50 = vor.u32 8388608, %v6986_v41 }
  0xcd   :  { %v323_v43 = vsel %vm322_vm3, %v321_v38, 0  ;;  %v6350_v46 = vpop.f32.mrf.mxu0 }
  0xce   :  { %v324_v47 = vshrl.u32 %v323_v43, 5  ;;  %v325_v48 = vand.u32 31, %v323_v43  ;;  %v425_v51 = vadd.s32 1, %v6060_v44  ;;  %v523_v58 = vshrl.u32 %v522_v45, 23 }
  0xcf   :  { %v6994_v52 = vpop.f32.mrf.mxu0  ;;  %v7032_v45 = vshll.u32 %v423_v50, 8 }
  0xd0   :  { %10029 = vst [vmem:[#allocation8_spill] sm:$0xff] %v6994_v52  ;;  %v326_v53 = vsub.s32 32, %v325_v48  ;;  %v328_v55 = vshll.u32 %v9907_v54, %v325_v48  ;;  %v331_v57 = vshll.u32 %v9903_v56, %v325_v48  ;;  %v334_v60 = vshll.u32 %v9900_v59, %v325_v48 }
  0xd1   :  { %v337_v62 = vshll.u32 %v9905_v61, %v325_v48  ;;  %v340_v0 = vshll.u32 %v9915_v63, %v325_v48  ;;  %vm343_vm4 = vcmp.lt.s32.totalorder %v324_v47, 1  ;;  %v6353_v1 = vpop.f32.mrf.mxu0  ;;  %vm344_vm5 = vcmp.lt.s32.totalorder %v324_v47, 2 }
  0xd2   :  { %v329_v3 = vshrl.u32 %v9903_v56, %v326_v53  ;;  %v332_v4 = vshrl.u32 %v9900_v59, %v326_v53  ;;  %v335_v5 = vshrl.u32 %v9905_v61, %v326_v53  ;;  %v327_v6 = vshrl.u32 %v9907_v54, %v326_v53 }
  0xd3   :  { %v338_v7 = vshrl.u32 %v9915_v63, %v326_v53  ;;  %v341_v9 = vshrl.u32 %v9910_v8, %v326_v53  ;;  %vm345_vm6 = vcmp.lt.s32.totalorder %v324_v47, 3  ;;  %v7007_v10 = vpop.f32.mrf.mxu0  ;;  %vm426_vm7 = vcmp.gt.s32.totalorder %v425_v51, 0 }
  0xd4   :  { %10030 = vst [vmem:[#allocation9_spill] sm:$0xff] %v7007_v10  ;;  %v330_v11 = vor.u32 %v329_v3, %v328_v55  ;;  %v333_v12 = vor.u32 %v332_v4, %v331_v57  ;;  %v336_v13 = vor.u32 %v335_v5, %v334_v60  ;;  %vm346_vm8 = vcmp.lt.s32.totalorder %v324_v47, 4 }
  0xd5   :  { %v339_v14 = vor.u32 %v338_v7, %v337_v62  ;;  %v342_v15 = vor.u32 %v341_v9, %v340_v0  ;;  %v427_v16 = vsel %vm426_vm7, %v425_v51, 0  ;;  %v6356_v17 = vpop.f32.mrf.mxu0  ;;  %v6064_v46 = vadd.s32 4294967169, %v523_v58 }
  0xd6   :  { %v347_v18 = vsel %vm343_vm4, %v327_v6, %v330_v11  ;;  %v348_v19 = vsel %vm346_vm8, %v336_v13, 2102212464  ;;  %v351_v20 = vsel %vm343_vm4, %v330_v11, %v333_v12  ;;  %v355_v21 = vsel %vm343_vm4, %v333_v12, %v336_v13 }
  0xd7   :  { %v349_v22 = vsel %vm345_vm6, %v333_v12, %v348_v19  ;;  %v352_v23 = vsel %vm346_vm8, %v339_v14, 920167782  ;;  %v356_v24 = vsel %vm346_vm8, %v342_v15, 1326507024  ;;  %v7013_v25 = vshrl.u32 %v427_v16, 5  ;;  %v7015_v26 = vpop.f32.mrf.mxu0 }
  0xd8   :  { %10031 = vst [vmem:[#allocation10_spill] sm:$0xff] %v7015_v26  ;;  %v350_v29 = vsel %vm344_vm5, %v347_v18, %v349_v22  ;;  %v353_v30 = vsel %vm345_vm6, %v336_v13, %v352_v23  ;;  %v357_v31 = vsel %vm345_vm6, %v339_v14, %v356_v24  ;;  %v429_v32 = vand.u32 31, %v427_v16 }
  0xd9   :  { %v354_v34 = vsel %vm344_vm5, %v351_v20, %v353_v30  ;;  %v358_v36 = vsel %vm344_vm5, %v355_v21, %v357_v31  ;;  %v6359_v37 = vpop.f32.mrf.mxu0  ;;  %v366_v43 = vmul.u32 %v6991_v49, %v350_v29  ;;  %vm447_vm9 = vcmp.lt.s32.totalorder %v7013_v25, 1 }
  0xda   :  { %v7023_v38 = vmul.u32.u64.low %v6991_v49, %v358_v36  ;;  %v7024_v39 = vmul.u32.u64.high %v6991_v49, %v358_v36, %v7023_v38  ;;  %v7027_v40 = vmul.u32.u64.low %v6991_v49, %v354_v34  ;;  %v7028_v41 = vmul.u32.u64.high %v6991_v49, %v354_v34, %v7027_v40 }
  0xdb   :  { %v430_v44 = vsub.s32 32, %v429_v32  ;;  %v7034_v48 = vpop.f32.mrf.mxu0  ;;  %v432_v47 = vshll.u32 %v9907_v54, %v429_v32  ;;  %v435_v51 = vshll.u32 %v9903_v56, %v429_v32  ;;  %v438_v53 = vshll.u32 %v9900_v59, %v429_v32 }
  0xdc   :  { %10032 = vst [vmem:[#allocation11_spill] sm:$0xff] %v7034_v48  ;;  %v441_v50 = vshll.u32 %v9905_v61, %v429_v32  ;;  %vm368_vm10 = vc.u32 %v7024_v39, %v7027_v40  ;;  %v369_v58 = vadd.s32 1, %v7028_v41  ;;  %v444_v0 = vshll.u32 %v9915_v63, %v429_v32 }
  0xdd   :  { %v433_v55 = vshrl.u32 %v9903_v56, %v430_v44  ;;  %v436_v57 = vshrl.u32 %v9900_v59, %v430_v44  ;;  %v439_v49 = vshrl.u32 %v9905_v61, %v430_v44  ;;  %v6362_v60 = vpop.f32.mrf.mxu0  ;;  %v442_v62 = vshrl.u32 %v9915_v63, %v430_v44 }
  0xde   :  { %v445_v5 = vshrl.u32 %v9910_v8, %v430_v44  ;;  %v370_v7 = vsel %vm368_vm10, %v369_v58, %v7028_v41  ;;  %vm448_vm11 = vcmp.lt.s32.totalorder %v7013_v25, 2  ;;  %vm450_vm12 = vcmp.lt.s32.totalorder %v7013_v25, 4 }
  0xdf   :  { %v434_v1 = vor.u32 %v433_v55, %v432_v47  ;;  %v437_v3 = vor.u32 %v436_v57, %v435_v51  ;;  %v440_v4 = vor.u32 %v439_v49, %v438_v53  ;;  %v7050_v6 = vpop.f32.mrf.mxu0  ;;  %v443_v9 = vor.u32 %v442_v62, %v441_v50 }
  0xe0   :  { %10033 = vst [vmem:[#allocation12_spill] sm:$0xff] %v7050_v6  ;;  %v371_v11 = vadd.s32 %v370_v7, %v366_v43  ;;  %v431_v12 = vshrl.u32 %v9907_v54, %v430_v44  ;;  %v446_v13 = vor.u32 %v445_v5, %v444_v0  ;;  %vm449_vm13 = vcmp.lt.s32.totalorder %v7013_v25, 3 }
  0xe1   :  { %v452_v14 = vsel %vm450_vm12, %v440_v4, 2102212464  ;;  %v6365_v15 = vpop.f32.mrf.mxu0  ;;  %v455_v16 = vsel %vm447_vm9, %v434_v1, %v437_v3  ;;  %v456_v17 = vsel %vm450_vm12, %v443_v9, 920167782  ;;  %v459_v18 = vsel %vm447_vm9, %v437_v3, %v440_v4 }
  0xe2   :  { %v372_v19 = vadd.s32 536870912, %v371_v11  ;;  %v451_v20 = vsel %vm447_vm9, %v431_v12, %v434_v1  ;;  %v457_v21 = vsel %vm449_vm13, %v440_v4, %v456_v17  ;;  %v460_v22 = vsel %vm450_vm12, %v446_v13, 1326507024 }
  0xe3   :  { %v7063_v23 = vpop.f32.mrf.mxu0  ;;  %v453_v24 = vsel %vm449_vm13, %v437_v3, %v452_v14  ;;  %v458_v29 = vsel %vm448_vm11, %v455_v16, %v457_v21  ;;  %v461_v30 = vsel %vm449_vm13, %v443_v9, %v460_v22  ;;  %v529_v31 = vadd.s32 1, %v6064_v46 }
  0xe4   :  { %10034 = vst [vmem:[#allocation13_spill] sm:$0xff] %v7063_v23  ;;  %v7067_v32 = vshrl.u32 %v372_v19, 30  ;;  %v462_v34 = vsel %vm448_vm11, %v459_v18, %v461_v30  ;;  %v7072_v36 = vmul.u32.u64.low %v7032_v45, %v458_v29  ;;  %v7073_v37 = vmul.u32.u64.high %v7032_v45, %v458_v29, %v7072_v36 }
  0xe5   :  { %v6368_v38 = vpop.f32.mrf.mxu0  ;;  %v7077_v41 = vmul.u32.u64.low %v7032_v45, %v462_v34  ;;  %v7078_v43 = vmul.u32.u64.high %v7032_v45, %v462_v34, %v7077_v41  ;;  %v9897_v44 = vand.u32 2147483647, %v6988_v42  ;;  %vm530_vm14 = vcmp.gt.s32.totalorder %v529_v31, 0 }
  0xe6   :  { %v374_v46 = vshll.u32 %v7067_v32, 30  ;;  %v454_v47 = vsel %vm448_vm11, %v451_v20, %v453_v24  ;;  %v531_v51 = vsel %vm530_vm14, %v529_v31, 0  ;;  %v473_v55 = vadd.s32 1, %v7073_v37 }
  0xe7   :  { %v533_v53 = vand.u32 31, %v531_v51  ;;  %v470_v57 = vmul.u32 %v7032_v45, %v454_v47  ;;  %vm472_vm15 = vc.u32 %v7078_v43, %v7072_v36  ;;  %v526_v49 = vand.u32 8388607, %v9897_v44  ;;  %v7097_v4 = vpop.f32.mrf.mxu0 }
  0xe8   :  { %v7090_v60 = vsub.s32 %v371_v11, %v374_v46  ;;  %v474_v58 = vsel %vm472_vm15, %v473_v55, %v7073_v37  ;;  %v532_v62 = vshrl.u32 %v531_v51, 5  ;;  %10035 = vst [vmem:[#allocation14_spill] sm:$0xff] %v7097_v4  ;;  %v626_v47 = vand.u32 2139095040, %v6994_v52 }
  0xe9   :  { %v534_v50 = vsub.s32 32, %v533_v53  ;;  %v536_v25 = vshll.u32 %v9907_v54, %v533_v53  ;;  %v475_v0 = vadd.s32 %v474_v58, %v470_v57  ;;  %v539_v3 = vshll.u32 %v9903_v56, %v533_v53  ;;  %v6371_v15 = vpop.f32.mrf.mxu0 }
  0xea   :  { %v542_v5 = vshll.u32 %v9900_v59, %v533_v53  ;;  %v545_v9 = vshll.u32 %v9905_v61, %v533_v53  ;;  %v548_v18 = vshll.u32 %v9915_v63, %v533_v53  ;;  %v377_v20 = vsub.s32 0, %v7090_v60 }
  0xeb   :  { %v537_v1 = vshrl.u32 %v9903_v56, %v534_v50  ;;  %v540_v45 = vshrl.u32 %v9900_v59, %v534_v50  ;;  %v543_v7 = vshrl.u32 %v9905_v61, %v534_v50  ;;  %v546_v11 = vshrl.u32 %v9915_v63, %v534_v50 }
  0xec   :  { %v476_v12 = vadd.s32 536870912, %v475_v0  ;;  %v549_v19 = vshrl.u32 %v9910_v8, %v534_v50  ;;  %v527_v21 = vor.u32 8388608, %v526_v49  ;;  %vm551_vm2 = vcmp.lt.s32.totalorder %v532_v62, 1 }
  0xed   :  { %v538_v13 = vor.u32 %v537_v1, %v536_v25  ;;  %v541_v14 = vor.u32 %v540_v45, %v539_v3  ;;  %v544_v16 = vor.u32 %v543_v7, %v542_v5  ;;  %v547_v17 = vor.u32 %v546_v11, %v545_v9 }
  0xee   :  { %v7106_v22 = vshrl.u32 %v476_v12, 30  ;;  %v550_v24 = vor.u32 %v549_v19, %v548_v18  ;;  %vm554_vm3 = vcmp.lt.s32.totalorder %v532_v62, 4  ;;  %vm553_vm4 = vcmp.lt.s32.totalorder %v532_v62, 3 }
  0xef   :  { %v559_v29 = vsel %vm551_vm2, %v538_v13, %v541_v14  ;;  %v560_v30 = vsel %vm554_vm3, %v547_v17, 920167782  ;;  %v535_v31 = vshrl.u32 %v9907_v54, %v534_v50  ;;  %vm552_vm5 = vcmp.lt.s32.totalorder %v532_v62, 2 }
  0xf0   :  { %10036 = vst [vmem:[#allocation15_spill] sm:$0xff] %v7106_v22  ;;  %v556_v34 = vsel %vm554_vm3, %v544_v16, 2102212464  ;;  %v561_v37 = vsel %vm553_vm4, %v544_v16, %v560_v30  ;;  %v563_v41 = vsel %vm551_vm2, %v541_v14, %v544_v16  ;;  %v567_v46 = vshll.u32 %v527_v21, 8  ;;  %v7132_v21 = vpop.f32.mrf.mxu0 }
  0xf1   :  { %v562_v38 = vsel %vm552_vm5, %v559_v29, %v561_v37  ;;  %v6057_v51 = vmin.u32 %v377_v20, %v7090_v60  ;;  %v478_v53 = vshll.u32 %v7106_v22, 30  ;;  %v555_v55 = vsel %vm551_vm2, %v535_v31, %v538_v13  ;;  %10037 = vst [vmem:[#allocation16_spill] sm:$0xff] %v7132_v21 }
  0xf2   :  { %v564_v57 = vsel %vm554_vm3, %v550_v24, 1326507024  ;;  %v557_v49 = vsel %vm553_vm4, %v541_v14, %v556_v34  ;;  %v7116_v58 = vmul.u32.u64.low %v567_v46, %v562_v38  ;;  %v7117_v25 = vmul.u32.u64.high %v567_v46, %v562_v38, %v7116_v58  ;;  %v6374_v34 = vpop.f32.mrf.mxu0 }
  0xf3   :  { %v565_v50 = vsel %vm553_vm4, %v547_v17, %v564_v57  ;;  %v627_v5 = vshrl.u32 %v626_v47, 23  ;;  %v558_v7 = vsel %vm552_vm5, %v555_v55, %v557_v49  ;;  %v379_v9 = vclz %v6057_v51 }
  0xf4   :  { %v566_v1 = vsel %vm552_vm5, %v563_v41, %v565_v50  ;;  %v7125_v11 = vsub.s32 %v475_v0, %v478_v53  ;;  %v577_v12 = vadd.s32 1, %v7117_v25  ;;  %v574_v14 = vmul.u32 %v567_v46, %v558_v7 }
  0xf5   :  { %v7121_v3 = vmul.u32.u64.low %v567_v46, %v566_v1  ;;  %v7122_v45 = vmul.u32.u64.high %v567_v46, %v566_v1, %v7121_v3  ;;  %v6068_v13 = vadd.s32 4294967169, %v627_v5  ;;  %v6058_v17 = vadd.s32 4294967294, %v379_v9 }
  0xf6   :  { %v481_v18 = vsub.s32 0, %v7125_v11  ;;  %v9896_v0 = vand.u32 2147483647, %v6994_v52  ;;  %v730_v31 = vand.u32 2139095040, %v7007_v10  ;;  %vm1041_vm1 = vcmp.lt.s32.totalorder %v7050_v6, 0 }
  0xf7   :  { %vm576_vm6 = vc.u32 %v7122_v45, %v7116_v58  ;;  %v633_v15 = vadd.s32 1, %v6068_v13  ;;  %vm6059_vm8 = vcmp.lt.s32.totalorder %v6058_v17, 0 }
  0xf8   :  { %v578_v16 = vsel %vm576_vm6, %v577_v12, %v7117_v25  ;;  %v6061_v29 = vmin.u32 %v481_v18, %v7125_v11  ;;  %v7140_v41 = vsel %vm6059_vm8, 0, %v6058_v17  ;;  %v630_v51 = vand.u32 8388607, %v9896_v0 }
  0xf9   :  { %v579_v19 = vadd.s32 %v578_v16, %v574_v14  ;;  %vm634_vm7 = vcmp.gt.s32.totalorder %v633_v15, 0  ;;  %v731_v55 = vshrl.u32 %v730_v31, 23 }
  0xfa   :  { %v635_v62 = vsel %vm634_vm7, %v633_v15, 0  ;;  %v483_v47 = vclz %v6061_v29  ;;  %v387_v15 = vsub.s32 4294967266, %v7140_v41  ;;  %v631_v17 = vor.u32 8388608, %v630_v51 }
  0xfb   :  { %v580_v20 = vadd.s32 536870912, %v579_v19  ;;  %v637_v24 = vand.u32 31, %v635_v62  ;;  %v636_v49 = vshrl.u32 %v635_v62, 5  ;;  %v6072_v34 = vadd.s32 4294967169, %v731_v55 }
  0xfc   :  { %v6062_v62 = vadd.s32 4294967294, %v483_v47 }
  0xfd   :  { %v7136_v30 = vshrl.u32 %v580_v20, 30  ;;  %v638_v37 = vsub.s32 32, %v637_v24  ;;  %v640_v53 = vshll.u32 %v9907_v54, %v637_v24  ;;  %v643_v50 = vshll.u32 %v9903_v56, %v637_v24 }
  0xfe   :  { %v646_v3 = vshll.u32 %v9900_v59, %v637_v24  ;;  %v649_v7 = vshll.u32 %v9905_v61, %v637_v24  ;;  %v652_v13 = vshll.u32 %v9915_v63, %v637_v24  ;;  %vm655_vm9 = vcmp.lt.s32.totalorder %v636_v49, 1 }
  0xff   :  { %v582_v38 = vshll.u32 %v7136_v30, 30  ;;  %v641_v46 = vshrl.u32 %v9903_v56, %v638_v37  ;;  %v644_v25 = vshrl.u32 %v9900_v59, %v638_v37  ;;  %v647_v5 = vshrl.u32 %v9905_v61, %v638_v37 }
 0x100   :  { %v650_v12 = vshrl.u32 %v9915_v63, %v638_v37  ;;  %v653_v14 = vshrl.u32 %v9910_v8, %v638_v37  ;;  %vm658_vm10 = vcmp.lt.s32.totalorder %v636_v49, 4  ;;  %vm657_vm11 = vcmp.lt.s32.totalorder %v636_v49, 3 }
 0x101   :  { %v7146_v57 = vsub.s32 %v579_v19, %v582_v38  ;;  %v642_v1 = vor.u32 %v641_v46, %v640_v53  ;;  %v645_v9 = vor.u32 %v644_v25, %v643_v50  ;;  %v648_v16 = vor.u32 %v647_v5, %v646_v3 }
 0x102   :  { %v651_v18 = vor.u32 %v650_v12, %v649_v7  ;;  %v654_v19 = vor.u32 %v653_v14, %v652_v13  ;;  %v388_v38 = vadd.s32 127, %v387_v15  ;;  %v9895_v53 = vand.u32 2147483647, %v7007_v10 }
 0x103   :  { %v585_v20 = vsub.s32 0, %v7146_v57  ;;  %v663_v29 = vsel %vm655_vm9, %v642_v1, %v645_v9  ;;  %v667_v46 = vsel %vm655_vm9, %v645_v9, %v648_v16  ;;  %vm656_vm12 = vcmp.lt.s32.totalorder %v636_v49, 2 }
 0x104   :  { %v664_v31 = vsel %vm658_vm10, %v651_v18, 920167782  ;;  %v660_v51 = vsel %vm658_vm10, %v648_v16, 2102212464  ;;  %v668_v50 = vsel %vm658_vm10, %v654_v19, 1326507024  ;;  %v639_v25 = vshrl.u32 %v9907_v54, %v638_v37 }
 0x105   :  { %v665_v24 = vsel %vm657_vm11, %v648_v16, %v664_v31  ;;  %v6065_v47 = vmin.u32 %v585_v20, %v7146_v57  ;;  %v669_v5 = vsel %vm657_vm11, %v651_v18, %v668_v50  ;;  %vm6063_vm13 = vcmp.lt.s32.totalorder %v6062_v62, 0 }
 0x106   :  { %v666_v3 = vsel %vm656_vm12, %v663_v29, %v665_v24  ;;  %v670_v55 = vsel %vm656_vm12, %v667_v46, %v669_v5  ;;  %v671_v7 = vshll.u32 %v631_v17, 8  ;;  %v737_v12 = vadd.s32 1, %v6072_v34 }
 0x107   :  { %v383_v13 = vsub.s32 32, %v7140_v41  ;;  %v389_v14 = vshll.u32 %v388_v38, 23  ;;  %v659_v15 = vsel %vm655_vm9, %v639_v25, %v642_v1  ;;  %v661_v16 = vsel %vm657_vm11, %v645_v9, %v660_v51  ;;  %v7184_v38 = vpop.f32.mrf.mxu0 }
 0x108   :  { %v7170_v19 = vmul.u32.u64.low %v671_v7, %v670_v55  ;;  %v7171_v20 = vmul.u32.u64.high %v671_v7, %v670_v55, %v7170_v19  ;;  %v7173_v37 = vmul.u32.u64.low %v671_v7, %v666_v3  ;;  %v7174_v31 = vmul.u32.u64.high %v671_v7, %v666_v3, %v7173_v37  ;;  %10038 = vst [vmem:[#allocation17_spill] sm:$0xff] %v7184_v38 }
 0x109   :  { %v367_v18 = vadd.s32 %v7027_v40, %v7024_v39  ;;  %v7179_v29 = vsel %vm6063_vm13, 0, %v6062_v62  ;;  %v587_v17 = vclz %v6065_v47  ;;  %vm738_vm14 = vcmp.gt.s32.totalorder %v737_v12, 0  ;;  %v6377_v50 = vpop.f32.mrf.mxu0 }
 0x10a   :  { %v662_v34 = vsel %vm656_vm12, %v659_v15, %v661_v16  ;;  %v734_v1 = vand.u32 8388607, %v9895_v53  ;;  %v739_v9 = vsel %vm738_vm14, %v737_v12, 0  ;;  %v384_v24 = vshll.u32 %v7090_v60, %v7140_v41 }
 0x10b   :  { %v385_v46 = vshrl.u32 %v367_v18, %v383_v13  ;;  %v471_v51 = vadd.s32 %v7072_v36, %v7078_v43  ;;  %v741_v39 = vand.u32 31, %v739_v9  ;;  %v7190_v40 = vor.u32 4788187, %v389_v14 }
 0x10c   :  { %v487_v62 = vsub.s32 32, %v7179_v29  ;;  %vm680_vm15 = vc.u32 %v7171_v20, %v7173_v37  ;;  %v681_v49 = vadd.s32 1, %v7174_v31  ;;  %v491_v47 = vsub.s32 4294967266, %v7179_v29 }
 0x10d   :  { %v6066_v25 = vadd.s32 4294967294, %v587_v17  ;;  %v678_v3 = vmul.u32 %v671_v7, %v662_v34  ;;  %v742_v60 = vsub.s32 32, %v741_v39  ;;  %v735_v5 = vor.u32 8388608, %v734_v1 }
 0x10e   :  { %v682_v41 = vsel %vm680_vm15, %v681_v49, %v7174_v31  ;;  %v740_v36 = vshrl.u32 %v739_v9, 5  ;;  %v744_v43 = vshll.u32 %v9907_v54, %v741_v39  ;;  %v747_v13 = vshll.u32 %v9903_v56, %v741_v39 }
 0x10f   :  { %v683_v55 = vadd.s32 %v682_v41, %v678_v3  ;;  %v745_v12 = vshrl.u32 %v9903_v56, %v742_v60  ;;  %v750_v14 = vshll.u32 %v9900_v59, %v741_v39  ;;  %v748_v15 = vshrl.u32 %v9900_v59, %v742_v60 }
 0x110   :  { %v751_v16 = vshrl.u32 %v9905_v61, %v742_v60  ;;  %v753_v7 = vshll.u32 %v9905_v61, %v741_v39  ;;  %v754_v19 = vshrl.u32 %v9915_v63, %v742_v60  ;;  %vm6067_vm2 = vcmp.lt.s32.totalorder %v6066_v25, 0 }
 0x111   :  { %v684_v31 = vadd.s32 536870912, %v683_v55  ;;  %v756_v18 = vshll.u32 %v9915_v63, %v741_v39  ;;  %v757_v17 = vshrl.u32 %v9910_v8, %v742_v60  ;;  %v746_v34 = vor.u32 %v745_v12, %v744_v43 }
 0x112   :  { %v749_v1 = vor.u32 %v748_v15, %v747_v13  ;;  %v752_v9 = vor.u32 %v751_v16, %v750_v14  ;;  %v755_v49 = vor.u32 %v754_v19, %v753_v7  ;;  %v386_v50 = vor.u32 %v385_v46, %v384_v24 }
 0x113   :  { %v391_v3 = vand.u32 2147483647, %v7190_v40  ;;  %v489_v41 = vshrl.u32 %v471_v51, %v487_v62  ;;  %v7209_v2 = vshrl.u32 %v684_v31, 30  ;;  %v492_v53 = vadd.s32 127, %v491_v47 }
 0x114   :  { %v7211_v0 = vsel %vm6067_vm2, 0, %v6066_v25  ;;  %v758_v44 = vor.u32 %v757_v17, %v756_v18  ;;  %vm762_vm3 = vcmp.lt.s32.totalorder %v740_v36, 4  ;;  %vm759_vm4 = vcmp.lt.s32.totalorder %v740_v36, 1 }
 0x115   :  { %v686_v35 = vshll.u32 %v7209_v2, 30  ;;  %v764_v39 = vsel %vm762_vm3, %v752_v9, 2102212464  ;;  %v834_v43 = vand.u32 2139095040, %v7015_v26  ;;  %v743_v12 = vshrl.u32 %v9907_v54, %v742_v60 }
 0x116   :  { %v767_v24 = vsel %vm759_vm4, %v746_v34, %v749_v1  ;;  %v768_v46 = vsel %vm762_vm3, %v755_v49, 920167782  ;;  %v775_v51 = vshll.u32 %v735_v5, 8  ;;  %vm760_vm5 = vcmp.lt.s32.totalorder %v740_v36, 2 }
 0x117   :  { %v7218_v40 = vsub.s32 %v683_v55, %v686_v35  ;;  %vm761_vm6 = vcmp.lt.s32.totalorder %v740_v36, 3  ;;  %v771_v62 = vsel %vm759_vm4, %v749_v1, %v752_v9  ;;  %v763_v47 = vsel %vm759_vm4, %v743_v12, %v746_v34 }
 0x118   :  { %v765_v25 = vsel %vm761_vm6, %v749_v1, %v764_v39  ;;  %v769_v13 = vsel %vm761_vm6, %v752_v9, %v768_v46  ;;  %v772_v14 = vsel %vm762_vm3, %v758_v44, 1326507024  ;;  %v835_v60 = vshrl.u32 %v834_v43, 23 }
 0x119   :  { %v689_v15 = vsub.s32 0, %v7218_v40  ;;  %v770_v16 = vsel %vm760_vm5, %v767_v24, %v769_v13  ;;  %v773_v7 = vsel %vm761_vm6, %v755_v49, %v772_v14  ;;  %v493_v19 = vshll.u32 %v492_v53, 23 }
 0x11a   :  { %v774_v31 = vsel %vm760_vm5, %v771_v62, %v773_v7  ;;  %v7224_v5 = vmul.u32.u64.low %v775_v51, %v770_v16  ;;  %v7225_v35 = vmul.u32.u64.high %v775_v51, %v770_v16, %v7224_v5  ;;  %v6076_v17 = vadd.s32 4294967169, %v835_v60  ;;  %v7251_v16 = vpop.f32.mrf.mxu0 }
 0x11b   :  { %v7228_v55 = vmul.u32.u64.low %v775_v51, %v774_v31  ;;  %v7229_v18 = vmul.u32.u64.high %v775_v51, %v774_v31, %v7228_v55  ;;  %v393_v34 = vcvt.s32.f32 %v386_v50  ;;  %v488_v44 = vshll.u32 %v7125_v11, %v7179_v29  ;;  %10039 = vst [vmem:[#allocation18_spill] sm:$0xff] %v7251_v16 }
 0x11c   :  { %v595_v1 = vsub.s32 4294967266, %v7211_v0  ;;  %v766_v9 = vsel %vm760_vm5, %v763_v47, %v765_v25  ;;  %v6069_v53 = vmin.u32 %v689_v15, %v7218_v40  ;;  %v9899_v49 = vand.u32 2147483647, %v7015_v26 }
 0x11d   :  { %v841_v39 = vadd.s32 1, %v6076_v17  ;;  %v7237_v43 = vmul.f32 %v393_v34, %v391_v3  ;;  %v490_v12 = vor.u32 %v489_v41, %v488_v44  ;;  %v494_v24 = vor.u32 4788187, %v493_v19  ;;  %v6380_v44 = vpop.f32.mrf.mxu0 }
 0x11e   :  { %v785_v46 = vadd.s32 1, %v7225_v35  ;;  %v782_v62 = vmul.u32 %v775_v51, %v766_v9  ;;  %vm784_vm7 = vc.u32 %v7229_v18, %v7224_v5  ;;  %v938_v11 = vand.u32 2139095040, %v7034_v48 }
 0x11f   :  { %vm842_vm8 = vcmp.gt.s32.totalorder %v841_v39, 0  ;;  %v591_v29 = vsub.s32 32, %v7211_v0  ;;  %v596_v36 = vadd.s32 127, %v595_v1  ;;  %v691_v25 = vclz %v6069_v53 }
 0x120   :  { %v786_v50 = vsel %vm784_vm7, %v785_v46, %v7225_v35  ;;  %v843_v47 = vsel %vm842_vm8, %v841_v39, 0  ;;  %v838_v41 = vand.u32 8388607, %v9899_v49  ;;  %v395_v51 = vxor.u32 2147483648, %v7237_v43 }
 0x121   :  { %v787_v3 = vadd.s32 %v786_v50, %v782_v62  ;;  %v845_v13 = vand.u32 31, %v843_v47  ;;  %v397_v14 = vsub.s32 4, %v7067_v32  ;;  %v575_v15 = vadd.s32 %v7116_v58, %v7122_v45 }
 0x122   :  { %v495_v7 = vand.u32 2147483647, %v494_v24  ;;  %v497_v60 = vcvt.s32.f32 %v490_v12  ;;  %v939_v31 = vshrl.u32 %v938_v11, 23  ;;  %v592_v35 = vshll.u32 %v7146_v57, %v7211_v0 }
 0x123   :  { %v788_v19 = vadd.s32 536870912, %v787_v3  ;;  %v593_v55 = vshrl.u32 %v575_v15, %v591_v29  ;;  %v597_v17 = vshll.u32 %v596_v36, 23  ;;  %v846_v34 = vsub.s32 32, %v845_v13 }
 0x124   :  { %v6070_v1 = vadd.s32 4294967294, %v691_v25  ;;  %v839_v53 = vor.u32 8388608, %v838_v41  ;;  %v848_v39 = vshll.u32 %v9907_v54, %v845_v13  ;;  %v851_v45 = vshll.u32 %v9903_v56, %v845_v13 }
 0x125   :  { %v7255_v9 = vshrl.u32 %v788_v19, 30  ;;  %v849_v58 = vshrl.u32 %v9903_v56, %v846_v34  ;;  %v852_v12 = vshrl.u32 %v9900_v59, %v846_v34  ;;  %v855_v24 = vshrl.u32 %v9905_v61, %v846_v34 }
 0x126   :  { %v844_v57 = vshrl.u32 %v843_v47, 5  ;;  %v854_v46 = vshll.u32 %v9900_v59, %v845_v13  ;;  %v6080_v62 = vadd.s32 4294967169, %v939_v31  ;;  %vm313_vm9 = vcmp.lt.s32.totalorder %v6974_v27, 0 }
 0x127   :  { %v790_v0 = vshll.u32 %v7255_v9, 30  ;;  %v850_v11 = vor.u32 %v849_v58, %v848_v39  ;;  %v853_v29 = vor.u32 %v852_v12, %v851_v45  ;;  %v857_v36 = vshll.u32 %v9905_v61, %v845_v13 }
 0x128   :  { %v858_v50 = vshrl.u32 %v9915_v63, %v846_v34  ;;  %v498_v25 = vmul.f32 %v497_v60, %v495_v7  ;;  %v594_v41 = vor.u32 %v593_v55, %v592_v35  ;;  %v856_v15 = vor.u32 %v855_v24, %v854_v46 }
 0x129   :  { %v9902_v19 = vand.u32 2147483647, %v7034_v48  ;;  %v598_v44 = vor.u32 4788187, %v597_v17  ;;  %v860_v47 = vshll.u32 %v9915_v63, %v845_v13  ;;  %v861_v59 = vshrl.u32 %v9910_v8, %v846_v34 }
 0x12a   :  { %v859_v49 = vor.u32 %v858_v50, %v857_v36  ;;  %vm6071_vm10 = vcmp.lt.s32.totalorder %v6070_v1, 0  ;;  %v7270_v31 = vsub.s32 %v787_v3, %v790_v0  ;;  %vm863_vm11 = vcmp.lt.s32.totalorder %v844_v57, 1 }
 0x12b   :  { %v879_v39 = vshll.u32 %v839_v53, 8  ;;  %vm7274_vm12 = vcmp.le.f32.partialorder %v311_v28, 0.7853982  ;;  %v10040_v58 = vmov 0  ;;  %v862_v7 = vor.u32 %v861_v59, %v860_v47 }
 0x12c   :  { %v10041_v58 = vsel %vm7274_vm12, 4294967295, %v10040_v58  ;;  %vm866_vm13 = vcmp.lt.s32.totalorder %v844_v57, 4  ;;  %v871_v60 = vsel %vm863_vm11, %v850_v11, %v853_v29  ;;  %v945_v35 = vadd.s32 1, %v6080_v62 }
 0x12d   :  { %10042 = vst [vmem:[#allocation19_spill] sm:$0xff] %v10041_v58  ;;  %v847_v13 = vshrl.u32 %v9907_v54, %v846_v34  ;;  %vm865_vm14 = vcmp.lt.s32.totalorder %v844_v57, 3  ;;  %v868_v55 = vsel %vm866_vm13, %v856_v15, 2102212464  ;;  %v872_v17 = vsel %vm866_vm13, %v859_v49, 920167782 }
 0x12e   :  { %vm864_vm15 = vcmp.lt.s32.totalorder %v844_v57, 2  ;;  %v873_v3 = vsel %vm865_vm14, %v856_v15, %v872_v17  ;;  %v875_v53 = vsel %vm863_vm11, %v853_v29, %v856_v15  ;;  %v876_v45 = vsel %vm866_vm13, %v862_v7, 1326507024 }
 0x12f   :  { %v7282_v28 = vsel %vm6071_vm10, 0, %v6070_v1  ;;  %v793_v12 = vsub.s32 0, %v7270_v31  ;;  %v867_v59 = vsel %vm863_vm11, %v847_v13, %v850_v11  ;;  %v874_v24 = vsel %vm864_vm15, %v871_v60, %v873_v3 }
 0x130   :  { %v869_v0 = vsel %vm865_vm14, %v853_v29, %v868_v55  ;;  %v877_v46 = vsel %vm865_vm14, %v859_v49, %v876_v45  ;;  %v7287_v34 = vmul.u32.u64.low %v879_v39, %v874_v24  ;;  %v7288_v62 = vmul.u32.u64.high %v879_v39, %v874_v24, %v7287_v34 }
 0x131   :  { %v396_v36 = vsel %vm313_vm9, %v395_v51, %v7237_v43  ;;  %v499_v1 = vxor.u32 2147483648, %v498_v25  ;;  %v878_v50 = vsel %vm864_vm15, %v875_v53, %v877_v46  ;;  %vm946_vm2 = vcmp.gt.s32.totalorder %v945_v35, 0 }
 0x132   :  { %v599_v15 = vand.u32 2147483647, %v598_v44  ;;  %v7297_v11 = vmul.u32.u64.low %v879_v39, %v878_v50  ;;  %v7298_v47 = vmul.u32.u64.high %v879_v39, %v878_v50, %v7297_v11  ;;  %v947_v29 = vsel %vm946_vm2, %v945_v35, 0 }
 0x133   :  { %v699_v49 = vsub.s32 4294967266, %v7282_v28  ;;  %v870_v7 = vsel %vm864_vm15, %v867_v59, %v869_v0  ;;  %v942_v60 = vand.u32 8388607, %v9902_v19  ;;  %v949_v13 = vand.u32 31, %v947_v29 }
 0x134   :  { %vm9961_vm3 = vcmp.lt.s32.totalorder %v6980_v33, 0  ;;  %v601_v43 = vcvt.s32.f32 %v594_v41  ;;  %v6073_v51 = vmin.u32 %v793_v12, %v7270_v31  ;;  %v889_v55 = vadd.s32 1, %v7288_v62 }
 0x135   :  { %v7312_v44 = vsel %vm313_vm9, %v397_v14, %v7067_v32  ;;  %v7317_v57 = vsel %vm7274_vm12, %v6974_v27, %v396_v36  ;;  %v7321_v35 = vsel %vm9961_vm3, %v499_v1, %v498_v25  ;;  %v950_v41 = vsub.s32 32, %v949_v13  ;;  %v7329_v32 = vpop.f32.mrf.mxu0 }
 0x136   :  { %10043 = vst [vmem:[#allocation20_spill] sm:$0xff] %v7312_v44  ;;  %v7323_v17 = vmul.f32 %v601_v43, %v599_v15  ;;  %v679_v3 = vadd.s32 %v7173_v37, %v7171_v20  ;;  %v886_v53 = vmul.u32 %v879_v39, %v870_v7  ;;  %vm888_vm4 = vc.u32 %v7298_v47, %v7287_v34 }
 0x137   :  { %10044 = vst [vmem:[#allocation21_spill] sm:$0xff] %v7329_v32  ;;  %v695_v14 = vsub.s32 32, %v7282_v28  ;;  %v700_v45 = vadd.s32 127, %v699_v49  ;;  %v890_v12 = vsel %vm888_vm4, %v889_v55, %v7288_v62  ;;  %v943_v59 = vor.u32 8388608, %v942_v60  ;;  %v6383_v1 = vpop.f32.mrf.mxu0 }
 0x138   :  { %v795_v25 = vclz %v6073_v51  ;;  %v891_v24 = vadd.s32 %v890_v12, %v886_v53  ;;  %v953_v0 = vshrl.u32 %v9903_v56, %v950_v41  ;;  %v10045_v46 = vmov 2131351028  }
 0x139   :  { %v956_v36 = vshrl.u32 %v10045_v46, %v950_v41  ;;  %v952_v20 = vshll.u32 %v9907_v54, %v949_v13  ;;  %v955_v37 = vshll.u32 %v9903_v56, %v949_v13  ;;  %v958_v39 = vshll.u32 %v10045_v46, %v949_v13 }
 0x13a   :  { %v959_v50 = vshrl.u32 %v9905_v61, %v950_v41  ;;  %v892_v15 = vadd.s32 536870912, %v891_v24  ;;  %v948_v11 = vshrl.u32 %v947_v29, 5  ;;  %v961_v62 = vshll.u32 %v9905_v61, %v949_v13 }
 0x13b   :  { %v962_v49 = vshrl.u32 %v9915_v63, %v950_v41  ;;  %v954_v7 = vor.u32 %v953_v0, %v952_v20  ;;  %v957_v60 = vor.u32 %v956_v36, %v955_v37  ;;  %v7341_v51 = vshll.u32 %v943_v59, 8 }
 0x13c   :  { %v960_v43 = vor.u32 %v959_v50, %v958_v39  ;;  %v7343_v55 = vshrl.u32 %v892_v15, 30  ;;  %v964_v12 = vshll.u32 %v9915_v63, %v949_v13  ;;  %v965_v1 = vshrl.u32 %v9910_v8, %v950_v41 }
 0x13d   :  { %v963_v53 = vor.u32 %v962_v49, %v961_v62  ;;  %v696_v19 = vshll.u32 %v7218_v40, %v7282_v28  ;;  %v697_v29 = vshrl.u32 %v679_v3, %v695_v14  ;;  %v701_v56 = vshll.u32 %v700_v45, 23 }
 0x13e   :  { %v6074_v61 = vadd.s32 4294967294, %v795_v25  ;;  %v10046_v54 = vand.u32 2147483647, %v6980_v33  ;;  %v10047_v0 = vmov 0  ;;  %v894_v59 = vshll.u32 %v7343_v55, 30 }
 0x13f   :  { %v966_v36 = vor.u32 %v965_v1, %v964_v12  ;;  %vm967_vm6 = vcmp.lt.s32.totalorder %v948_v11, 1  ;;  %vm970_vm7 = vcmp.lt.s32.totalorder %v948_v11, 4  ;;  %vm969_vm8 = vcmp.lt.s32.totalorder %v948_v11, 3 }
 0x140   :  { %vm7351_vm5 = vcmp.le.f32.partialorder %v10046_v54, 0.7853982  ;;  %v975_v13 = vsel %vm967_vm6, %v954_v7, %v957_v60  ;;  %v976_v20 = vsel %vm970_vm7, %v963_v53, 920167782  ;;  %v1042_v40 = vand.u32 2139095040, %v7050_v6 }
 0x141   :  { %v10048_v0 = vsel %vm7351_vm5, 4294967295, %v10047_v0  ;;  %v7358_v28 = vsub.s32 %v891_v24, %v894_v59  ;;  %vm968_vm9 = vcmp.lt.s32.totalorder %v948_v11, 2  ;;  %v972_v3 = vsel %vm970_vm7, %v960_v43, 2102212464 }
 0x142   :  { %10049 = vst [vmem:[#allocation22_spill] sm:$0xff] %v10048_v0  ;;  %v977_v54 = vsel %vm969_vm8, %v960_v43, %v976_v20  ;;  %vm6075_vm10 = vcmp.lt.s32.totalorder %v6074_v61, 0  ;;  %v10050_v14 = vmov 683565275   ;;  %v979_v37 = vsel %vm967_vm6, %v957_v60, %v960_v43 }
 0x143   :  { %v951_v45 = vshrl.u32 %v10050_v14, %v950_v41  ;;  %v978_v25 = vsel %vm968_vm9, %v975_v13, %v977_v54  ;;  %v897_v39 = vsub.s32 0, %v7358_v28  ;;  %v980_v50 = vsel %vm970_vm7, %v966_v36, 1326507024 }
 0x144   :  { %v7366_v15 = vmul.u32.u64.low %v7341_v51, %v978_v25  ;;  %v7367_v62 = vmul.u32.u64.high %v7341_v51, %v978_v25, %v7366_v15  ;;  %vm521_vm11 = vcmp.lt.s32.totalorder %v6988_v42, 0  ;;  %v973_v49 = vsel %vm969_vm8, %v957_v60, %v972_v3 }
 0x145   :  { %v971_v24 = vsel %vm967_vm6, %v951_v45, %v954_v7  ;;  %v981_v41 = vsel %vm969_vm8, %v963_v53, %v980_v50  ;;  %v1043_v12 = vshrl.u32 %v1042_v40, 23  ;;  %v698_v1 = vor.u32 %v697_v29, %v696_v19 }
 0x146   :  { %v702_v59 = vor.u32 4788187, %v701_v56  ;;  %v6077_v43 = vmin.u32 %v897_v39, %v7358_v28  ;;  %v982_v36 = vsel %vm968_vm9, %v979_v37, %v981_v41  ;;  %v7377_v13 = vsel %vm6075_vm10, 0, %v6074_v61 }
 0x147   :  { %v7380_v20 = vmul.u32.u64.low %v7341_v51, %v982_v36  ;;  %v7381_v54 = vmul.u32.u64.high %v7341_v51, %v982_v36, %v7380_v20  ;;  %v6084_v25 = vadd.s32 4294967169, %v1043_v12  ;;  %v974_v60 = vsel %vm968_vm9, %v971_v24, %v973_v49 }
 0x148   :  { %v899_v7 = vclz %v6077_v43  ;;  %v993_v53 = vadd.s32 1, %v7367_v62  ;;  %v9909_v19 = vand.u32 2147483647, %v7050_v6  ;;  %6633 = vcosq.f32 %v7317_v57 }
 0x149   :  { %v7391_v56 = vsel %vm7351_vm5, %v6980_v33, %v7321_v35  ;;  %v605_v61 = vsub.s32 4, %v7136_v30  ;;  %v1049_v29 = vadd.s32 1, %v6084_v25  ;;  %v603_v40 = vxor.u32 2147483648, %v7323_v17 }
 0x14a   :  { %v703_v3 = vand.u32 2147483647, %v702_v59  ;;  %v705_v11 = vcvt.s32.f32 %v698_v1  ;;  %v799_v45 = vsub.s32 32, %v7377_v13  ;;  %v803_v37 = vsub.s32 4294967266, %v7377_v13  ;;  %v7406_v59 = vpop.f32.mrf.mxu0 }
 0x14b   :  { %v990_v39 = vmul.u32 %v7341_v51, %v974_v60  ;;  %vm992_vm13 = vc.u32 %v7381_v54, %v7366_v15  ;;  %vm1050_vm14 = vcmp.gt.s32.totalorder %v1049_v29, 0  ;;  %v6078_v50 = vadd.s32 4294967294, %v899_v7  ;;  %10051 = vst [vmem:[#allocation23_spill] sm:$0xff] %v7406_v59 }
 0x14c   :  { %v994_v35 = vsel %vm992_vm13, %v993_v53, %v7367_v62  ;;  %v1046_v24 = vand.u32 8388607, %v9909_v19  ;;  %v1051_v49 = vsel %vm1050_vm14, %v1049_v29, 0  ;;  %6635 = vsinq.f32 %v7317_v57  ;;  %v6386_v20 = vpop.f32.mrf.mxu0 }
 0x14d   :  { %v783_v41 = vadd.s32 %v7224_v5, %v7229_v18  ;;  %v995_v12 = vadd.s32 %v994_v35, %v990_v39  ;;  %v1053_v1 = vand.u32 31, %v1051_v49  ;;  %6637 = vcosq.f32 %v7391_v56 }
 0x14e   :  { %v7412_v51 = vsel %vm521_vm11, %v603_v40, %v7323_v17  ;;  %v7417_v62 = vsel %vm521_vm11, %v605_v61, %v7136_v30  ;;  %v7419_v57 = vmul.f32 %v705_v11, %v703_v3  ;;  %v804_v25 = vadd.s32 127, %v803_v37 }
 0x14f   :  { %10052 = vst [vmem:[#allocation24_spill] sm:$0xff] %v7417_v62  ;;  %v7423_v18 = vshrl.u32 %v783_v41, %v799_v45  ;;  %v996_v43 = vadd.s32 536870912, %v995_v12  ;;  %v1054_v36 = vsub.s32 32, %v1053_v1  ;;  %vm6079_vm15 = vcmp.lt.s32.totalorder %v6078_v50, 0 }
 0x150   :  { %v1047_v7 = vor.u32 8388608, %v1046_v24  ;;  %v1146_v17 = vand.u32 2139095040, %v7063_v23  ;;  %v1056_v30 = vshll.u32 %v10050_v14, %v1053_v1  ;;  %v10053_v53 = vmov 2475754826  }
 0x151   :  { %v7426_v60 = vshrl.u32 %v996_v43, 30  ;;  %v1057_v61 = vshrl.u32 %v10053_v53, %v1054_v36  ;;  %v1060_v29 = vshrl.u32 %v10045_v46, %v1054_v36  ;;  %v1059_v40 = vshll.u32 %v10053_v53, %v1053_v1 }
 0x152   :  { %v10054_v3 = vmov 2102212464   ;;  %v1066_v37 = vshrl.u32 %v9915_v63, %v1054_v36  ;;  %v7435_v39 = vsel %vm6079_vm15, 0, %v6078_v50  ;;  %v1052_v24 = vshrl.u32 %v1051_v49, 5 }
 0x153   :  { %v1063_v11 = vshrl.u32 %v10054_v3, %v1054_v36  ;;  %v1065_v45 = vshll.u32 %v10054_v3, %v1053_v1  ;;  %v998_v35 = vshll.u32 %v7426_v60, 30  ;;  %v1062_v41 = vshll.u32 %v10045_v46, %v1053_v1 }
 0x154   :  { %v10055_v43 = vand.u32 2147483647, %v6988_v42  ;;  %v10056_v20 = vmov 0  ;;  %v805_v19 = vshll.u32 %v804_v25, 23  ;;  %v1058_v5 = vor.u32 %v1057_v61, %v1056_v30 }
 0x155   :  { %v1061_v8 = vor.u32 %v1060_v29, %v1059_v40  ;;  %v1067_v27 = vor.u32 %v1066_v37, %v1065_v45  ;;  %v7445_v58 = vsub.s32 %v995_v12, %v998_v35  ;;  %v1064_v63 = vor.u32 %v1063_v11, %v1062_v41  ;;  %v7449_v49 = vpop.eup %6633 }
 0x156   :  { %vm7441_vm2 = vcmp.le.f32.partialorder %v10055_v43, 0.7853982  ;;  %v10059_v50 = vmov 920167782   ;;  %v10060_v62 = vmov 1326507024   ;;  %6639 = vsinq.f32 %v7391_v56 }
 0x157   :  { %v10057_v20 = vsel %vm7441_vm2, 4294967295, %v10056_v20  ;;  %v1068_v44 = vshll.u32 %v10059_v50, %v1053_v1  ;;  %v1069_v0 = vshrl.u32 %v10060_v62, %v1054_v36  ;;  %10061 = vst [vmem:[#allocation26_spill] sm:$0xff] %v7449_v49  ;;  %v907_v33 = vsub.s32 4294967266, %v7435_v39 }
 0x158   :  { %10058 = vst [vmem:[#allocation25_spill] sm:$0xff] %v10057_v20  ;;  %v1087_v22 = vshll.u32 %v1047_v7, 8  ;;  %v1147_v59 = vshrl.u32 %v1146_v17, 23  ;;  %v1001_v25 = vsub.s32 0, %v7445_v58  ;;  %vm1071_vm4 = vcmp.lt.s32.totalorder %v1052_v24, 1 }
 0x159   :  { %v1070_v30 = vor.u32 %v1069_v0, %v1068_v44  ;;  %vm1074_vm6 = vcmp.lt.s32.totalorder %v1052_v24, 4  ;;  %vm1072_vm7 = vcmp.lt.s32.totalorder %v1052_v24, 2  ;;  %vm1073_vm8 = vcmp.lt.s32.totalorder %v1052_v24, 3  ;;  %v7458_v11 = vpop.eup %6635 }
 0x15a   :  { %v1079_v12 = vsel %vm1071_vm4, %v1058_v5, %v1061_v8  ;;  %v1080_v1 = vsel %vm1074_vm6, %v1067_v27, 920167782  ;;  %v6081_v61 = vmin.u32 %v1001_v25, %v7445_v58  ;;  %v1076_v29 = vsel %vm1074_vm6, %v1064_v63, 2102212464  ;;  %10062 = vst [vmem:[#allocation27_spill] sm:$0xff] %v7458_v11  ;;  %v7462_v37 = vpop.eup %6637 }
 0x15b   :  { %v1081_v40 = vsel %vm1073_vm8, %v1064_v63, %v1080_v1  ;;  %v1083_v7 = vsel %vm1071_vm4, %v1061_v8, %v1064_v63  ;;  %v1055_v17 = vshrl.u32 %v10050_v14, %v1054_v36  ;;  %v1084_v0 = vsel %vm1074_vm6, %v1070_v30, 1326507024  ;;  %10063 = vst [vmem:[#allocation28_spill] sm:$0xff] %v7462_v37 }
 0x15c   :  { %v1082_v44 = vsel %vm1072_vm7, %v1079_v12, %v1081_v40  ;;  %v6088_v45 = vadd.s32 4294967169, %v1147_v59  ;;  %vm625_vm9 = vcmp.lt.s32.totalorder %v6994_v52, 0  ;;  %v1003_v35 = vclz %v6081_v61 }
 0x15d   :  { %v1085_v41 = vsel %vm1073_vm8, %v1067_v27, %v1084_v0  ;;  %v7466_v25 = vmul.u32.u64.low %v1087_v22, %v1082_v44  ;;  %v7467_v43 = vmul.u32.u64.high %v1087_v22, %v1082_v44, %v7466_v25  ;;  %v806_v63 = vor.u32 4788187, %v805_v19 }
 0x15e   :  { %v1075_v1 = vsel %vm1071_vm4, %v1055_v17, %v1058_v5  ;;  %v1077_v36 = vsel %vm1073_vm8, %v1061_v8, %v1076_v29  ;;  %v1086_v12 = vsel %vm1072_vm7, %v1083_v7, %v1085_v41  ;;  %v607_v59 = vsel %vm7441_vm2, %v6988_v42, %v7412_v51 }
 0x15f   :  { %v908_v30 = vadd.s32 127, %v907_v33  ;;  %v7477_v61 = vmul.u32.u64.low %v1087_v22, %v1086_v12  ;;  %v7478_v40 = vmul.u32.u64.high %v1087_v22, %v1086_v12, %v7477_v61  ;;  %v10064_v19 = vshll.u32 %v7270_v31, %v7377_v13 }
 0x160   :  { %v1153_v5 = vadd.s32 1, %v6088_v45  ;;  %v6082_v29 = vadd.s32 4294967294, %v1003_v35  ;;  %v1078_v7 = vsel %vm1072_vm7, %v1075_v1, %v1077_v36  ;;  %v1097_v17 = vadd.s32 1, %v7467_v43  ;;  %v7496_v35 = vpop.f32.mrf.mxu0 }
 0x161   :  { %v802_v8 = vor.u32 %v7423_v18, %v10064_v19  ;;  %v10065_v33 = vand.u32 2147483647, %v7063_v23  ;;  %6641 = vcosq.f32 %v607_v59  ;;  %v707_v44 = vxor.u32 2147483648, %v7419_v57  ;;  %10066 = vst [vmem:[#allocation29_spill] sm:$0xff] %v7496_v35 }
 0x162   :  { %v807_v56 = vand.u32 2147483647, %v806_v63  ;;  %vm1154_vm10 = vcmp.gt.s32.totalorder %v1153_v5, 0  ;;  %6643 = vsinq.f32 %v607_v59  ;;  %v887_v31 = vadd.s32 %v7287_v34, %v7298_v47  ;;  %v6389_v12 = vpop.f32.mrf.mxu0 }
 0x163   :  { %v1150_v51 = vand.u32 8388607, %v10065_v33  ;;  %v903_v13 = vsub.s32 32, %v7435_v39  ;;  %v909_v18 = vshll.u32 %v908_v30, 23  ;;  %v809_v0 = vcvt.s32.f32 %v802_v8 }
 0x164   :  { %v1094_v24 = vmul.u32 %v1087_v22, %v1078_v7  ;;  %vm1096_vm11 = vc.u32 %v7478_v40, %v7466_v25  ;;  %v1155_v45 = vsel %vm1154_vm10, %v1153_v5, 0  ;;  %vm6083_vm13 = vcmp.lt.s32.totalorder %v6082_v29, 0 }
 0x165   :  { %v1098_v41 = vsel %vm1096_vm11, %v1097_v17, %v7467_v43  ;;  %v1151_v63 = vor.u32 8388608, %v1150_v51  ;;  %v9923_v1 = vand.u32 2147483647, %v7097_v4  ;;  %v7503_v34 = vsel %vm625_vm9, %v707_v44, %v7419_v57 }
 0x166   :  { %v7505_v47 = vmul.f32 %v809_v0, %v807_v56  ;;  %v1099_v22 = vadd.s32 %v1098_v41, %v1094_v24  ;;  %v1157_v36 = vand.u32 31, %v1155_v45  ;;  %v904_v59 = vshll.u32 %v7358_v28, %v7435_v39 }
 0x167   :  { %v905_v30 = vshrl.u32 %v887_v31, %v903_v13  ;;  %v7509_v61 = vor.u32 4788187, %v909_v18  ;;  %v991_v43 = vadd.s32 %v7366_v15, %v7381_v54  ;;  %v7513_v19 = vsel %vm6083_vm13, 0, %v6082_v29 }
 0x168   :  { %v1100_v8 = vadd.s32 536870912, %v1099_v22  ;;  %v1158_v5 = vsub.s32 32, %v1157_v36  ;;  %v1250_v57 = vand.u32 2139095040, %v7097_v4  ;;  %v1156_v7 = vshrl.u32 %v1155_v45, 5  ;;  %v7533_v45 = vpop.eup %6639 }
 0x169   :  { %v1160_v17 = vshll.u32 %v10050_v14, %v1157_v36  ;;  %v7517_v33 = vshll.u32 %v1151_v63, 8  ;;  %v7521_v28 = vand.u32 8388607, %v9923_v1  ;;  %v1163_v15 = vshll.u32 %v10053_v53, %v1157_v36 }
 0x16a   :  { %v7523_v39 = vshrl.u32 %v1100_v8, 30  ;;  %v1161_v51 = vshrl.u32 %v10053_v53, %v1158_v5  ;;  %v1164_v54 = vshrl.u32 %v10045_v46, %v1158_v5  ;;  %v1166_v29 = vshll.u32 %v10045_v46, %v1157_v36 }
 0x16b   :  { %v1167_v44 = vshrl.u32 %v10054_v3, %v1158_v5  ;;  %v1169_v56 = vshll.u32 %v10054_v3, %v1157_v36  ;;  %v1170_v31 = vshrl.u32 %v10059_v50, %v1158_v5  ;;  %v1251_v24 = vshrl.u32 %v1250_v57, 23 }
 0x16c   :  { %v1102_v13 = vshll.u32 %v7523_v39, 30  ;;  %v1162_v18 = vor.u32 %v1161_v51, %v1160_v17  ;;  %v1165_v0 = vor.u32 %v1164_v54, %v1163_v15  ;;  %v1172_v12 = vshll.u32 %v10059_v50, %v1157_v36 }
 0x16d   :  { %v1168_v41 = vor.u32 %v1167_v44, %v1166_v29  ;;  %v1171_v63 = vor.u32 %v1170_v31, %v1169_v56  ;;  %v1173_v8 = vshrl.u32 %v10060_v62, %v1158_v5  ;;  %v1007_v1 = vsub.s32 32, %v7513_v19 }
 0x16e   :  { %v1011_v27 = vsub.s32 4294967266, %v7513_v19  ;;  %v7539_v49 = vsub.s32 %v1099_v22, %v1102_v13  ;;  %vm1175_vm14 = vcmp.lt.s32.totalorder %v1156_v7, 1  ;;  %v7541_v11 = vpop.eup %6641  ;;  %v1159_v17 = vshrl.u32 %v10050_v14, %v1158_v5 }
 0x16f   :  { %10067 = vst [vmem:[#allocation30_spill] sm:$0xff] %v7541_v11  ;;  %v1174_v57 = vor.u32 %v1173_v8, %v1172_v12  ;;  %vm1177_vm15 = vcmp.lt.s32.totalorder %v1156_v7, 3  ;;  %vm1178_vm4 = vcmp.lt.s32.totalorder %v1156_v7, 4  ;;  %v7544_v51 = vpop.eup %6643  ;;  %v1183_v54 = vsel %vm1175_vm14, %v1162_v18, %v1165_v0 }
 0x170   :  { %10068 = vst [vmem:[#allocation31_spill] sm:$0xff] %v7544_v51  ;;  %v1105_v36 = vsub.s32 0, %v7539_v49  ;;  %v1180_v15 = vsel %vm1178_vm4, %v1168_v41, 2102212464  ;;  %v1184_v29 = vsel %vm1178_vm4, %v1171_v63, 920167782  ;;  %v1187_v56 = vsel %vm1175_vm14, %v1165_v0, %v1168_v41 }
 0x171   :  { %v10069_v44 = vand.u32 2147483647, %v6994_v52  ;;  %v10070_v22 = vmov 0  ;;  %vm729_vm7 = vcmp.lt.s32.totalorder %v7007_v10, 0  ;;  %vm1176_vm8 = vcmp.lt.s32.totalorder %v1156_v7, 2 }
 0x172   :  { %v1185_v5 = vsel %vm1177_vm15, %v1168_v41, %v1184_v29  ;;  %v6092_v31 = vadd.s32 4294967169, %v1251_v24  ;;  %v6085_v13 = vmin.u32 %v1105_v36, %v7539_v49  ;;  %v1179_v12 = vsel %vm1175_vm14, %v1159_v17, %v1162_v18 }
 0x173   :  { %vm7550_vm6 = vcmp.le.f32.partialorder %v10069_v44, 0.7853982  ;;  %v1186_v8 = vsel %vm1176_vm8, %v1183_v54, %v1185_v5  ;;  %v1188_v42 = vsel %vm1178_vm4, %v1174_v57, 1326507024  ;;  %v1181_v44 = vsel %vm1177_vm15, %v1165_v0, %v1180_v15 }
 0x174   :  { %v10071_v22 = vsel %vm7550_vm6, 4294967295, %v10070_v22  ;;  %v1189_v11 = vsel %vm1177_vm15, %v1171_v63, %v1188_v42  ;;  %v7563_v51 = vmul.u32.u64.low %v7517_v33, %v1186_v8  ;;  %v7564_v20 = vmul.u32.u64.high %v7517_v33, %v1186_v8, %v7563_v51 }
 0x175   :  { %10072 = vst [vmem:[#allocation32_spill] sm:$0xff] %v10071_v22  ;;  %v1009_v29 = vshrl.u32 %v991_v43, %v1007_v1  ;;  %v1012_v37 = vadd.s32 127, %v1011_v27  ;;  %v1107_v41 = vclz %v6085_v13  ;;  %v1190_v24 = vsel %vm1176_vm8, %v1187_v56, %v1189_v11  ;;  %v7602_v13 = vpop.f32.mrf.mxu0 }
 0x176   :  { %v906_v36 = vor.u32 %v905_v30, %v904_v59  ;;  %v7569_v18 = vmul.u32.u64.low %v7517_v33, %v1190_v24  ;;  %v7570_v17 = vmul.u32.u64.high %v7517_v33, %v1190_v24, %v7569_v18  ;;  %v1257_v57 = vadd.s32 1, %v6092_v31  ;;  %10073 = vst [vmem:[#allocation33_spill] sm:$0xff] %v7602_v13 }
 0x177   :  { %v811_v0 = vxor.u32 2147483648, %v7505_v47  ;;  %v1008_v42 = vshll.u32 %v7445_v58, %v7513_v19  ;;  %v6086_v63 = vadd.s32 4294967294, %v1107_v41  ;;  %v1182_v15 = vsel %vm1176_vm8, %v1179_v12, %v1181_v44  ;;  %v6392_v24 = vpop.f32.mrf.mxu0 }
 0x178   :  { %v911_v1 = vand.u32 2147483647, %v7509_v61  ;;  %v1201_v27 = vadd.s32 1, %v7564_v20  ;;  %v1255_v11 = vor.u32 8388608, %v7521_v28  ;;  %vm1258_vm10 = vcmp.gt.s32.totalorder %v1257_v57, 0 }
 0x179   :  { %v7579_v59 = vor.u32 %v1009_v29, %v1008_v42  ;;  %v1013_v30 = vshll.u32 %v1012_v37, 23  ;;  %vm6087_vm11 = vcmp.lt.s32.totalorder %v6086_v63, 0  ;;  %v1259_v43 = vsel %vm1258_vm10, %v1257_v57, 0 }
 0x17a   :  { %v913_v5 = vcvt.s32.f32 %v906_v36  ;;  %v1198_v58 = vmul.u32 %v7517_v33, %v1182_v15  ;;  %vm1200_vm13 = vc.u32 %v7570_v17, %v7563_v51  ;;  %v7589_v61 = vsel %vm7550_vm6, %v6994_v52, %v7503_v34 }
 0x17b   :  { %v7594_v37 = vsel %vm729_vm7, %v811_v0, %v7505_v47  ;;  %v1202_v19 = vsel %vm1200_vm13, %v1201_v27, %v7564_v20  ;;  %v1354_v7 = vand.u32 2139095040, %v7132_v21  ;;  %v7600_v33 = vsel %vm6087_vm11, 0, %v6086_v63 }
 0x17c   :  { %v7598_v28 = vmul.f32 %v913_v5, %v911_v1  ;;  %v1203_v56 = vadd.s32 %v1202_v19, %v1198_v58  ;;  %v1261_v31 = vand.u32 31, %v1259_v43  ;;  %v7604_v12 = vor.u32 4788187, %v1013_v30 }
 0x17d   :  { %v1095_v47 = vadd.s32 %v7466_v25, %v7478_v40  ;;  %v7609_v8 = vshll.u32 %v1255_v11, 8  ;;  %v1260_v44 = vshrl.u32 %v1259_v43, 5  ;;  %v1111_v36 = vsub.s32 32, %v7600_v33 }
 0x17e   :  { %v1204_v20 = vadd.s32 536870912, %v1203_v56  ;;  %v1262_v29 = vsub.s32 32, %v1261_v31  ;;  %v1115_v18 = vsub.s32 4294967266, %v7600_v33  ;;  %v1264_v57 = vshll.u32 %v10050_v14, %v1261_v31 }
 0x17f   :  { %v1355_v0 = vshrl.u32 %v1354_v7, 23  ;;  %v1267_v25 = vshll.u32 %v10053_v53, %v1261_v31  ;;  %v1270_v15 = vshll.u32 %v10045_v46, %v1261_v31  ;;  %v1273_v27 = vshll.u32 %v10054_v3, %v1261_v31 }
 0x180   :  { %v7615_v42 = vshrl.u32 %v1204_v20, 30  ;;  %v1265_v63 = vshrl.u32 %v10053_v53, %v1262_v29  ;;  %v1268_v40 = vshrl.u32 %v10045_v46, %v1262_v29  ;;  %v1271_v1 = vshrl.u32 %v10054_v3, %v1262_v29 }
 0x181   :  { %v1274_v11 = vshrl.u32 %v10059_v50, %v1262_v29  ;;  %vm1279_vm14 = vcmp.lt.s32.totalorder %v1260_v44, 1  ;;  %v1116_v58 = vadd.s32 127, %v1115_v18  ;;  %vm1280_vm15 = vcmp.lt.s32.totalorder %v1260_v44, 2 }
 0x182   :  { %v1206_v30 = vshll.u32 %v7615_v42, 30  ;;  %v1266_v43 = vor.u32 %v1265_v63, %v1264_v57  ;;  %v1269_v5 = vor.u32 %v1268_v40, %v1267_v25  ;;  %v1272_v19 = vor.u32 %v1271_v1, %v1270_v15 }
 0x183   :  { %v1275_v7 = vor.u32 %v1274_v11, %v1273_v27  ;;  %v1276_v24 = vshll.u32 %v10059_v50, %v1261_v31  ;;  %v1277_v54 = vshrl.u32 %v10060_v62, %v1262_v29  ;;  %vm1282_vm4 = vcmp.lt.s32.totalorder %v1260_v44, 4 }
 0x184   :  { %v7625_v20 = vsub.s32 %v1203_v56, %v1206_v30  ;;  %v1113_v34 = vshrl.u32 %v1095_v47, %v1111_v36  ;;  %vm1281_vm8 = vcmp.lt.s32.totalorder %v1260_v44, 3  ;;  %v1287_v41 = vsel %vm1279_vm14, %v1266_v43, %v1269_v5 }
 0x185   :  { %v1288_v22 = vsel %vm1282_vm4, %v1275_v7, 920167782  ;;  %v10074_v57 = vand.u32 2147483647, %v7007_v10  ;;  %v10075_v63 = vmov 0  ;;  %v1278_v56 = vor.u32 %v1277_v54, %v1276_v24 }
 0x186   :  { %v1209_v18 = vsub.s32 0, %v7625_v20  ;;  %v1284_v25 = vsel %vm1282_vm4, %v1272_v19, 2102212464  ;;  %v1289_v31 = vsel %vm1281_vm8, %v1272_v19, %v1288_v22  ;;  %v1117_v40 = vshll.u32 %v1116_v58, 23 }
 0x187   :  { %vm7632_vm10 = vcmp.le.f32.partialorder %v10074_v57, 0.7853982  ;;  %v1263_v15 = vshrl.u32 %v10050_v14, %v1262_v29  ;;  %v1290_v47 = vsel %vm1280_vm15, %v1287_v41, %v1289_v31  ;;  %v1291_v36 = vsel %vm1279_vm14, %v1269_v5, %v1272_v19 }
 0x188   :  { %v10076_v63 = vsel %vm7632_vm10, 4294967295, %v10075_v63  ;;  %v6089_v1 = vmin.u32 %v1209_v18, %v7625_v20  ;;  %v1292_v27 = vsel %vm1282_vm4, %v1278_v56, 1326507024  ;;  %vm833_vm11 = vcmp.lt.s32.totalorder %v7015_v26, 0 }
 0x189   :  { %10077 = vst [vmem:[#allocation34_spill] sm:$0xff] %v10076_v63  ;;  %v7643_v11 = vmul.u32.u64.low %v7609_v8, %v1290_v47  ;;  %v7644_v30 = vmul.u32.u64.high %v7609_v8, %v1290_v47, %v7643_v11  ;;  %v1283_v54 = vsel %vm1279_vm14, %v1263_v15, %v1266_v43  ;;  %v1285_v22 = vsel %vm1281_vm8, %v1269_v5, %v1284_v25 }
 0x18a   :  { %v1293_v29 = vsel %vm1281_vm8, %v1275_v7, %v1292_v27  ;;  %v6096_v58 = vadd.s32 4294967169, %v1355_v0  ;;  %v1015_v41 = vand.u32 2147483647, %v7604_v12  ;;  %v1112_v19 = vshll.u32 %v7539_v49, %v7600_v33 }
 0x18b   :  { %v1211_v24 = vclz %v6089_v1  ;;  %v1294_v57 = vsel %vm1280_vm15, %v1291_v36, %v1293_v29  ;;  %v1118_v18 = vor.u32 4788187, %v1117_v40  ;;  %v1286_v5 = vsel %vm1280_vm15, %v1283_v54, %v1285_v22 }
 0x18c   :  { %v7656_v56 = vmul.u32.u64.low %v7609_v8, %v1294_v57  ;;  %v7657_v31 = vmul.u32.u64.high %v7609_v8, %v1294_v57, %v7656_v56  ;;  %v1361_v47 = vadd.s32 1, %v6096_v58  ;;  %v1305_v7 = vadd.s32 1, %v7644_v30 }
 0x18d   :  { %v6090_v43 = vadd.s32 4294967294, %v1211_v24  ;;  %v10078_v0 = vand.u32 2147483647, %v7132_v21  ;;  %v10079_v49 = vsub.s32 4, %v7209_v2  ;;  %6645 = vcosq.f32 %v7589_v61 }
 0x18e   :  { %v1114_v25 = vor.u32 %v1113_v34, %v1112_v19  ;;  %vm1362_vm13 = vcmp.gt.s32.totalorder %v1361_v47, 0  ;;  %v915_v40 = vxor.u32 2147483648, %v7598_v28  ;;  %v10080_v44 = vcvt.s32.f32 %v7579_v59 }
 0x18f   :  { %v1358_v12 = vand.u32 8388607, %v10078_v0  ;;  %v7668_v33 = vsel %vm625_vm9, %v10079_v49, %v7209_v2  ;;  %vm6091_vm14 = vcmp.lt.s32.totalorder %v6090_v43, 0  ;;  %v1363_v36 = vsel %vm1362_vm13, %v1361_v47, 0 }
 0x190   :  { %v7674_v15 = vmul.f32 %v10080_v44, %v1015_v41  ;;  %v7680_v1 = vsel %vm7632_vm10, %v7007_v10, %v7594_v37  ;;  %v1119_v2 = vand.u32 2147483647, %v1118_v18  ;;  %v1302_v27 = vmul.u32 %v7609_v8, %v1286_v5  ;;  %v7694_v37 = vpop.f32.mrf.mxu0 }
 0x191   :  { %vm1304_vm9 = vc.u32 %v7657_v31, %v7643_v11  ;;  %6647 = vsinq.f32 %v7589_v61  ;;  %v10081_v59 = vsub.s32 4, %v7255_v9  ;;  %v1359_v22 = vor.u32 8388608, %v1358_v12  ;;  %10083 = vst [vmem:[#allocation36_spill] sm:$0xff] %v7694_v37 }
 0x192   :  { %v1306_v54 = vsel %vm1304_vm9, %v1305_v7, %v7644_v30  ;;  %v1121_v29 = vcvt.s32.f32 %v1114_v25  ;;  %v7696_v58 = vsel %vm6091_vm14, 0, %v6090_v43  ;;  %v1365_v41 = vand.u32 31, %v1363_v36  ;;  %v6395_v24 = vpop.f32.mrf.mxu0 }
 0x193   :  { %v7691_v34 = vsel %vm729_vm7, %v10081_v59, %v7255_v9  ;;  %v1307_v8 = vadd.s32 %v1306_v54, %v1302_v27  ;;  %6649 = vcosq.f32 %v7680_v1  ;;  %v916_v61 = vsel %vm833_vm11, %v915_v40, %v7598_v28 }
 0x194   :  { %10082 = vst [vmem:[#allocation35_spill] sm:$0xff] %v7691_v34  ;;  %v1019_v9 = vxor.u32 2147483648, %v7674_v15  ;;  %v7704_v30 = vmul.f32 %v1121_v29, %v1119_v2  ;;  %v1199_v57 = vadd.s32 %v7563_v51, %v7570_v17  ;;  %v1366_v56 = vsub.s32 32, %v1365_v41 }
 0x195   :  { %v1308_v18 = vadd.s32 536870912, %v1307_v8  ;;  %v1219_v47 = vsub.s32 4294967266, %v7696_v58  ;;  %v1364_v43 = vshrl.u32 %v1363_v36, 5  ;;  %v1368_v5 = vshll.u32 %v10050_v14, %v1365_v41 }
 0x196   :  { %v7710_v7 = vshll.u32 %v1359_v22, 8  ;;  %v1369_v0 = vshrl.u32 %v10053_v53, %v1366_v56  ;;  %v1371_v12 = vshll.u32 %v10053_v53, %v1365_v41  ;;  %v1372_v49 = vshrl.u32 %v10045_v46, %v1366_v56 }
 0x197   :  { %v7712_v28 = vshrl.u32 %v1308_v18, 30  ;;  %v10084_v25 = vand.u32 2147483647, %v7015_v26  ;;  %v10085_v51 = vmov 0  ;;  %vm937_vm15 = vcmp.lt.s32.totalorder %v7034_v48, 0 }
 0x198   :  { %v1374_v17 = vshll.u32 %v10045_v46, %v1365_v41  ;;  %v1375_v40 = vshrl.u32 %v10054_v3, %v1366_v56  ;;  %v1377_v44 = vshll.u32 %v10054_v3, %v1365_v41  ;;  %v1378_v36 = vshrl.u32 %v10059_v50, %v1366_v56 }
 0x199   :  { %vm7719_vm7 = vcmp.le.f32.partialorder %v10084_v25, 0.7853982  ;;  %v1310_v2 = vshll.u32 %v7712_v28, 30  ;;  %v1370_v27 = vor.u32 %v1369_v0, %v1368_v5  ;;  %v1373_v59 = vor.u32 %v1372_v49, %v1371_v12 }
 0x19a   :  { %v10086_v51 = vsel %vm7719_vm7, 4294967295, %v10085_v51  ;;  %v1458_v54 = vand.u32 2139095040, %v7184_v38  ;;  %v1220_v22 = vadd.s32 127, %v1219_v47  ;;  %v1376_v29 = vor.u32 %v1375_v40, %v1374_v17  ;;  %v7734_v10 = vpop.eup %6645 }
 0x19b   :  { %10087 = vst [vmem:[#allocation37_spill] sm:$0xff] %v10086_v51  ;;  %v1379_v24 = vor.u32 %v1378_v36, %v1377_v44  ;;  %vm1383_vm4 = vcmp.lt.s32.totalorder %v1364_v43, 1  ;;  %v7730_v18 = vsub.s32 %v1307_v8, %v1310_v2  ;;  %v1380_v25 = vshll.u32 %v10059_v50, %v1365_v41 }
 0x19c   :  { %v1381_v19 = vshrl.u32 %v10060_v62, %v1366_v56  ;;  %vm1386_vm8 = vcmp.lt.s32.totalorder %v1364_v43, 4  ;;  %v10088_v63 = vand.u32 2147483647, %v7034_v48  ;;  %v10089_v5 = vmov 0 }
 0x19d   :  { %v1215_v47 = vsub.s32 32, %v7696_v58  ;;  %vm1385_vm14 = vcmp.lt.s32.totalorder %v1364_v43, 3  ;;  %v1391_v0 = vsel %vm1383_vm4, %v1370_v27, %v1373_v59  ;;  %v1392_v8 = vsel %vm1386_vm8, %v1379_v24, 920167782 }
 0x19e   :  { %vm7738_vm13 = vcmp.le.f32.partialorder %v10088_v63, 0.7853982  ;;  %v1382_v12 = vor.u32 %v1381_v19, %v1380_v25  ;;  %vm1384_vm9 = vcmp.lt.s32.totalorder %v1364_v43, 2  ;;  %v1388_v41 = vsel %vm1386_vm8, %v1376_v29, 2102212464  ;;  %v7751_v36 = vpop.eup %6647  ;;  %v7795_v43 = vpop.f32.mrf.mxu0 }
 0x19f   :  { %v10090_v5 = vsel %vm7738_vm13, 4294967295, %v10089_v5  ;;  %v1393_v49 = vsel %vm1385_vm14, %v1376_v29, %v1392_v8  ;;  %v1221_v17 = vshll.u32 %v1220_v22, 23  ;;  %v1367_v63 = vshrl.u32 %v10050_v14, %v1366_v56  ;;  %10097 = vst [vmem:[#allocation41_spill] sm:$0xff] %v7795_v43 }
 0x1a0   :  { %10091 = vst [vmem:[#allocation38_spill] sm:$0xff] %v10090_v5  ;;  %v1394_v40 = vsel %vm1384_vm9, %v1391_v0, %v1393_v49  ;;  %v1395_v44 = vsel %vm1383_vm4, %v1373_v59, %v1376_v29  ;;  %v1313_v2 = vsub.s32 0, %v7730_v18  ;;  %v1396_v19 = vsel %vm1386_vm8, %v1382_v12, 1326507024  ;;  %v7763_v49 = vpop.eup %6649 }
 0x1a1   :  { %v7756_v25 = vmul.u32.u64.low %v7710_v7, %v1394_v40  ;;  %v7757_v34 = vmul.u32.u64.high %v7710_v7, %v1394_v40, %v7756_v25  ;;  %v1387_v8 = vsel %vm1383_vm4, %v1367_v63, %v1370_v27  ;;  %v1389_v22 = vsel %vm1385_vm14, %v1373_v59, %v1388_v41  ;;  %10092 = vst [vmem:[#allocation39_spill] sm:$0xff] %v7763_v49 }
 0x1a2   :  { %v1397_v56 = vsel %vm1385_vm14, %v1379_v24, %v1396_v19  ;;  %v1459_v0 = vshrl.u32 %v1458_v54, 23  ;;  %6651 = vsinq.f32 %v7680_v1  ;;  %v919_v29 = vsel %vm7719_vm7, %v7015_v26, %v916_v61 }
 0x1a3   :  { %v1020_v12 = vsel %vm937_vm15, %v1019_v9, %v7674_v15  ;;  %v1398_v40 = vsel %vm1384_vm9, %v1395_v44, %v1397_v56  ;;  %v10093_v27 = vand.u32 2147483647, %v7050_v6  ;;  %v10094_v59 = vmov 0 }
 0x1a4   :  { %v1217_v54 = vshrl.u32 %v1199_v57, %v1215_v47  ;;  %v7780_v24 = vmul.u32.u64.low %v7710_v7, %v1398_v40  ;;  %v7781_v1 = vmul.u32.u64.high %v7710_v7, %v1398_v40, %v7780_v24  ;;  %v6100_v41 = vadd.s32 4294967169, %v1459_v0 }
 0x1a5   :  { %vm7775_vm4 = vcmp.le.f32.partialorder %v10093_v27, 0.7853982  ;;  %v1123_v61 = vxor.u32 2147483648, %v7704_v30  ;;  %v6093_v63 = vmin.u32 %v1313_v2, %v7730_v18  ;;  %v1390_v15 = vsel %vm1384_vm9, %v1387_v8, %v1389_v22 }
 0x1a6   :  { %v10095_v59 = vsel %vm7775_vm4, 4294967295, %v10094_v59  ;;  %v1409_v9 = vadd.s32 1, %v7757_v34  ;;  %v1216_v44 = vshll.u32 %v7625_v20, %v7696_v58  ;;  %v1222_v19 = vor.u32 4788187, %v1221_v17 }
 0x1a7   :  { %10096 = vst [vmem:[#allocation40_spill] sm:$0xff] %v10095_v59  ;;  %v9938_v56 = vand.u32 2147483647, %v7184_v38  ;;  %v1465_v57 = vadd.s32 1, %v6100_v41  ;;  %6653 = vcosq.f32 %v919_v29  ;;  %v1021_v47 = vsub.s32 4, %v7426_v60 }
 0x1a8   :  { %v1023_v0 = vsel %vm7738_vm13, %v7034_v48, %v1020_v12  ;;  %v1125_v2 = vsub.s32 4, %v7523_v39  ;;  %v1218_v8 = vor.u32 %v1217_v54, %v1216_v44  ;;  %v1406_v22 = vmul.u32 %v7710_v7, %v1390_v15  ;;  %v6398_v12 = vpop.f32.mrf.mxu0 }
 0x1a9   :  { %vm1408_vm8 = vc.u32 %v7781_v1, %v7756_v25  ;;  %vm1466_vm14 = vcmp.gt.s32.totalorder %v1465_v57, 0  ;;  %6655 = vsinq.f32 %v919_v29  ;;  %v1124_v20 = vsel %vm1041_vm1, %v1123_v61, %v7704_v30 }
 0x1aa   :  { %v1315_v58 = vclz %v6093_v63  ;;  %v1410_v17 = vsel %vm1408_vm8, %v1409_v9, %v7757_v34  ;;  %v1223_v40 = vand.u32 2147483647, %v1222_v19  ;;  %v1462_v54 = vand.u32 8388607, %v9938_v56 }
 0x1ab   :  { %v1411_v27 = vadd.s32 %v1410_v17, %v1406_v22  ;;  %v1467_v24 = vsel %vm1466_vm14, %v1465_v57, 0  ;;  %v10098_v7 = vsub.s32 4, %v7343_v55  ;;  %v7816_v30 = vsel %vm937_vm15, %v1021_v47, %v7426_v60 }
 0x1ac   :  { %10100 = vst [vmem:[#allocation43_spill] sm:$0xff] %v7816_v30  ;;  %6657 = vcosq.f32 %v1023_v0  ;;  %v1469_v34 = vand.u32 31, %v1467_v24  ;;  %v7821_v41 = vsel %vm1041_vm1, %v1125_v2, %v7523_v39  ;;  %v1225_v61 = vcvt.s32.f32 %v1218_v8 }
 0x1ad   :  { %v7811_v29 = vsel %vm833_vm11, %v10098_v7, %v7343_v55  ;;  %6659 = vsinq.f32 %v1023_v0  ;;  %10101 = vst [vmem:[#allocation44_spill] sm:$0xff] %v7821_v41  ;;  %v1412_v63 = vadd.s32 536870912, %v1411_v27  ;;  %v7826_v55 = vsel %vm7775_vm4, %v7050_v6, %v1124_v20 }
 0x1ae   :  { %10099 = vst [vmem:[#allocation42_spill] sm:$0xff] %v7811_v29  ;;  %v1229_v15 = vsub.s32 4, %v7615_v42  ;;  %v6094_v9 = vadd.s32 4294967294, %v1315_v58  ;;  %v1470_v60 = vsub.s32 32, %v1469_v34  ;;  %v7829_v44 = vmul.f32 %v1225_v61, %v1223_v40 }
 0x1af   :  { %v7831_v19 = vshrl.u32 %v1412_v63, 30  ;;  %v1463_v57 = vor.u32 8388608, %v1462_v54  ;;  %v1472_v39 = vshll.u32 %v10050_v14, %v1469_v34  ;;  %v1475_v2 = vshll.u32 %v10053_v53, %v1469_v34  ;;  %v7838_v22 = vpop.eup %6651 }
 0x1b0   :  { %v1473_v0 = vshrl.u32 %v10053_v53, %v1470_v60  ;;  %v1562_v8 = vand.u32 2139095040, %v7251_v16  ;;  %10102 = vst [vmem:[#allocation45_spill] sm:$0xff] %v7838_v22  ;;  %v1476_v58 = vshrl.u32 %v10045_v46, %v1470_v60  ;;  %v1478_v17 = vshll.u32 %v10045_v46, %v1469_v34 }
 0x1b1   :  { %v1414_v20 = vshll.u32 %v7831_v19, 30  ;;  %v1479_v12 = vshrl.u32 %v10054_v3, %v1470_v60  ;;  %vm1145_vm1 = vcmp.lt.s32.totalorder %v7063_v23, 0  ;;  %vm6095_vm11 = vcmp.lt.s32.totalorder %v6094_v9, 0 }
 0x1b2   :  { %v1468_v40 = vshrl.u32 %v1467_v24, 5  ;;  %v1481_v54 = vshll.u32 %v10054_v3, %v1469_v34  ;;  %v1482_v7 = vshrl.u32 %v10059_v50, %v1470_v60  ;;  %v1474_v63 = vor.u32 %v1473_v0, %v1472_v39 }
 0x1b3   :  { %v7847_v61 = vsub.s32 %v1411_v27, %v1414_v20  ;;  %v1477_v56 = vor.u32 %v1476_v58, %v1475_v2  ;;  %v1480_v47 = vor.u32 %v1479_v12, %v1478_v17  ;;  %v1484_v48 = vshll.u32 %v10059_v50, %v1469_v34 }
 0x1b4   :  { %v1483_v6 = vor.u32 %v1482_v7, %v1481_v54  ;;  %v1485_v59 = vshrl.u32 %v10060_v62, %v1470_v60  ;;  %v1563_v41 = vshrl.u32 %v1562_v8, 23  ;;  %v7851_v26 = vpop.eup %6653  ;;  %v7853_v5 = vsel %vm6095_vm11, 0, %v6094_v9 }
 0x1b5   :  { %10103 = vst [vmem:[#allocation46_spill] sm:$0xff] %v7851_v26  ;;  %v1417_v24 = vsub.s32 0, %v7847_v61  ;;  %v1471_v30 = vshrl.u32 %v10050_v14, %v1470_v60  ;;  %v1503_v51 = vshll.u32 %v1463_v57, 8  ;;  %vm1487_vm15 = vcmp.lt.s32.totalorder %v1468_v40, 1 }
 0x1b6   :  { %v1486_v27 = vor.u32 %v1485_v59, %v1484_v48  ;;  %vm1489_vm9 = vcmp.lt.s32.totalorder %v1468_v40, 3  ;;  %vm1490_vm8 = vcmp.lt.s32.totalorder %v1468_v40, 4  ;;  %v7857_v39 = vpop.eup %6655  ;;  %v1495_v2 = vsel %vm1487_vm15, %v1474_v63, %v1477_v56 }
 0x1b7   :  { %10104 = vst [vmem:[#allocation47_spill] sm:$0xff] %v7857_v39  ;;  %v6097_v34 = vmin.u32 %v1417_v24, %v7847_v61  ;;  %v1492_v0 = vsel %vm1490_vm8, %v1480_v47, 2102212464  ;;  %v1496_v8 = vsel %vm1490_vm8, %v1483_v6, 920167782  ;;  %vm1249_vm14 = vcmp.lt.s32.totalorder %v7097_v4, 0 }
 0x1b8   :  { %vm1488_vm11 = vcmp.lt.s32.totalorder %v1468_v40, 2  ;;  %v1497_v9 = vsel %vm1489_vm9, %v1480_v47, %v1496_v8  ;;  %v1499_v20 = vsel %vm1487_vm15, %v1477_v56, %v1480_v47  ;;  %v6104_v58 = vadd.s32 4294967169, %v1563_v41 }
 0x1b9   :  { %v7862_v60 = vpop.eup %6657  ;;  %v1419_v48 = vclz %v6097_v34  ;;  %v1491_v59 = vsel %vm1487_vm15, %v1471_v30, %v1474_v63  ;;  %v1498_v57 = vsel %vm1488_vm11, %v1495_v2, %v1497_v9  ;;  %v1500_v17 = vsel %vm1490_vm8, %v1486_v27, 1326507024 }
 0x1ba   :  { %10105 = vst [vmem:[#allocation48_spill] sm:$0xff] %v7862_v60  ;;  %v7865_v12 = vpop.eup %6659  ;;  %v1493_v54 = vsel %vm1489_vm9, %v1477_v56, %v1492_v0  ;;  %v1501_v7 = vsel %vm1489_vm9, %v1483_v6, %v1500_v17  ;;  %v7869_v24 = vmul.u32.u64.low %v1503_v51, %v1498_v57  ;;  %v7870_v26 = vmul.u32.u64.high %v1503_v51, %v1498_v57, %v7869_v24  ;;  %v7895_v57 = vpop.f32.mrf.mxu0 }
 0x1bb   :  { %10106 = vst [vmem:[#allocation49_spill] sm:$0xff] %v7865_v12  ;;  %6661 = vcosq.f32 %v7826_v55  ;;  %v7877_v41 = vsel %vm1145_vm1, %v1229_v15, %v7615_v42  ;;  %v1323_v30 = vsub.s32 4294967266, %v7853_v5  ;;  %v1502_v47 = vsel %vm1488_vm11, %v1499_v20, %v1501_v7 }
 0x1bc   :  { %10107 = vst [vmem:[#allocation50_spill] sm:$0xff] %v7877_v41  ;;  %v6098_v63 = vadd.s32 4294967294, %v1419_v48  ;;  %v7881_v27 = vmul.u32.u64.low %v1503_v51, %v1502_v47  ;;  %v7882_v56 = vmul.u32.u64.high %v1503_v51, %v1502_v47, %v7881_v27  ;;  %v1569_v6 = vadd.s32 1, %v6104_v58 }
 0x1bd   :  { %6663 = vsinq.f32 %v7826_v55  ;;  %v1227_v34 = vxor.u32 2147483648, %v7829_v44  ;;  %v1333_v0 = vsub.s32 4, %v7712_v28  ;;  %v1494_v2 = vsel %vm1488_vm11, %v1491_v59, %v1493_v54 }
 0x1be   :  { %v1319_v42 = vsub.s32 32, %v7853_v5  ;;  %v1513_v15 = vadd.s32 1, %v7870_v26  ;;  %v10108_v8 = vand.u32 2147483647, %v7251_v16  ;;  %vm1570_vm15 = vcmp.gt.s32.totalorder %v1569_v6, 0 }
 0x1bf   :  { %v1303_v20 = vadd.s32 %v7643_v11, %v7657_v31  ;;  %v1324_v58 = vadd.s32 127, %v1323_v30  ;;  %v1571_v48 = vsel %vm1570_vm15, %v1569_v6, 0  ;;  %v1666_v55 = vand.u32 2139095040, %v7329_v32 }
 0x1c0   :  { %v1566_v9 = vand.u32 8388607, %v10108_v8  ;;  %vm6099_vm9 = vcmp.lt.s32.totalorder %v6098_v63, 0  ;;  %v1510_v40 = vmul.u32 %v1503_v51, %v1494_v2  ;;  %vm1512_vm8 = vc.u32 %v7882_v56, %v7869_v24  ;;  %v6401_v51 = vpop.f32.mrf.mxu0 }
 0x1c1   :  { %v1573_v59 = vand.u32 31, %v1571_v48  ;;  %v7902_v17 = vsel %vm1145_vm1, %v1227_v34, %v7829_v44  ;;  %v1320_v11 = vshll.u32 %v7730_v18, %v7853_v5  ;;  %v7909_v31 = vsel %vm1249_vm14, %v1333_v0, %v7712_v28 }
 0x1c2   :  { %10109 = vst [vmem:[#allocation51_spill] sm:$0xff] %v7909_v31  ;;  %v1514_v54 = vsel %vm1512_vm8, %v1513_v15, %v7870_v26  ;;  %v1321_v7 = vshrl.u32 %v1303_v20, %v1319_v42  ;;  %v1567_v47 = vor.u32 8388608, %v1566_v9  ;;  %v1325_v6 = vshll.u32 %v1324_v58, 23 }
 0x1c3   :  { %v1515_v30 = vadd.s32 %v1514_v54, %v1510_v40  ;;  %v1574_v27 = vsub.s32 32, %v1573_v59  ;;  %v7912_v2 = vsel %vm6099_vm9, 0, %v6098_v63  ;;  %v1576_v44 = vshll.u32 %v10050_v14, %v1573_v59 }
 0x1c4   :  { %v1667_v34 = vshrl.u32 %v1666_v55, 23  ;;  %v1579_v5 = vshll.u32 %v10053_v53, %v1573_v59  ;;  %v1582_v26 = vshll.u32 %v10045_v46, %v1573_v59  ;;  %v1585_v42 = vshll.u32 %v10054_v3, %v1573_v59 }
 0x1c5   :  { %v1516_v8 = vadd.s32 536870912, %v1515_v30  ;;  %v1577_v18 = vshrl.u32 %v10053_v53, %v1574_v27  ;;  %v1580_v28 = vshrl.u32 %v10045_v46, %v1574_v27  ;;  %v1583_v0 = vshrl.u32 %v10054_v3, %v1574_v27 }
 0x1c6   :  { %v1586_v15 = vshrl.u32 %v10059_v50, %v1574_v27  ;;  %v1572_v9 = vshrl.u32 %v1571_v48, 5  ;;  %v1588_v54 = vshll.u32 %v10059_v50, %v1573_v59  ;;  %v1589_v51 = vshrl.u32 %v10060_v62, %v1574_v27 }
 0x1c7   :  { %v7922_v63 = vshrl.u32 %v1516_v8, 30  ;;  %v1578_v20 = vor.u32 %v1577_v18, %v1576_v44  ;;  %v1581_v58 = vor.u32 %v1580_v28, %v1579_v5  ;;  %v1584_v55 = vor.u32 %v1583_v0, %v1582_v26 }
 0x1c8   :  { %v1587_v40 = vor.u32 %v1586_v15, %v1585_v42  ;;  %v7926_v31 = vpop.eup %6661  ;;  %v10111_v41 = vand.u32 2147483647, %v7063_v23  ;;  %v10112_v60 = vmov 0  ;;  %v1322_v12 = vor.u32 %v1321_v7, %v1320_v11 }
 0x1c9   :  { %10110 = vst [vmem:[#allocation52_spill] sm:$0xff] %v7926_v31  ;;  %v1518_v8 = vshll.u32 %v7922_v63, 30  ;;  %v1607_v48 = vshll.u32 %v1567_v47, 8  ;;  %v1326_v18 = vor.u32 4788187, %v1325_v6  ;;  %v1427_v5 = vsub.s32 4294967266, %v7912_v2 }
 0x1ca   :  { %vm7930_vm1 = vcmp.le.f32.partialorder %v10111_v41, 0.7853982  ;;  %v1590_v59 = vor.u32 %v1589_v51, %v1588_v54  ;;  %v6108_v28 = vadd.s32 4294967169, %v1667_v34  ;;  %v7937_v26 = vpop.eup %6663  ;;  %v1575_v41 = vshrl.u32 %v10050_v14, %v1574_v27 }
 0x1cb   :  { %v10113_v60 = vsel %vm7930_vm1, 4294967295, %v10112_v60  ;;  %10115 = vst [vmem:[#allocation54_spill] sm:$0xff] %v7937_v26  ;;  %v7939_v0 = vsub.s32 %v1515_v30, %v1518_v8  ;;  %vm1591_vm11 = vcmp.lt.s32.totalorder %v1572_v9, 1  ;;  %vm1594_vm15 = vcmp.lt.s32.totalorder %v1572_v9, 4 }
 0x1cc   :  { %10114 = vst [vmem:[#allocation53_spill] sm:$0xff] %v10113_v60  ;;  %vm1593_vm9 = vcmp.lt.s32.totalorder %v1572_v9, 3  ;;  %v1596_v11 = vsel %vm1594_vm15, %v1584_v55, 2102212464  ;;  %v1599_v7 = vsel %vm1591_vm11, %v1578_v20, %v1581_v58  ;;  %v1600_v42 = vsel %vm1594_vm15, %v1587_v40, 920167782 }
 0x1cd   :  { %v1521_v47 = vsub.s32 0, %v7939_v0  ;;  %vm1592_vm8 = vcmp.lt.s32.totalorder %v1572_v9, 2  ;;  %v1601_v6 = vsel %vm1593_vm9, %v1584_v55, %v1600_v42  ;;  %v1603_v15 = vsel %vm1591_vm11, %v1581_v58, %v1584_v55  ;;  %v10117_v9 = vld [vmem:[#allocation23_spill] sm:$0xff] }
 0x1ce   :  { %v1423_v54 = vsub.s32 32, %v7912_v2  ;;  %v1595_v34 = vsel %vm1591_vm11, %v1575_v41, %v1578_v20  ;;  %v1602_v51 = vsel %vm1592_vm8, %v1599_v7, %v1601_v6  ;;  %v1604_v30 = vsel %vm1594_vm15, %v1590_v59, 1326507024 }
 0x1cf   :  { %v6101_v8 = vmin.u32 %v1521_v47, %v7939_v0  ;;  %v1597_v27 = vsel %vm1593_vm9, %v1581_v58, %v1596_v11  ;;  %v1605_v44 = vsel %vm1593_vm9, %v1587_v40, %v1604_v30  ;;  %v1673_v31 = vadd.s32 1, %v6108_v28 }
 0x1d0   :  { %v1428_v26 = vadd.s32 127, %v1427_v5  ;;  %v1606_v39 = vsel %vm1592_vm8, %v1603_v15, %v1605_v44  ;;  %v7947_v29 = vmul.u32.u64.low %v1607_v48, %v1602_v51  ;;  %v7948_v49 = vmul.u32.u64.high %v1607_v48, %v1602_v51, %v7947_v29 }
 0x1d1   :  { %v1327_v42 = vand.u32 2147483647, %v1326_v18  ;;  %v1523_v55 = vclz %v6101_v8  ;;  %v7951_v22 = vmul.u32.u64.low %v1607_v48, %v1606_v39  ;;  %v7952_v52 = vmul.u32.u64.high %v1607_v48, %v1606_v39, %v7951_v22 }
 0x1d2   :  { %v7958_v20 = vsel %vm7930_vm1, %v7063_v23, %v7902_v17  ;;  %v1407_v58 = vadd.s32 %v7756_v25, %v7781_v1  ;;  %v1598_v40 = vsel %vm1592_vm8, %v1595_v34, %v1597_v27  ;;  %vm1674_vm11 = vcmp.gt.s32.totalorder %v1673_v31, 0  ;;  %v7970_v25 = vpop.f32.mrf.mxu0 }
 0x1d3   :  { %v1329_v44 = vcvt.s32.f32 %v1322_v12  ;;  %v6102_v5 = vadd.s32 4294967294, %v1523_v55  ;;  %v10116_v18 = vand.u32 2147483647, %v7329_v32  ;;  %v1675_v28 = vsel %vm1674_vm11, %v1673_v31, 0 }
 0x1d4   :  { %v1425_v39 = vshrl.u32 %v1407_v58, %v1423_v54  ;;  %v1429_v22 = vshll.u32 %v1428_v26, 23  ;;  %v1617_v41 = vadd.s32 1, %v7948_v49  ;;  %v1677_v11 = vand.u32 31, %v1675_v28  ;;  %v6404_v54 = vpop.f32.mrf.mxu0 }
 0x1d5   :  { %v1670_v59 = vand.u32 8388607, %v10116_v18  ;;  %v7966_v7 = vmul.f32 %v1329_v44, %v1327_v42  ;;  %vm6103_vm15 = vcmp.lt.s32.totalorder %v6102_v5, 0  ;;  %v1614_v17 = vmul.u32 %v1607_v48, %v1598_v40 }
 0x1d6   :  { %vm1616_vm9 = vc.u32 %v7952_v52, %v7947_v29  ;;  %v1424_v1 = vshll.u32 %v7847_v61, %v7912_v2  ;;  %v1678_v31 = vsub.s32 32, %v1677_v11  ;;  %v1511_v47 = vadd.s32 %v7869_v24, %v7882_v56 }
 0x1d7   :  { %v1618_v12 = vsel %vm1616_vm9, %v1617_v41, %v7948_v49  ;;  %v7978_v6 = vsel %vm6103_vm15, 0, %v6102_v5  ;;  %v1671_v48 = vor.u32 8388608, %v1670_v59  ;;  %v1430_v51 = vor.u32 4788187, %v1429_v22 }
 0x1d8   :  { %v1619_v15 = vadd.s32 %v1618_v12, %v1614_v17  ;;  %v1426_v34 = vor.u32 %v1425_v39, %v1424_v1  ;;  %v1681_v30 = vshrl.u32 %v10053_v53, %v1678_v31  ;;  %v1684_v8 = vshrl.u32 %v10045_v46, %v1678_v31 }
 0x1d9   :  { %v1680_v49 = vshll.u32 %v10050_v14, %v1677_v11  ;;  %v1683_v2 = vshll.u32 %v10053_v53, %v1677_v11  ;;  %v1770_v27 = vand.u32 2139095040, %v10117_v9  ;;  %v1531_v24 = vsub.s32 4294967266, %v7978_v6 }
 0x1da   :  { %v1620_v61 = vadd.s32 536870912, %v1619_v15  ;;  %v1676_v56 = vshrl.u32 %v1675_v28, 5  ;;  %v1686_v42 = vshll.u32 %v10045_v46, %v1677_v11  ;;  %v1687_v55 = vshrl.u32 %v10054_v3, %v1678_v31 }
 0x1db   :  { %v1682_v40 = vor.u32 %v1681_v30, %v1680_v49  ;;  %v1685_v44 = vor.u32 %v1684_v8, %v1683_v2  ;;  %v1690_v5 = vshrl.u32 %v10059_v50, %v1678_v31  ;;  %v1689_v59 = vshll.u32 %v10054_v3, %v1677_v11 }
 0x1dc   :  { %v7988_v58 = vshrl.u32 %v1620_v61, 30  ;;  %v1688_v18 = vor.u32 %v1687_v55, %v1686_v42  ;;  %v1692_v39 = vshll.u32 %v10059_v50, %v1677_v11  ;;  %v1693_v22 = vshrl.u32 %v10060_v62, %v1678_v31 }
 0x1dd   :  { %v1431_v41 = vand.u32 2147483647, %v1430_v51  ;;  %v1527_v28 = vsub.s32 32, %v7978_v6  ;;  %v1711_v1 = vshll.u32 %v1671_v48, 8  ;;  %v1532_v12 = vadd.s32 127, %v1531_v24 }
 0x1de   :  { %v1622_v17 = vshll.u32 %v7988_v58, 30  ;;  %v1691_v54 = vor.u32 %v1690_v5, %v1689_v59  ;;  %v1694_v61 = vor.u32 %v1693_v22, %v1692_v39  ;;  %v1771_v30 = vshrl.u32 %v1770_v27, 23 }
 0x1df   :  { %v1679_v49 = vshrl.u32 %v10050_v14, %v1678_v31  ;;  %vm1695_vm8 = vcmp.lt.s32.totalorder %v1676_v56, 1  ;;  %vm1698_vm11 = vcmp.lt.s32.totalorder %v1676_v56, 4  ;;  %vm1697_vm15 = vcmp.lt.s32.totalorder %v1676_v56, 3 }
 0x1e0   :  { %v7996_v8 = vsub.s32 %v1619_v15, %v1622_v17  ;;  %v1700_v11 = vsel %vm1698_vm11, %v1688_v18, 2102212464  ;;  %v1703_v2 = vsel %vm1695_vm8, %v1682_v40, %v1685_v44  ;;  %v1704_v42 = vsel %vm1698_vm11, %v1691_v54, 920167782 }
 0x1e1   :  { %v1529_v51 = vshrl.u32 %v1511_v47, %v1527_v28  ;;  %vm1696_vm9 = vcmp.lt.s32.totalorder %v1676_v56, 2  ;;  %v1705_v26 = vsel %vm1697_vm15, %v1688_v18, %v1704_v42  ;;  %v1533_v48 = vshll.u32 %v1532_v12, 23 }
 0x1e2   :  { %v1625_v55 = vsub.s32 0, %v7996_v8  ;;  %v1706_v24 = vsel %vm1696_vm9, %v1703_v2, %v1705_v26  ;;  %v1707_v5 = vsel %vm1695_vm8, %v1685_v44, %v1688_v18  ;;  %v1708_v27 = vsel %vm1698_vm11, %v1694_v61, 1326507024 }
 0x1e3   :  { %v1699_v59 = vsel %vm1695_vm8, %v1679_v49, %v1682_v40  ;;  %v1701_v31 = vsel %vm1697_vm15, %v1685_v44, %v1700_v11  ;;  %v1709_v39 = vsel %vm1697_vm15, %v1691_v54, %v1708_v27  ;;  %v6112_v47 = vadd.s32 4294967169, %v1771_v30 }
 0x1e4   :  { %v6105_v15 = vmin.u32 %v1625_v55, %v7996_v8  ;;  %v1710_v22 = vsel %vm1696_vm9, %v1707_v5, %v1709_v39  ;;  %v8003_v17 = vmul.u32.u64.low %v1711_v1, %v1706_v24  ;;  %v8004_v23 = vmul.u32.u64.high %v1711_v1, %v1706_v24, %v8003_v17  ;;  %v8034_v39 = vpop.f32.mrf.mxu0 }
 0x1e5   :  { %v1433_v28 = vcvt.s32.f32 %v1426_v34  ;;  %v8007_v42 = vmul.u32.u64.low %v1711_v1, %v1710_v22  ;;  %v8008_v12 = vmul.u32.u64.high %v1711_v1, %v1710_v22, %v8007_v42  ;;  %v1331_v26 = vxor.u32 2147483648, %v7966_v7 }
 0x1e6   :  { %v1627_v60 = vclz %v6105_v15  ;;  %v1528_v18 = vshll.u32 %v7939_v0, %v7978_v6  ;;  %v1702_v40 = vsel %vm1696_vm9, %v1699_v59, %v1701_v31  ;;  %v1777_v44 = vadd.s32 1, %v6112_v47 }
 0x1e7   :  { %v8014_v54 = vmul.f32 %v1433_v28, %v1431_v41  ;;  %v10118_v30 = vand.u32 2147483647, %v10117_v9  ;;  %v1534_v2 = vor.u32 4788187, %v1533_v48  ;;  %v1721_v55 = vadd.s32 1, %v8004_v23 }
 0x1e8   :  { %v6106_v49 = vadd.s32 4294967294, %v1627_v60  ;;  %v1530_v11 = vor.u32 %v1529_v51, %v1528_v18  ;;  %vm1778_vm8 = vcmp.gt.s32.totalorder %v1777_v44, 0  ;;  %v1718_v24 = vmul.u32 %v1711_v1, %v1702_v40 }
 0x1e9   :  { %v1774_v34 = vand.u32 8388607, %v10118_v30  ;;  %vm1720_vm15 = vc.u32 %v8008_v12, %v8003_v17  ;;  %v1779_v0 = vsel %vm1778_vm8, %v1777_v44, 0  ;;  %v8025_v6 = vsel %vm1249_vm14, %v1331_v26, %v7966_v7  ;;  %v6407_v26 = vpop.f32.mrf.mxu0 }
 0x1ea   :  { %vm6107_vm11 = vcmp.lt.s32.totalorder %v6106_v49, 0  ;;  %v1722_v56 = vsel %vm1720_vm15, %v1721_v55, %v8004_v23  ;;  %v1781_v41 = vand.u32 31, %v1779_v0  ;;  %v1435_v51 = vxor.u32 2147483648, %v8014_v54 }
 0x1eb   :  { %v8027_v60 = vsel %vm6107_vm11, 0, %v6106_v49  ;;  %v1615_v48 = vadd.s32 %v7947_v29, %v7952_v52  ;;  %v1723_v5 = vadd.s32 %v1722_v56, %v1718_v24  ;;  %v1535_v27 = vand.u32 2147483647, %v1534_v2 }
 0x1ec   :  { %v1635_v1 = vsub.s32 4294967266, %v8027_v60  ;;  %v1537_v15 = vcvt.s32.f32 %v1530_v11  ;;  %v1775_v59 = vor.u32 8388608, %v1774_v34  ;;  %v1782_v31 = vsub.s32 32, %v1781_v41 }
 0x1ed   :  { %v1631_v7 = vsub.s32 32, %v8027_v60  ;;  %v1724_v22 = vadd.s32 536870912, %v1723_v5  ;;  %v8037_v47 = vshrl.u32 %v1779_v0, 5  ;;  %v1784_v23 = vshll.u32 %v10050_v14, %v1781_v41 }
 0x1ee   :  { %v1785_v28 = vshrl.u32 %v10053_v53, %v1782_v31  ;;  %v1787_v52 = vshll.u32 %v10053_v53, %v1781_v41  ;;  %v1788_v29 = vshrl.u32 %v10045_v46, %v1782_v31  ;;  %v1791_v42 = vshrl.u32 %v10054_v3, %v1782_v31 }
 0x1ef   :  { %v1636_v18 = vadd.s32 127, %v1635_v1  ;;  %v8044_v40 = vshrl.u32 %v1724_v22, 30  ;;  %v1790_v44 = vshll.u32 %v10045_v46, %v1781_v41  ;;  %v1794_v49 = vshrl.u32 %v10059_v50, %v1782_v31 }
 0x1f0   :  { %v8048_v30 = vmul.f32 %v1537_v15, %v1535_v27  ;;  %v1786_v34 = vor.u32 %v1785_v28, %v1784_v23  ;;  %v1789_v11 = vor.u32 %v1788_v29, %v1787_v52  ;;  %v1793_v2 = vshll.u32 %v10054_v3, %v1781_v41  ;;  %v6754_v28 = vld [vmem:[%s9889_s0 + $0xb0] sm:$0xff] }
 0x1f1   :  { %v1726_v55 = vshll.u32 %v8044_v40, 30  ;;  %v1792_v24 = vor.u32 %v1791_v42, %v1790_v44  ;;  %v8053_v0 = vshll.u32 %v1775_v59, 8  ;;  %v1874_v56 = vand.u32 2139095040, %v7496_v35 }
 0x1f2   :  { %v1632_v1 = vshll.u32 %v7996_v8, %v8027_v60  ;;  %v1795_v22 = vor.u32 %v1794_v49, %v1793_v2  ;;  %v1796_v27 = vshll.u32 %v10059_v50, %v1781_v41  ;;  %v1797_v15 = vshrl.u32 %v10060_v62, %v1782_v31 }
 0x1f3   :  { %v10119_v23 = vand.u32 2147483647, %v7097_v4  ;;  %v1633_v52 = vshrl.u32 %v1615_v48, %v1631_v7  ;;  %v1637_v29 = vshll.u32 %v1636_v18, 23  ;;  %v8066_v59 = vsub.s32 %v1723_v5, %v1726_v55 }
 0x1f4   :  { %vm1799_vm8 = vcmp.lt.s32.totalorder %v8037_v47, 1  ;;  %v1783_v42 = vshrl.u32 %v10050_v14, %v1782_v31  ;;  %v1798_v8 = vor.u32 %v1797_v15, %v1796_v27  ;;  %vm1802_vm11 = vcmp.lt.s32.totalorder %v8037_v47, 4 }
 0x1f5   :  { %vm8062_vm9 = vcmp.le.f32.partialorder %v10119_v23, 0.7853982  ;;  %v1807_v60 = vsel %vm1799_vm8, %v1786_v34, %v1789_v11  ;;  %v10122_v41 = vand.u32 2147483647, %v7132_v21  ;;  %v10123_v26 = vmov 0 }
 0x1f6   :  { %v1729_v48 = vsub.s32 0, %v8066_v59  ;;  %vm1801_vm0 = vcmp.lt.s32.totalorder %v8037_v47, 3  ;;  %v1804_v5 = vsel %vm1802_vm11, %v1792_v24, 2102212464  ;;  %v1808_v7 = vsel %vm1802_vm11, %v1795_v22, 920167782 }
 0x1f7   :  { %vm8075_vm15 = vcmp.le.f32.partialorder %v10122_v41, 0.7853982  ;;  %vm1800_vm3 = vcmp.lt.s32.totalorder %v8037_v47, 2  ;;  %v1809_v31 = vsel %vm1801_vm0, %v1792_v24, %v1808_v7  ;;  %v1811_v18 = vsel %vm1799_vm8, %v1789_v11, %v1792_v24 }
 0x1f8   :  { %v10124_v26 = vsel %vm8075_vm15, 4294967295, %v10123_v26  ;;  %v1812_v44 = vsel %vm1802_vm11, %v1798_v8, 1326507024  ;;  %v1638_v49 = vor.u32 4788187, %v1637_v29  ;;  %v6109_v2 = vmin.u32 %v1729_v48, %v8066_v59 }
 0x1f9   :  { %10125 = vst [vmem:[#allocation55_spill] sm:$0xff] %v10124_v26  ;;  %v1803_v55 = vsel %vm1799_vm8, %v1783_v42, %v1786_v34  ;;  %v1810_v27 = vsel %vm1800_vm3, %v1807_v60, %v1809_v31  ;;  %v1805_v15 = vsel %vm1801_vm0, %v1789_v11, %v1804_v5  ;;  %v1813_v23 = vsel %vm1801_vm0, %v1795_v22, %v1812_v44 }
 0x1fa   :  { %v8091_v41 = vmul.u32.u64.low %v8053_v0, %v1810_v27  ;;  %v8092_v7 = vmul.u32.u64.high %v8053_v0, %v1810_v27, %v8091_v41  ;;  %v1634_v24 = vor.u32 %v1633_v52, %v1632_v1  ;;  %v1731_v8 = vclz %v6109_v2 }
 0x1fb   :  { %v1814_v29 = vsel %vm1800_vm3, %v1811_v18, %v1813_v23  ;;  %v1875_v61 = vshrl.u32 %v1874_v56, 23  ;;  %vm10126_vm8 = vcmp.lt.s32.totalorder %v7132_v21, 0  ;;  %v10127_v11 = vand.u32 2147483647, %v7184_v38 }
 0x1fc   :  { %v1436_v34 = vsel %vm10126_vm8, %v1435_v51, %v8014_v54  ;;  %v10128_v22 = vmov 0  ;;  %v8109_v42 = vmul.u32.u64.low %v8053_v0, %v1814_v29  ;;  %v8110_v1 = vmul.u32.u64.high %v8053_v0, %v1814_v29, %v8109_v42  ;;  %vm10132_vm11 = vmmov %vm10126_vm8 }
 0x1fd   :  { %vm8104_vm0 = vcmp.le.f32.partialorder %v10127_v11, 0.7853982  ;;  %v9962_v52 = vand.u32 2147483647, %v7496_v35  ;;  %v1639_v60 = vand.u32 2147483647, %v1638_v49  ;;  %v1806_v48 = vsel %vm1800_vm3, %v1803_v55, %v1805_v15 }
 0x1fe   :  { %v10129_v22 = vsel %vm8104_vm0, 4294967295, %v10128_v22  ;;  %v6110_v56 = vadd.s32 4294967294, %v1731_v8  ;;  %v6116_v5 = vadd.s32 4294967169, %v1875_v61  ;;  %6665 = vcosq.f32 %v7958_v20  ;;  %v6733_v55 = vld [vmem:[%s9889_s0 + $0x10] sm:$0xff] }
 0x1ff   :  { %10130 = vst [vmem:[#allocation56_spill] sm:$0xff] %v10129_v22  ;;  %v1335_v54 = vsel %vm8062_vm9, %v7097_v4, %v8025_v6  ;;  %v1539_v51 = vxor.u32 2147483648, %v8048_v30  ;;  %v1825_v31 = vadd.s32 1, %v8092_v7  ;;  %6667 = vsinq.f32 %v7958_v20  ;;  %5590 = vrot.lane.b32.xlu1 %v6733_v55, %s6788_s10 }
 0x200   :  { %v10131_v18 = vsub.s32 4, %v7831_v19  ;;  %v1641_v61 = vcvt.s32.f32 %v1634_v24  ;;  %v1881_v44 = vadd.s32 1, %v6116_v5  ;;  %v1439_v49 = vsel %vm8075_vm15, %v7132_v21, %v1436_v34 }
 0x201   :  { %vm6111_vm3 = vcmp.lt.s32.totalorder %v6110_v56, 0  ;;  %v1822_v6 = vmul.u32 %v8053_v0, %v1806_v48  ;;  %vm1824_vm8 = vc.u32 %v8110_v1, %v8091_v41  ;;  %6669 = vcosq.f32 %v1335_v54 }
 0x202   :  { %v8128_v47 = vsel %vm10132_vm11, %v10131_v18, %v7831_v19  ;;  %v1642_v20 = vmul.f32 %v1641_v61, %v1639_v60  ;;  %v1826_v2 = vsel %vm1824_vm8, %v1825_v31, %v8092_v7  ;;  %v1878_v19 = vand.u32 8388607, %v9962_v52 }
 0x203   :  { %10133 = vst [vmem:[#allocation57_spill] sm:$0xff] %v8128_v47  ;;  %6671 = vsinq.f32 %v1335_v54  ;;  %vm10134_vm11 = vcmp.lt.s32.totalorder %v7184_v38, 0  ;;  %v1827_v27 = vadd.s32 %v1826_v2, %v1822_v6  ;;  %vm1882_vm14 = vcmp.gt.s32.totalorder %v1881_v44, 0 }
 0x204   :  { %v1540_v0 = vsel %vm10134_vm11, %v1539_v51, %v8048_v30  ;;  %6673 = vcosq.f32 %v1439_v49  ;;  %v8148_v15 = vsel %vm6111_vm3, 0, %v6110_v56  ;;  %v1883_v23 = vsel %vm1882_vm14, %v1881_v44, 0 }
 0x205   :  { %v1978_v7 = vand.u32 2139095040, %v7602_v13  ;;  %6675 = vsinq.f32 %v1439_v49  ;;  %v1828_v8 = vadd.s32 536870912, %v1827_v27  ;;  %v1885_v29 = vand.u32 31, %v1883_v23 }
 0x206   :  { %v8155_v34 = vsel %vm8104_vm0, %v7184_v38, %v1540_v0  ;;  %v1643_v30 = vxor.u32 2147483648, %v1642_v20  ;;  %v1879_v42 = vor.u32 8388608, %v1878_v19  ;;  %v1735_v60 = vsub.s32 32, %v8148_v15 }
 0x207   :  { %v8159_v56 = vshrl.u32 %v1828_v8, 30  ;;  %v1886_v48 = vsub.s32 32, %v1885_v29  ;;  %v1739_v54 = vsub.s32 4294967266, %v8148_v15  ;;  %v8163_v51 = vshrl.u32 %v1883_v23, 5 }
 0x208   :  { %v1888_v31 = vshll.u32 %v10050_v14, %v1885_v29  ;;  %v1979_v18 = vshrl.u32 %v1978_v7, 23  ;;  %v1891_v49 = vshll.u32 %v10053_v53, %v1885_v29  ;;  %v1894_v6 = vshll.u32 %v10045_v46, %v1885_v29 }
 0x209   :  { %v1830_v61 = vshll.u32 %v8159_v56, 30  ;;  %v1889_v44 = vshrl.u32 %v10053_v53, %v1886_v48  ;;  %v1892_v2 = vshrl.u32 %v10045_v46, %v1886_v48  ;;  %v1895_v19 = vshrl.u32 %v10054_v3, %v1886_v48 }
 0x20a   :  { %v1897_v55 = vshll.u32 %v10054_v3, %v1885_v29  ;;  %v1898_v0 = vshrl.u32 %v10059_v50, %v1886_v48  ;;  %vm10135_vm14 = vcmp.lt.s32.totalorder %v7251_v16, 0  ;;  %v1719_v7 = vadd.s32 %v8003_v17, %v8008_v12 }
 0x20b   :  { %v1644_v23 = vsel %vm10135_vm14, %v1643_v30, %v1642_v20  ;;  %v8178_v8 = vsub.s32 %v1827_v27, %v1830_v61  ;;  %v1890_v52 = vor.u32 %v1889_v44, %v1888_v31  ;;  %v8180_v11 = vpop.eup %6665  ;;  %v1893_v24 = vor.u32 %v1892_v2, %v1891_v49 }
 0x20c   :  { %v1896_v5 = vor.u32 %v1895_v19, %v1894_v6  ;;  %v1899_v22 = vor.u32 %v1898_v0, %v1897_v55  ;;  %v8182_v21 = vshll.u32 %v1879_v42, 8  ;;  %v8184_v4 = vpop.eup %6667  ;;  %v1900_v47 = vshll.u32 %v10059_v50, %v1885_v29 }
 0x20d   :  { %v1833_v26 = vsub.s32 0, %v8178_v8  ;;  %v1901_v20 = vshrl.u32 %v10060_v62, %v1886_v48  ;;  %v10136_v17 = vand.u32 2147483647, %v7602_v13  ;;  %v1737_v27 = vshrl.u32 %v1719_v7, %v1735_v60 }
 0x20e   :  { %v1740_v30 = vadd.s32 127, %v1739_v54  ;;  %vm1903_vm3 = vcmp.lt.s32.totalorder %v8163_v51, 1  ;;  %v6120_v31 = vadd.s32 4294967169, %v1979_v18  ;;  %v8194_v61 = vpop.eup %6669  ;;  %v10138_v42 = vand.u32 2147483647, %v7251_v16 }
 0x20f   :  { %v8191_v12 = vand.u32 8388607, %v10136_v17  ;;  %10137 = vst [vmem:[#allocation58_spill] sm:$0xff] %v8194_v61  ;;  %v10139_v44 = vmov 0  ;;  %v6113_v29 = vmin.u32 %v1833_v26, %v8178_v8  ;;  %v1902_v49 = vor.u32 %v1901_v20, %v1900_v47 }
 0x210   :  { %vm8198_vm8 = vcmp.le.f32.partialorder %v10138_v42, 0.7853982  ;;  %vm1906_vm11 = vcmp.lt.s32.totalorder %v8163_v51, 4  ;;  %v1911_v60 = vsel %vm1903_vm3, %v1890_v52, %v1893_v24  ;;  %v8206_v54 = vpop.eup %6671  ;;  %v1887_v18 = vshrl.u32 %v10050_v14, %v1886_v48 }
 0x211   :  { %v10140_v44 = vsel %vm8198_vm8, 4294967295, %v10139_v44  ;;  %vm1905_vm14 = vcmp.lt.s32.totalorder %v8163_v51, 3  ;;  %v1908_v6 = vsel %vm1906_vm11, %v1896_v5, 2102212464  ;;  %v1912_v2 = vsel %vm1906_vm11, %v1899_v22, 920167782  ;;  %v8214_v19 = vpop.eup %6673 }
 0x212   :  { %10141 = vst [vmem:[#allocation59_spill] sm:$0xff] %v10140_v44  ;;  %10142 = vst [vmem:[#allocation60_spill] sm:$0xff] %v8214_v19  ;;  %v1835_v26 = vclz %v6113_v29  ;;  %vm1904_vm12 = vcmp.lt.s32.totalorder %v8163_v51, 2  ;;  %v1913_v47 = vsel %vm1905_vm14, %v1896_v5, %v1912_v2  ;;  %v1915_v55 = vsel %vm1903_vm3, %v1893_v24, %v1896_v5  ;;  %v8219_v0 = vpop.eup %6675 }
 0x213   :  { %10143 = vst [vmem:[#allocation61_spill] sm:$0xff] %v8219_v0  ;;  %v1741_v48 = vshll.u32 %v1740_v30, 23  ;;  %v1907_v7 = vsel %vm1903_vm3, %v1887_v18, %v1890_v52  ;;  %v1914_v20 = vsel %vm1904_vm12, %v1911_v60, %v1913_v47  ;;  %v1916_v17 = vsel %vm1906_vm11, %v1902_v49, 1326507024 }
 0x214   :  { %v6114_v42 = vadd.s32 4294967294, %v1835_v26  ;;  %v1909_v29 = vsel %vm1905_vm14, %v1893_v24, %v1908_v6  ;;  %v1917_v19 = vsel %vm1905_vm14, %v1899_v22, %v1916_v17  ;;  %v1985_v61 = vadd.s32 1, %v6120_v31 }
 0x215   :  { %v1736_v2 = vshll.u32 %v8066_v59, %v8148_v15  ;;  %v1918_v5 = vsel %vm1904_vm12, %v1915_v55, %v1917_v19  ;;  %v8232_v30 = vmul.u32.u64.low %v8182_v21, %v1914_v20  ;;  %v8233_v0 = vmul.u32.u64.high %v8182_v21, %v1914_v20, %v8232_v30 }
 0x216   :  { %vm6115_vm3 = vcmp.lt.s32.totalorder %v6114_v42, 0  ;;  %v8237_v52 = vmul.u32.u64.low %v8182_v21, %v1918_v5  ;;  %v8238_v60 = vmul.u32.u64.high %v8182_v21, %v1918_v5, %v8237_v52  ;;  %vm1986_vm11 = vcmp.gt.s32.totalorder %v1985_v61, 0 }
 0x217   :  { %6677 = vcosq.f32 %v8155_v34  ;;  %v1738_v22 = vor.u32 %v1737_v27, %v1736_v2  ;;  %v1910_v59 = vsel %vm1904_vm12, %v1907_v7, %v1909_v29  ;;  %v1987_v15 = vsel %vm1986_vm11, %v1985_v61, 0 }
 0x218   :  { %v10144_v24 = vsub.s32 4, %v7922_v63  ;;  %vm10145_vm14 = vcmp.lt.s32.totalorder %v7184_v38, 0  ;;  %6679 = vsinq.f32 %v8155_v34  ;;  %v10147_v49 = vsub.s32 4, %v7988_v58 }
 0x219   :  { %vm10148_vm0 = vcmp.lt.s32.totalorder %v7251_v16, 0  ;;  %v1742_v27 = vor.u32 4788187, %v1741_v48  ;;  %v8261_v51 = vsel %vm8198_vm8, %v7251_v16, %v1644_v23  ;;  %v1838_v61 = vsel %vm6115_vm3, 0, %v6114_v42 }
 0x21a   :  { %v8248_v31 = vsel %vm10145_vm14, %v10144_v24, %v7922_v63  ;;  %v8256_v18 = vsel %vm10148_vm0, %v10147_v49, %v7988_v58  ;;  %v1929_v6 = vadd.s32 1, %v8233_v0  ;;  %v1989_v63 = vand.u32 31, %v1987_v15 }
 0x21b   :  { %10146 = vst [vmem:[#allocation62_spill] sm:$0xff] %v8248_v31  ;;  %10149 = vst [vmem:[#allocation63_spill] sm:$0xff] %v8256_v18  ;;  %v1823_v34 = vadd.s32 %v8091_v41, %v8110_v1  ;;  %v1926_v19 = vmul.u32 %v8182_v21, %v1910_v59  ;;  %vm1928_vm12 = vc.u32 %v8238_v60, %v8232_v30  ;;  %v1983_v58 = vor.u32 8388608, %v8191_v12 }
 0x21c   :  { %v1745_v26 = vcvt.s32.f32 %v1738_v22  ;;  %v1930_v47 = vsel %vm1928_vm12, %v1929_v6, %v8233_v0  ;;  %v1990_v55 = vsub.s32 32, %v1989_v63  ;;  %v1743_v48 = vand.u32 2147483647, %v1742_v27 }
 0x21d   :  { %v1839_v7 = vsub.s32 32, %v1838_v61  ;;  %v1931_v20 = vadd.s32 %v1930_v47, %v1926_v19  ;;  %v2082_v17 = vand.u32 2139095040, %v7694_v37  ;;  %v1992_v41 = vshll.u32 %v10050_v14, %v1989_v63 }
 0x21e   :  { %v1993_v21 = vshrl.u32 %v10053_v53, %v1990_v55  ;;  %v1996_v1 = vshrl.u32 %v10045_v46, %v1990_v55  ;;  %v1999_v42 = vshrl.u32 %v10054_v3, %v1990_v55  ;;  %v1843_v12 = vsub.s32 4294967266, %v1838_v61 }
 0x21f   :  { %v1932_v29 = vadd.s32 536870912, %v1931_v20  ;;  %v1988_v2 = vshrl.u32 %v1987_v15, 5  ;;  %v1995_v0 = vshll.u32 %v10053_v53, %v1989_v63  ;;  %v1998_v52 = vshll.u32 %v10045_v46, %v1989_v63 }
 0x220   :  { %v1994_v5 = vor.u32 %v1993_v21, %v1992_v41  ;;  %v2001_v22 = vshll.u32 %v10054_v3, %v1989_v63  ;;  %v2002_v59 = vshrl.u32 %v10059_v50, %v1990_v55  ;;  %v2004_v27 = vshll.u32 %v10059_v50, %v1989_v63 }
 0x221   :  { %v8281_v24 = vshrl.u32 %v1932_v29, 30  ;;  %v1997_v49 = vor.u32 %v1996_v1, %v1995_v0  ;;  %v2005_v6 = vshrl.u32 %v10060_v62, %v1990_v55  ;;  %v2000_v19 = vor.u32 %v1999_v42, %v1998_v52 }
 0x222   :  { %v2003_v47 = vor.u32 %v2002_v59, %v2001_v22  ;;  %v8285_v23 = vshll.u32 %v1983_v58, 8  ;;  %v2083_v15 = vshrl.u32 %v2082_v17, 23  ;;  %v8287_v16 = vmul.f32 %v1745_v26, %v1743_v48 }
 0x223   :  { %v1934_v41 = vshll.u32 %v8281_v24, 30  ;;  %v2006_v21 = vor.u32 %v2005_v6, %v2004_v27  ;;  %v10150_v38 = vand.u32 2147483647, %v7694_v37  ;;  %v1840_v1 = vshll.u32 %v8178_v8, %v1838_v61 }
 0x224   :  { %v1841_v29 = vshrl.u32 %v1823_v34, %v1839_v7  ;;  %v1844_v63 = vadd.s32 127, %v1843_v12  ;;  %vm2007_vm0 = vcmp.lt.s32.totalorder %v1988_v2, 1  ;;  %v8295_v0 = vpop.eup %6677  ;;  %vm2009_vm3 = vcmp.lt.s32.totalorder %v1988_v2, 3 }
 0x225   :  { %v8292_v44 = vand.u32 8388607, %v10150_v38  ;;  %10151 = vst [vmem:[#allocation64_spill] sm:$0xff] %v8295_v0  ;;  %v8297_v42 = vsub.s32 %v1931_v20, %v1934_v41  ;;  %vm2010_vm11 = vcmp.lt.s32.totalorder %v1988_v2, 4  ;;  %v2015_v58 = vsel %vm2007_vm0, %v1994_v5, %v1997_v49  ;;  %v8300_v26 = vpop.eup %6679 }
 0x226   :  { %10152 = vst [vmem:[#allocation65_spill] sm:$0xff] %v8300_v26  ;;  %v2016_v48 = vsel %vm2010_vm11, %v2003_v47, 920167782  ;;  %v2019_v17 = vsel %vm2007_vm0, %v1997_v49, %v2000_v19  ;;  %v2020_v38 = vsel %vm2010_vm11, %v2006_v21, 1326507024  ;;  %v6124_v52 = vadd.s32 4294967169, %v2083_v15 }
 0x227   :  { %v1937_v8 = vsub.s32 0, %v8297_v42  ;;  %vm2008_vm14 = vcmp.lt.s32.totalorder %v1988_v2, 2  ;;  %v2012_v61 = vsel %vm2010_vm11, %v2000_v19, 2102212464  ;;  %v2017_v34 = vsel %vm2009_vm3, %v2000_v19, %v2016_v48 }
 0x228   :  { %v1845_v7 = vshll.u32 %v1844_v63, 23  ;;  %v1991_v20 = vshrl.u32 %v10050_v14, %v1990_v55  ;;  %v2018_v12 = vsel %vm2008_vm14, %v2015_v58, %v2017_v34  ;;  %v2021_v22 = vsel %vm2009_vm3, %v2003_v47, %v2020_v38 }
 0x229   :  { %v1842_v59 = vor.u32 %v1841_v29, %v1840_v1  ;;  %v6117_v27 = vmin.u32 %v1937_v8, %v8297_v42  ;;  %v2022_v6 = vsel %vm2008_vm14, %v2019_v17, %v2021_v22  ;;  %v2089_v41 = vadd.s32 1, %v6124_v52 }
 0x22a   :  { %v2011_v15 = vsel %vm2007_vm0, %v1991_v20, %v1994_v5  ;;  %v2013_v21 = vsel %vm2009_vm3, %v1997_v49, %v2012_v61  ;;  %v8313_v18 = vmul.u32.u64.low %v8285_v23, %v2022_v6  ;;  %v8314_v19 = vmul.u32.u64.high %v8285_v23, %v2022_v6, %v8313_v18 }
 0x22b   :  { %v1939_v63 = vclz %v6117_v27  ;;  %v8317_v55 = vmul.u32.u64.low %v8285_v23, %v2018_v12  ;;  %v8318_v58 = vmul.u32.u64.high %v8285_v23, %v2018_v12, %v8317_v55  ;;  %vm2090_vm12 = vcmp.gt.s32.totalorder %v2089_v41, 0 }
 0x22c   :  { %6681 = vcosq.f32 %v8261_v51  ;;  %v1846_v1 = vor.u32 4788187, %v1845_v7  ;;  %v2091_v29 = vsel %vm2090_vm12, %v2089_v41, 0  ;;  %v2014_v48 = vsel %vm2008_vm14, %v2011_v15, %v2013_v21 }
 0x22d   :  { %v6118_v49 = vadd.s32 4294967294, %v1939_v63  ;;  %v2093_v17 = vand.u32 31, %v2091_v29  ;;  %v1927_v38 = vadd.s32 %v8232_v30, %v8238_v60  ;;  %vm2032_vm0 = vc.u32 %v8314_v19, %v8317_v55 }
 0x22e   :  { %v2087_v52 = vor.u32 8388608, %v8292_v44  ;;  %v1849_v8 = vcvt.s32.f32 %v1842_v59  ;;  %v2033_v61 = vadd.s32 1, %v8318_v58  ;;  %v1847_v7 = vand.u32 2147483647, %v1846_v1 }
 0x22f   :  { %vm6119_vm3 = vcmp.lt.s32.totalorder %v6118_v49, 0  ;;  %v2094_v34 = vsub.s32 32, %v2093_v17  ;;  %v2030_v2 = vmul.u32 %v8285_v23, %v2014_v48  ;;  %v2186_v12 = vand.u32 2139095040, %v7795_v43 }
 0x230   :  { %v1942_v20 = vsel %vm6119_vm3, 0, %v6118_v49  ;;  %v2034_v27 = vsel %vm2032_vm0, %v2033_v61, %v8318_v58  ;;  %v2096_v30 = vshll.u32 %v10050_v14, %v2093_v17  ;;  %v2099_v60 = vshll.u32 %v10053_v53, %v2093_v17 }
 0x231   :  { %v1947_v22 = vsub.s32 4294967266, %v1942_v20  ;;  %v2035_v6 = vadd.s32 %v2034_v27, %v2030_v2  ;;  %v2097_v44 = vshrl.u32 %v10053_v53, %v2094_v34  ;;  %v2100_v59 = vshrl.u32 %v10045_v46, %v2094_v34 }
 0x232   :  { %v2105_v41 = vshll.u32 %v10054_v3, %v2093_v17  ;;  %v1943_v15 = vsub.s32 32, %v1942_v20  ;;  %v2103_v23 = vshrl.u32 %v10054_v3, %v2094_v34  ;;  %v2106_v63 = vshrl.u32 %v10059_v50, %v2094_v34 }
 0x233   :  { %v1948_v21 = vadd.s32 127, %v1947_v22  ;;  %v8342_v1 = vmul.f32 %v1849_v8, %v1847_v7  ;;  %v2036_v58 = vadd.s32 536870912, %v2035_v6  ;;  %v2092_v49 = vshrl.u32 %v2091_v29, 5 }
 0x234   :  { %v2102_v48 = vshll.u32 %v10045_v46, %v2093_v17  ;;  %v2098_v61 = vor.u32 %v2097_v44, %v2096_v30  ;;  %v2101_v2 = vor.u32 %v2100_v59, %v2099_v60  ;;  %v2107_v27 = vor.u32 %v2106_v63, %v2105_v41 }
 0x235   :  { %v2108_v5 = vshll.u32 %v10059_v50, %v2093_v17  ;;  %v1949_v47 = vshll.u32 %v1948_v21, 23  ;;  %v8346_v18 = vshrl.u32 %v2036_v58, 30  ;;  %v2109_v22 = vshrl.u32 %v10060_v62, %v2094_v34 }
 0x236   :  { %v2104_v0 = vor.u32 %v2103_v23, %v2102_v48  ;;  %v1944_v26 = vshll.u32 %v8297_v42, %v1942_v20  ;;  %v1945_v31 = vshrl.u32 %v1927_v38, %v1943_v15  ;;  %v8350_v8 = vshll.u32 %v2087_v52, 8 }
 0x237   :  { %v2187_v7 = vshrl.u32 %v2186_v12, 23  ;;  %v2038_v29 = vshll.u32 %v8346_v18, 30  ;;  %v2110_v30 = vor.u32 %v2109_v22, %v2108_v5  ;;  %vm2111_vm14 = vcmp.lt.s32.totalorder %v2092_v49, 1 }
 0x238   :  { %vm2114_vm12 = vcmp.lt.s32.totalorder %v2092_v49, 4  ;;  %vm2112_vm0 = vcmp.lt.s32.totalorder %v2092_v49, 2  ;;  %vm2113_vm3 = vcmp.lt.s32.totalorder %v2092_v49, 3  ;;  %v2119_v60 = vsel %vm2111_vm14, %v2098_v61, %v2101_v2 }
 0x239   :  { %v8354_v17 = vpop.eup %6681  ;;  %v2120_v44 = vsel %vm2114_vm12, %v2107_v27, 920167782  ;;  %vm1769_vm8 = vcmp.lt.s32.totalorder %v10117_v9, 0  ;;  %v1950_v42 = vor.u32 4788187, %v1949_v47  ;;  %v8359_v38 = vsub.s32 %v2035_v6, %v2038_v29 }
 0x23a   :  { %v2116_v52 = vsel %vm2114_vm12, %v2104_v0, 2102212464  ;;  %v2121_v20 = vsel %vm2113_vm3, %v2104_v0, %v2120_v44  ;;  %v10153_v5 = vand.u32 2147483647, %v7329_v32  ;;  %v10154_v12 = vmov 0 }
 0x23b   :  { %v1946_v59 = vor.u32 %v1945_v31, %v1944_v26  ;;  %v2095_v41 = vshrl.u32 %v10050_v14, %v2094_v34  ;;  %v2122_v15 = vsel %vm2112_vm0, %v2119_v60, %v2121_v20  ;;  %v2123_v21 = vsel %vm2111_vm14, %v2101_v2, %v2104_v0 }
 0x23c   :  { %vm8365_vm11 = vcmp.le.f32.partialorder %v10153_v5, 0.7853982  ;;  %v2041_v47 = vsub.s32 0, %v8359_v38  ;;  %v2124_v6 = vsel %vm2114_vm12, %v2110_v30, 1326507024  ;;  %v2117_v48 = vsel %vm2113_vm3, %v2101_v2, %v2116_v52 }
 0x23d   :  { %v10155_v12 = vsel %vm8365_vm11, 4294967295, %v10154_v12  ;;  %v8375_v23 = vmul.u32.u64.low %v8350_v8, %v2122_v15  ;;  %v8376_v63 = vmul.u32.u64.high %v8350_v8, %v2122_v15, %v8375_v23  ;;  %v2115_v58 = vsel %vm2111_vm14, %v2095_v41, %v2098_v61 }
 0x23e   :  { %10156 = vst [vmem:[#allocation66_spill] sm:$0xff] %v10155_v12  ;;  %v2125_v31 = vsel %vm2113_vm3, %v2107_v27, %v2124_v6  ;;  %v6128_v26 = vadd.s32 4294967169, %v2187_v7  ;;  %v1951_v34 = vand.u32 2147483647, %v1950_v42  ;;  %v6121_v22 = vmin.u32 %v2041_v47, %v8359_v38  ;;  %v8392_v7 = vpop.f32.mrf.mxu0 }
 0x23f   :  { %v2126_v0 = vsel %vm2112_vm0, %v2123_v21, %v2125_v31  ;;  %v9981_v29 = vand.u32 2147483647, %v7795_v43  ;;  %v1851_v30 = vxor.u32 2147483648, %v8342_v1  ;;  %v1953_v61 = vcvt.s32.f32 %v1946_v59  ;;  %10157 = vst [vmem:[#allocation67_spill] sm:$0xff] %v8392_v7 }
 0x240   :  { %v8387_v60 = vmul.u32.u64.low %v8350_v8, %v2126_v0  ;;  %v8388_v44 = vmul.u32.u64.high %v8350_v8, %v2126_v0, %v8387_v60  ;;  %v2193_v20 = vadd.s32 1, %v6128_v26  ;;  %v2043_v5 = vclz %v6121_v22  ;;  %v6410_v47 = vpop.f32.mrf.mxu0 }
 0x241   :  { %v2118_v2 = vsel %vm2112_vm0, %v2115_v58, %v2117_v48  ;;  %v2137_v27 = vadd.s32 1, %v8376_v63  ;;  %6683 = vsinq.f32 %v8261_v51  ;;  %v10158_v42 = vxor.u32 2147483648, %v8287_v16 }
 0x242   :  { %vm10159_vm14 = vcmp.lt.s32.totalorder %v7329_v32, 0  ;;  %v10160_v41 = vsub.s32 4, %v8044_v40  ;;  %vm2194_vm0 = vcmp.gt.s32.totalorder %v2193_v20, 0  ;;  %v8407_v49 = vmul.f32 %v1953_v61, %v1951_v34 }
 0x243   :  { %v1748_v52 = vsel %vm10159_vm14, %v10158_v42, %v8287_v16  ;;  %vm10161_vm12 = vmmov %vm10159_vm14  ;;  %v6122_v15 = vadd.s32 4294967294, %v2043_v5  ;;  %v2190_v51 = vand.u32 8388607, %v9981_v29  ;;  %v2195_v21 = vsel %vm2194_vm0, %v2193_v20, 0 }
 0x244   :  { %v8405_v59 = vsel %vm10161_vm12, %v10160_v41, %v8044_v40  ;;  %v10163_v6 = vsub.s32 4, %v8159_v56  ;;  %v2134_v58 = vmul.u32 %v8350_v8, %v2118_v2  ;;  %vm2136_vm3 = vc.u32 %v8388_v44, %v8375_v23 }
 0x245   :  { %10162 = vst [vmem:[#allocation68_spill] sm:$0xff] %v8405_v59  ;;  %v2197_v40 = vand.u32 31, %v2195_v21  ;;  %v8424_v48 = vsel %vm8365_vm11, %v7329_v32, %v1748_v52  ;;  %v8429_v31 = vsel %vm1769_vm8, %v1851_v30, %v8342_v1  ;;  %vm6123_vm14 = vcmp.lt.s32.totalorder %v6122_v15, 0 }
 0x246   :  { %v8416_v16 = vsel %vm1769_vm8, %v10163_v6, %v8159_v56  ;;  %v2138_v56 = vsel %vm2136_vm3, %v2137_v27, %v8376_v63  ;;  %v2031_v8 = vadd.s32 %v8317_v55, %v8314_v19  ;;  %v2046_v26 = vsel %vm6123_vm14, 0, %v6122_v15 }
 0x247   :  { %10164 = vst [vmem:[#allocation69_spill] sm:$0xff] %v8416_v16  ;;  %v2139_v34 = vadd.s32 %v2138_v56, %v2134_v58  ;;  %v2198_v22 = vsub.s32 32, %v2197_v40  ;;  %v2051_v60 = vsub.s32 4294967266, %v2046_v26  ;;  %v2191_v20 = vor.u32 8388608, %v2190_v51 }
 0x248   :  { %v2290_v61 = vand.u32 2139095040, %v7895_v57  ;;  %v2200_v2 = vshll.u32 %v10050_v14, %v2197_v40  ;;  %v2047_v63 = vsub.s32 32, %v2046_v26  ;;  %v2203_v19 = vshll.u32 %v10053_v53, %v2197_v40 }
 0x249   :  { %v2140_v5 = vadd.s32 536870912, %v2139_v34  ;;  %v2201_v1 = vshrl.u32 %v10053_v53, %v2198_v22  ;;  %v2204_v30 = vshrl.u32 %v10045_v46, %v2198_v22  ;;  %v2052_v27 = vadd.s32 127, %v2051_v60 }
 0x24a   :  { %v2207_v55 = vshrl.u32 %v10054_v3, %v2198_v22  ;;  %v2196_v52 = vshrl.u32 %v2195_v21, 5  ;;  %v2206_v15 = vshll.u32 %v10045_v46, %v2197_v40  ;;  %v2209_v6 = vshll.u32 %v10054_v3, %v2197_v40 }
 0x24b   :  { %v8441_v42 = vshrl.u32 %v2140_v5, 30  ;;  %v2202_v41 = vor.u32 %v2201_v1, %v2200_v2  ;;  %v2053_v51 = vshll.u32 %v2052_v27, 23  ;;  %v2205_v47 = vor.u32 %v2204_v30, %v2203_v19 }
 0x24c   :  { %v2210_v58 = vshrl.u32 %v10059_v50, %v2198_v22  ;;  %v2208_v29 = vor.u32 %v2207_v55, %v2206_v15  ;;  %v2212_v60 = vshll.u32 %v10059_v50, %v2197_v40  ;;  %v2213_v0 = vshrl.u32 %v10060_v62, %v2198_v22 }
 0x24d   :  { %v2142_v56 = vshll.u32 %v8441_v42, 30  ;;  %v2049_v16 = vshrl.u32 %v2031_v8, %v2047_v63  ;;  %v2231_v32 = vshll.u32 %v2191_v20, 8  ;;  %v2291_v21 = vshrl.u32 %v2290_v61, 23 }
 0x24e   :  { %v2211_v5 = vor.u32 %v2210_v58, %v2209_v6  ;;  %v10165_v2 = vand.u32 2147483647, %v10117_v9  ;;  %v10166_v1 = vmov 0  ;;  %v2048_v30 = vshll.u32 %v8359_v38, %v2046_v26  ;;  %v8459_v40 = vpop.eup %6683 }
 0x24f   :  { %v8456_v27 = vsub.s32 %v2139_v34, %v2142_v56  ;;  %v2199_v19 = vshrl.u32 %v10050_v14, %v2198_v22  ;;  %v2214_v55 = vor.u32 %v2213_v0, %v2212_v60  ;;  %v2054_v8 = vor.u32 4788187, %v2053_v51 }
 0x250   :  { %vm8451_vm8 = vcmp.le.f32.partialorder %v10165_v2, 0.7853982  ;;  %vm2215_vm0 = vcmp.lt.s32.totalorder %v2196_v52, 1  ;;  %vm2217_vm3 = vcmp.lt.s32.totalorder %v2196_v52, 3  ;;  %vm2218_vm14 = vcmp.lt.s32.totalorder %v2196_v52, 4 }
 0x251   :  { %v10167_v1 = vsel %vm8451_vm8, 4294967295, %v10166_v1  ;;  %v2145_v20 = vsub.s32 0, %v8456_v27  ;;  %v2220_v61 = vsel %vm2218_vm14, %v2208_v29, 2102212464  ;;  %v2223_v63 = vsel %vm2215_vm0, %v2202_v41, %v2205_v47 }
 0x252   :  { %10168 = vst [vmem:[#allocation70_spill] sm:$0xff] %v10167_v1  ;;  %v2224_v15 = vsel %vm2218_vm14, %v2211_v5, 920167782  ;;  %v2050_v6 = vor.u32 %v2049_v16, %v2048_v30  ;;  %vm2216_vm11 = vcmp.lt.s32.totalorder %v2196_v52, 2  ;;  %v2227_v26 = vsel %vm2215_vm0, %v2205_v47, %v2208_v29 }
 0x253   :  { %v2225_v38 = vsel %vm2217_vm3, %v2208_v29, %v2224_v15  ;;  %v6125_v34 = vmin.u32 %v2145_v20, %v8456_v27  ;;  %v2219_v22 = vsel %vm2215_vm0, %v2199_v19, %v2202_v41  ;;  %v2228_v58 = vsel %vm2218_vm14, %v2214_v55, 1326507024 }
 0x254   :  { %v2226_v0 = vsel %vm2216_vm11, %v2223_v63, %v2225_v38  ;;  %v2221_v56 = vsel %vm2217_vm3, %v2205_v47, %v2220_v61  ;;  %v2229_v51 = vsel %vm2217_vm3, %v2211_v5, %v2228_v58  ;;  %v10169_v12 = vand.u32 2147483647, %v7496_v35 }
 0x255   :  { %v8465_v60 = vmul.u32.u64.low %v2231_v32, %v2226_v0  ;;  %v8466_v2 = vmul.u32.u64.high %v2231_v32, %v2226_v0, %v8465_v60  ;;  %v10170_v59 = vmov 0  ;;  %v2055_v16 = vand.u32 2147483647, %v2054_v8 }
 0x256   :  { %vm8471_vm12 = vcmp.le.f32.partialorder %v10169_v12, 0.7853982  ;;  %v2147_v29 = vclz %v6125_v34  ;;  %v2230_v30 = vsel %vm2216_vm11, %v2227_v26, %v2229_v51  ;;  %v6132_v41 = vadd.s32 4294967169, %v2291_v21 }
 0x257   :  { %v10171_v59 = vsel %vm8471_vm12, 4294967295, %v10170_v59  ;;  %6685 = vcosq.f32 %v8424_v48  ;;  %v8477_v19 = vmul.u32.u64.low %v2231_v32, %v2230_v30  ;;  %v8478_v47 = vmul.u32.u64.high %v2231_v32, %v2230_v30, %v8477_v19 }
 0x258   :  { %10172 = vst [vmem:[#allocation71_spill] sm:$0xff] %v10171_v59  ;;  %v9986_v5 = vand.u32 2147483647, %v7895_v57  ;;  %v2057_v55 = vcvt.s32.f32 %v2050_v6  ;;  %v6126_v20 = vadd.s32 4294967294, %v2147_v29  ;;  %v2222_v61 = vsel %vm2216_vm11, %v2219_v22, %v2221_v56 }
 0x259   :  { %v2297_v12 = vadd.s32 1, %v6132_v41  ;;  %6687 = vsinq.f32 %v8424_v48  ;;  %v1855_v8 = vsel %vm8451_vm8, %v10117_v9, %v8429_v31  ;;  %v1957_v21 = vsub.s32 4, %v8281_v24 }
 0x25a   :  { %v2241_v63 = vadd.s32 1, %v8466_v2  ;;  %v10173_v15 = vxor.u32 2147483648, %v8407_v49  ;;  %vm10174_vm0 = vcmp.lt.s32.totalorder %v7496_v35, 0  ;;  %v8494_v52 = vmul.f32 %v2057_v55, %v2055_v16 }
 0x25b   :  { %vm6127_vm11 = vcmp.lt.s32.totalorder %v6126_v20, 0  ;;  %vm2298_vm3 = vcmp.gt.s32.totalorder %v2297_v12, 0  ;;  %v2238_v38 = vmul.u32 %v2231_v32, %v2222_v61  ;;  %vm2240_vm14 = vc.u32 %v8478_v47, %v8465_v60 }
 0x25c   :  { %v1956_v6 = vsel %vm10174_vm0, %v10173_v15, %v8407_v49  ;;  %v2150_v48 = vsel %vm6127_vm11, 0, %v6126_v20  ;;  %v2299_v31 = vsel %vm2298_vm3, %v2297_v12, 0  ;;  %v2242_v22 = vsel %vm2240_vm14, %v2241_v63, %v8466_v2 }
 0x25d   :  { %v2151_v26 = vsub.s32 32, %v2150_v48  ;;  %v2155_v34 = vsub.s32 4294967266, %v2150_v48  ;;  %v8501_v0 = vand.u32 8388607, %v9986_v5  ;;  %6689 = vcosq.f32 %v1855_v8 }
 0x25e   :  { %v8506_v49 = vsel %vm10174_vm0, %v1957_v21, %v8281_v24  ;;  %v2243_v58 = vadd.s32 %v2242_v22, %v2238_v38  ;;  %v2301_v32 = vand.u32 31, %v2299_v31  ;;  %6691 = vsinq.f32 %v1855_v8  ;;  %v8530_v22 = vpop.f32.mrf.mxu0 }
 0x25f   :  { %10175 = vst [vmem:[#allocation72_spill] sm:$0xff] %v8506_v49  ;;  %v2135_v51 = vadd.s32 %v8375_v23, %v8388_v44  ;;  %v2156_v16 = vadd.s32 127, %v2155_v34  ;;  %v8514_v2 = vsel %vm8471_vm12, %v7496_v35, %v1956_v6  ;;  %v2295_v55 = vor.u32 8388608, %v8501_v0 }
 0x260   :  { %v2244_v30 = vadd.s32 536870912, %v2243_v58  ;;  %v2302_v41 = vsub.s32 32, %v2301_v32  ;;  %v2304_v20 = vshll.u32 %v10050_v14, %v2301_v32  ;;  %v2307_v44 = vshll.u32 %v10053_v53, %v2301_v32  ;;  %v6413_v35 = vpop.f32.mrf.mxu0 }
 0x261   :  { %v2153_v24 = vshrl.u32 %v2135_v51, %v2151_v26  ;;  %v2157_v19 = vshll.u32 %v2156_v16, 23  ;;  %v2313_v63 = vshll.u32 %v10054_v3, %v2301_v32  ;;  %v2300_v38 = vshrl.u32 %v2299_v31, 5 }
 0x262   :  { %v8519_v61 = vshrl.u32 %v2244_v30, 30  ;;  %v2305_v23 = vshrl.u32 %v10053_v53, %v2302_v41  ;;  %v2308_v12 = vshrl.u32 %v10045_v46, %v2302_v41  ;;  %v2311_v21 = vshrl.u32 %v10054_v3, %v2302_v41 }
 0x263   :  { %v2158_v8 = vor.u32 4788187, %v2157_v19  ;;  %v2314_v15 = vshrl.u32 %v10059_v50, %v2302_v41  ;;  %v2310_v26 = vshll.u32 %v10045_v46, %v2301_v32  ;;  %v2152_v51 = vshll.u32 %v8456_v27, %v2150_v48 }
 0x264   :  { %v2246_v6 = vshll.u32 %v8519_v61, 30  ;;  %v8532_v0 = vpop.eup %6685  ;;  %v2306_v16 = vor.u32 %v2305_v23, %v2304_v20  ;;  %v2309_v30 = vor.u32 %v2308_v12, %v2307_v44  ;;  %v2316_v31 = vshll.u32 %v10059_v50, %v2301_v32 }
 0x265   :  { %10176 = vst [vmem:[#allocation73_spill] sm:$0xff] %v8532_v0  ;;  %v2315_v19 = vor.u32 %v2314_v15, %v2313_v63  ;;  %v2312_v56 = vor.u32 %v2311_v21, %v2310_v26  ;;  %v2317_v29 = vshrl.u32 %v10060_v62, %v2302_v41  ;;  %v2154_v59 = vor.u32 %v2153_v24, %v2152_v51 }
 0x266   :  { %v8536_v5 = vsub.s32 %v2243_v58, %v2246_v6  ;;  %v8540_v34 = vpop.eup %6687  ;;  %v2159_v49 = vand.u32 2147483647, %v2158_v8  ;;  %v2303_v9 = vshrl.u32 %v10050_v14, %v2302_v41  ;;  %v2394_v27 = vand.u32 2139095040, %v7970_v25 }
 0x267   :  { %v2318_v20 = vor.u32 %v2317_v29, %v2316_v31  ;;  %vm2319_vm3 = vcmp.lt.s32.totalorder %v2300_v38, 1  ;;  %vm2322_vm14 = vcmp.lt.s32.totalorder %v2300_v38, 4  ;;  %v10177_v58 = vand.u32 2147483647, %v7602_v13 }
 0x268   :  { %v2249_v48 = vsub.s32 0, %v8536_v5  ;;  %v10178_v32 = vmov 0  ;;  %vm2320_vm11 = vcmp.lt.s32.totalorder %v2300_v38, 2  ;;  %vm2321_vm12 = vcmp.lt.s32.totalorder %v2300_v38, 3 }
 0x269   :  { %vm8547_vm0 = vcmp.le.f32.partialorder %v10177_v58, 0.7853982  ;;  %v2327_v35 = vsel %vm2319_vm3, %v2306_v16, %v2309_v30  ;;  %v2328_v24 = vsel %vm2322_vm14, %v2315_v19, 920167782  ;;  %v2324_v23 = vsel %vm2322_vm14, %v2312_v56, 2102212464 }
 0x26a   :  { %v10179_v32 = vsel %vm8547_vm0, 4294967295, %v10178_v32  ;;  %v6129_v41 = vmin.u32 %v2249_v48, %v8536_v5  ;;  %v2329_v44 = vsel %vm2321_vm12, %v2312_v56, %v2328_v24  ;;  %v2331_v29 = vsel %vm2319_vm3, %v2309_v30, %v2312_v56  ;;  %v8555_v12 = vpop.eup %6689 }
 0x26b   :  { %10180 = vst [vmem:[#allocation74_spill] sm:$0xff] %v10179_v32  ;;  %10181 = vst [vmem:[#allocation75_spill] sm:$0xff] %v8555_v12  ;;  %v2161_v8 = vcvt.s32.f32 %v2154_v59  ;;  %v2330_v21 = vsel %vm2320_vm11, %v2327_v35, %v2329_v44  ;;  %v2332_v63 = vsel %vm2322_vm14, %v2318_v20, 1326507024  ;;  %v2335_v15 = vshll.u32 %v2295_v55, 8  ;;  %v8558_v6 = vpop.eup %6691 }
 0x26c   :  { %10182 = vst [vmem:[#allocation76_spill] sm:$0xff] %v8558_v6  ;;  %v2251_v26 = vclz %v6129_v41  ;;  %v2323_v51 = vsel %vm2319_vm3, %v2303_v9, %v2306_v16  ;;  %v2333_v31 = vsel %vm2321_vm12, %v2315_v19, %v2332_v63  ;;  %v2395_v48 = vshrl.u32 %v2394_v27, 23 }
 0x26d   :  { %vm10000_vm8 = vcmp.lt.s32.totalorder %v7694_v37, 0  ;;  %v2325_v58 = vsel %vm2321_vm12, %v2309_v30, %v2324_v23  ;;  %v2334_v56 = vsel %vm2320_vm11, %v2331_v29, %v2333_v31  ;;  %v2162_v20 = vmul.f32 %v2161_v8, %v2159_v49 }
 0x26e   :  { %v8565_v24 = vmul.u32.u64.low %v2335_v15, %v2330_v21  ;;  %v8566_v59 = vmul.u32.u64.high %v2335_v15, %v2330_v21, %v8565_v24  ;;  %v6130_v55 = vadd.s32 4294967294, %v2251_v26  ;;  %6693 = vcosq.f32 %v8514_v2 }
 0x26f   :  { %v8569_v35 = vmul.u32.u64.low %v2335_v15, %v2334_v56  ;;  %v8570_v44 = vmul.u32.u64.high %v2335_v15, %v2334_v56, %v8569_v35  ;;  %v10183_v9 = vxor.u32 2147483648, %v8494_v52  ;;  %vm10184_vm3 = vcmp.lt.s32.totalorder %v7602_v13, 0 }
 0x270   :  { %v6136_v30 = vadd.s32 4294967169, %v2395_v48  ;;  %v10185_v19 = vand.u32 2147483647, %v7970_v25  ;;  %6695 = vsinq.f32 %v8514_v2  ;;  %v10186_v49 = vsub.s32 4, %v8346_v18  ;;  %vm10187_vm12 = vmmov %vm10184_vm3 }
 0x271   :  { %v2060_v16 = vsel %vm10184_vm3, %v10183_v9, %v8494_v52  ;;  %vm6131_vm14 = vcmp.lt.s32.totalorder %v6130_v55, 0  ;;  %v2326_v23 = vsel %vm2320_vm11, %v2323_v51, %v2325_v58  ;;  %v2345_v52 = vadd.s32 1, %v8566_v59 }
 0x272   :  { %v2398_v27 = vand.u32 8388607, %v10185_v19  ;;  %v8586_v41 = vsel %vm10187_vm12, %v10186_v49, %v8346_v18  ;;  %v2254_v8 = vsel %vm6131_vm14, 0, %v6130_v55  ;;  %v2401_v21 = vadd.s32 1, %v6136_v30 }
 0x273   :  { %10188 = vst [vmem:[#allocation77_spill] sm:$0xff] %v8586_v41  ;;  %v8594_v2 = vsel %vm8547_vm0, %v7602_v13, %v2060_v16  ;;  %v2163_v63 = vxor.u32 2147483648, %v2162_v20  ;;  %v2259_v26 = vsub.s32 4294967266, %v2254_v8  ;;  %v9993_v31 = vand.u32 2147483647, %v8034_v39 }
 0x274   :  { %v2342_v18 = vmul.u32 %v2335_v15, %v2326_v23  ;;  %vm2344_vm3 = vc.u32 %v8570_v44, %v8565_v24  ;;  %v2399_v38 = vor.u32 8388608, %v2398_v27  ;;  %vm2402_vm11 = vcmp.gt.s32.totalorder %v2401_v21, 0  ;;  %v10189_v23 = vld [vmem:[#allocation15_spill] sm:$0xff] }
 0x275   :  { %v2255_v51 = vsub.s32 32, %v2254_v8  ;;  %v2346_v48 = vsel %vm2344_vm3, %v2345_v52, %v8566_v59  ;;  %v2403_v58 = vsel %vm2402_vm11, %v2401_v21, 0  ;;  %v2498_v56 = vand.u32 2139095040, %v8034_v39 }
 0x276   :  { %6697 = vcosq.f32 %v8594_v2  ;;  %v2239_v55 = vadd.s32 %v8465_v60, %v8478_v47  ;;  %v2347_v35 = vadd.s32 %v2346_v48, %v2342_v18  ;;  %v2405_v9 = vand.u32 31, %v2403_v58 }
 0x277   :  { %v8606_v15 = vsel %vm10000_vm8, %v2163_v63, %v2162_v20  ;;  %v2260_v16 = vadd.s32 127, %v2259_v26  ;;  %v8611_v59 = vand.u32 8388607, %v9993_v31  ;;  %v8613_v49 = vshll.u32 %v2399_v38, 8 }
 0x278   :  { %v2348_v19 = vadd.s32 536870912, %v2347_v35  ;;  %v2406_v27 = vsub.s32 32, %v2405_v9  ;;  %v501_v52 = vsub.s32 4, %v10189_v23  ;;  %v2257_v60 = vshrl.u32 %v2239_v55, %v2255_v51 }
 0x279   :  { %v8616_v47 = vshrl.u32 %v2403_v58, 5  ;;  %v2408_v21 = vshll.u32 %v10050_v14, %v2405_v9  ;;  %v2499_v20 = vshrl.u32 %v2498_v56, 23  ;;  %v2411_v18 = vshll.u32 %v10053_v53, %v2405_v9 }
 0x27a   :  { %v8619_v63 = vshrl.u32 %v2348_v19, 30  ;;  %v2409_v26 = vshrl.u32 %v10053_v53, %v2406_v27  ;;  %v2412_v48 = vshrl.u32 %v10045_v46, %v2406_v27  ;;  %v2261_v31 = vshll.u32 %v2260_v16, 23 }
 0x27b   :  { %v2415_v38 = vshrl.u32 %v10054_v3, %v2406_v27  ;;  %v2417_v30 = vshll.u32 %v10054_v3, %v2405_v9  ;;  %v2418_v51 = vshrl.u32 %v10059_v50, %v2406_v27  ;;  %v2414_v56 = vshll.u32 %v10045_v46, %v2405_v9  ;;  %v8629_v19 = vpop.eup %6693 }
 0x27c   :  { %v2350_v58 = vshll.u32 %v8619_v63, 30  ;;  %v2410_v55 = vor.u32 %v2409_v26, %v2408_v21  ;;  %v2413_v29 = vor.u32 %v2412_v48, %v2411_v18  ;;  %10190 = vst [vmem:[#allocation15_spill] sm:$0xff] %v8629_v19  ;;  %v2256_v13 = vshll.u32 %v8536_v5, %v2254_v8  ;;  %v8641_v5 = vpop.f32.mrf.mxu0 }
 0x27d   :  { %v2419_v32 = vor.u32 %v2418_v51, %v2417_v30  ;;  %v2420_v41 = vshll.u32 %v10059_v50, %v2405_v9  ;;  %v2421_v16 = vshrl.u32 %v10060_v62, %v2406_v27  ;;  %v8634_v12 = vpop.eup %6695  ;;  %v2416_v1 = vor.u32 %v2415_v38, %v2414_v56 }
 0x27e   :  { %v8636_v6 = vsub.s32 %v2347_v35, %v2350_v58  ;;  %v6140_v0 = vadd.s32 4294967169, %v2499_v20  ;;  %v2503_v21 = vor.u32 8388608, %v8611_v59  ;;  %v2258_v26 = vor.u32 %v2257_v60, %v2256_v13  ;;  %v10195_v13 = vld [vmem:[#allocation6_spill] sm:$0xff]  ;;  %v6416_v60 = vpop.f32.mrf.mxu0 }
 0x27f   :  { %v2262_v18 = vor.u32 4788187, %v2261_v31  ;;  %v2422_v48 = vor.u32 %v2421_v16, %v2420_v41  ;;  %vm2423_vm14 = vcmp.lt.s32.totalorder %v8616_v47, 1  ;;  %v10191_v8 = vand.u32 2147483647, %v7694_v37 }
 0x280   :  { %v10192_v9 = vmov 0  ;;  %v2353_v35 = vsub.s32 0, %v8636_v6  ;;  %vm2426_vm11 = vcmp.lt.s32.totalorder %v8616_v47, 4  ;;  %v2431_v30 = vsel %vm2423_vm14, %v2410_v55, %v2413_v29 }
 0x281   :  { %vm8645_vm3 = vcmp.le.f32.partialorder %v10191_v8, 0.7853982  ;;  %vm10196_vm12 = vcmp.lt.s32.totalorder %v10195_v13, 0  ;;  %v2407_v31 = vshrl.u32 %v10050_v14, %v2406_v27  ;;  %vm2424_vm8 = vcmp.lt.s32.totalorder %v8616_v47, 2 }
 0x282   :  { %v10193_v9 = vsel %vm8645_vm3, 4294967295, %v10192_v9  ;;  %v502_v41 = vsel %vm10196_vm12, %v501_v52, %v10189_v23  ;;  %vm2425_vm0 = vcmp.lt.s32.totalorder %v8616_v47, 3  ;;  %v2432_v59 = vsel %vm2426_vm11, %v2419_v32, 920167782 }
 0x283   :  { %10194 = vst [vmem:[#allocation78_spill] sm:$0xff] %v10193_v9  ;;  %v6133_v20 = vmin.u32 %v2353_v35, %v8636_v6  ;;  %v2428_v38 = vsel %vm2426_vm11, %v2416_v1, 2102212464  ;;  %v2433_v51 = vsel %vm2425_vm0, %v2416_v1, %v2432_v59  ;;  %v2435_v23 = vsel %vm2423_vm14, %v2413_v29, %v2416_v1  ;;  %v8668_v27 = vpop.eup %6697 }
 0x284   :  { %10197 = vst [vmem:[#allocation6_spill] sm:$0xff] %v8668_v27  ;;  %v2263_v52 = vand.u32 2147483647, %v2262_v18  ;;  %v2265_v58 = vcvt.s32.f32 %v2258_v26  ;;  %v2434_v56 = vsel %vm2424_vm8, %v2431_v30, %v2433_v51  ;;  %v2436_v16 = vsel %vm2426_vm11, %v2422_v48, 1326507024 }
 0x285   :  { %v2355_v8 = vclz %v6133_v20  ;;  %v2427_v35 = vsel %vm2423_vm14, %v2407_v31, %v2410_v55  ;;  %v2437_v59 = vsel %vm2425_vm0, %v2419_v32, %v2436_v16  ;;  %v2505_v60 = vadd.s32 1, %v6140_v0 }
 0x286   :  { %v2429_v1 = vsel %vm2425_vm0, %v2413_v29, %v2428_v38  ;;  %v2438_v26 = vsel %vm2424_vm8, %v2435_v23, %v2437_v59  ;;  %v8683_v18 = vmul.u32.u64.low %v8613_v49, %v2434_v56  ;;  %v8684_v30 = vmul.u32.u64.high %v8613_v49, %v2434_v56, %v8683_v18 }
 0x287   :  { %v6134_v48 = vadd.s32 4294967294, %v2355_v8  ;;  %v8688_v20 = vmul.u32.u64.low %v8613_v49, %v2438_v26  ;;  %v8689_v51 = vmul.u32.u64.high %v8613_v49, %v2438_v26, %v8688_v20  ;;  %vm2506_vm12 = vcmp.gt.s32.totalorder %v2505_v60, 0 }
 0x288   :  { %6699 = vsinq.f32 %v8594_v2  ;;  %v10198_v0 = vsub.s32 4, %v8441_v42  ;;  %vm10199_vm0 = vcmp.lt.s32.totalorder %v7694_v37, 0  ;;  %v8699_v29 = vmul.f32 %v2265_v58, %v2263_v52 }
 0x289   :  { %v2507_v55 = vsel %vm2506_vm12, %v2505_v60, 0  ;;  %v10201_v31 = vsub.s32 4, %v8519_v61  ;;  %vm10202_vm14 = vcmp.lt.s32.totalorder %v7795_v43, 0  ;;  %vm6135_vm11 = vcmp.lt.s32.totalorder %v6134_v48, 0 }
 0x28a   :  { %v8697_v32 = vsel %vm10199_vm0, %v10198_v0, %v8441_v42  ;;  %v2430_v2 = vsel %vm2424_vm8, %v2427_v35, %v2429_v1  ;;  %v2509_v23 = vand.u32 31, %v2507_v55  ;;  %v8714_v42 = vsel %vm8645_vm3, %v7694_v37, %v8606_v15 }
 0x28b   :  { %10200 = vst [vmem:[#allocation79_spill] sm:$0xff] %v8697_v32  ;;  %v8706_v38 = vsel %vm10202_vm14, %v10201_v31, %v8519_v61  ;;  %v2358_v52 = vsel %vm6135_vm11, 0, %v6134_v48  ;;  %v2449_v58 = vadd.s32 1, %v8684_v30  ;;  %v504_v16 = vsel %vm7351_vm5, 0, %v502_v41 }
 0x28c   :  { %10203 = vst [vmem:[#allocation80_spill] sm:$0xff] %v8706_v38  ;;  %v2343_v61 = vadd.s32 %v8565_v24, %v8570_v44  ;;  %v2359_v8 = vsub.s32 32, %v2358_v52  ;;  %v2363_v59 = vsub.s32 4294967266, %v2358_v52  ;;  %v8721_v47 = vshll.u32 %v2503_v21, 8 }
 0x28d   :  { %v2446_v60 = vmul.u32 %v8613_v49, %v2430_v2  ;;  %vm2448_vm8 = vc.u32 %v8689_v51, %v8683_v18  ;;  %v2510_v15 = vsub.s32 32, %v2509_v23  ;;  %v2508_v48 = vshrl.u32 %v2507_v55, 5 }
 0x28e   :  { %v2364_v1 = vadd.s32 127, %v2363_v59  ;;  %v2450_v26 = vsel %vm2448_vm8, %v2449_v58, %v8684_v30  ;;  %v508_v41 = vadd.s32 3, %v504_v16  ;;  %v2512_v24 = vshll.u32 %v10050_v14, %v2509_v23 }
 0x28f   :  { %v2451_v20 = vadd.s32 %v2450_v26, %v2446_v60  ;;  %v2513_v44 = vshrl.u32 %v10053_v53, %v2510_v15  ;;  %v2516_v21 = vshrl.u32 %v10045_v46, %v2510_v15  ;;  %v2361_v0 = vshrl.u32 %v2343_v61, %v2359_v8 }
 0x290   :  { %v2515_v31 = vshll.u32 %v10053_v53, %v2509_v23  ;;  %v2518_v49 = vshll.u32 %v10045_v46, %v2509_v23  ;;  %v2519_v2 = vshrl.u32 %v10054_v3, %v2510_v15  ;;  %v2360_v56 = vshll.u32 %v8636_v6, %v2358_v52 }
 0x291   :  { %v2452_v59 = vadd.s32 536870912, %v2451_v20  ;;  %v2521_v30 = vshll.u32 %v10054_v3, %v2509_v23  ;;  %v2522_v55 = vshrl.u32 %v10059_v50, %v2510_v15  ;;  %v2365_v58 = vshll.u32 %v2364_v1, 23 }
 0x292   :  { %v2514_v60 = vor.u32 %v2513_v44, %v2512_v24  ;;  %v2517_v26 = vor.u32 %v2516_v21, %v2515_v31  ;;  %v2520_v35 = vor.u32 %v2519_v2, %v2518_v49  ;;  %v2524_v8 = vshll.u32 %v10059_v50, %v2509_v23 }
 0x293   :  { %v8737_v38 = vshrl.u32 %v2452_v59, 30  ;;  %v2523_v61 = vor.u32 %v2522_v55, %v2521_v30  ;;  %v2525_v37 = vshrl.u32 %v10060_v62, %v2510_v15  ;;  %v2362_v9 = vor.u32 %v2361_v0, %v2360_v56 }
 0x294   :  { %v2511_v32 = vshrl.u32 %v10050_v14, %v2510_v15  ;;  %v509_v6 = vand.u32 3, %v508_v41  ;;  %v3107_v52 = vand.u32 3, %v504_v16  ;;  %vm2527_vm5 = vcmp.lt.s32.totalorder %v2508_v48, 1 }
 0x295   :  { %v2454_v27 = vshll.u32 %v8737_v38, 30  ;;  %v2526_v19 = vor.u32 %v2525_v37, %v2524_v8  ;;  %vm2530_vm12 = vcmp.lt.s32.totalorder %v2508_v48, 4  ;;  %v8743_v1 = vpop.eup %6699  ;;  %vm2529_vm0 = vcmp.lt.s32.totalorder %v2508_v48, 3 }
 0x296   :  { %v2532_v24 = vsel %vm2530_vm12, %v2520_v35, 2102212464  ;;  %v2535_v44 = vsel %vm2527_vm5, %v2514_v60, %v2517_v26  ;;  %v2536_v23 = vsel %vm2530_vm12, %v2523_v61, 920167782  ;;  %v2366_v21 = vor.u32 4788187, %v2365_v58 }
 0x297   :  { %v8747_v31 = vsub.s32 %v2451_v20, %v2454_v27  ;;  %vm2528_vm14 = vcmp.lt.s32.totalorder %v2508_v48, 2  ;;  %v2537_v15 = vsel %vm2529_vm0, %v2520_v35, %v2536_v23  ;;  %v2531_v16 = vsel %vm2527_vm5, %v2511_v32, %v2514_v60  ;;  %v10205_v32 = vld [vmem:[#allocation28_spill] sm:$0xff] }
 0x298   :  { %v2533_v37 = vsel %vm2529_vm0, %v2517_v26, %v2532_v24  ;;  %v2538_v41 = vsel %vm2528_vm14, %v2535_v44, %v2537_v15  ;;  %v2539_v0 = vsel %vm2527_vm5, %v2517_v26, %v2520_v35  ;;  %v2540_v2 = vsel %vm2530_vm12, %v2526_v19, 1326507024 }
 0x299   :  { %v2457_v49 = vsub.s32 0, %v8747_v31  ;;  %v8756_v56 = vmul.u32.u64.low %v8721_v47, %v2538_v41  ;;  %v8757_v59 = vmul.u32.u64.high %v8721_v47, %v2538_v41, %v8756_v56  ;;  %v2369_v27 = vcvt.s32.f32 %v2362_v9 }
 0x29a   :  { %v2541_v20 = vsel %vm2529_vm0, %v2523_v61, %v2540_v2  ;;  %v512_v30 = vxor.u32 2147483648, %v7533_v45  ;;  %v515_v55 = vxor.u32 2147483648, %v10205_v32  ;;  %v2367_v58 = vand.u32 2147483647, %v2366_v21 }
 0x29b   :  { %v6137_v60 = vmin.u32 %v2457_v49, %v8747_v31  ;;  %v2534_v35 = vsel %vm2528_vm14, %v2531_v16, %v2533_v37  ;;  %v2542_v26 = vsel %vm2528_vm14, %v2539_v0, %v2541_v20  ;;  %vm510_vm8 = vcmp.lt.s32.totalorder %v509_v6, 2 }
 0x29c   :  { %v8767_v19 = vmul.u32.u64.low %v8721_v47, %v2542_v26  ;;  %v8768_v8 = vmul.u32.u64.high %v8721_v47, %v2542_v26, %v8767_v19  ;;  %vm511_vm5 = vcmp.eq.s32.totalorder %v509_v6, 0  ;;  %v2553_v61 = vadd.s32 1, %v8757_v59 }
 0x29d   :  { %v2459_v9 = vclz %v6137_v60  ;;  %vm514_vm12 = vcmp.eq.s32.totalorder %v509_v6, 2  ;;  %vm3108_vm0 = vcmp.lt.s32.totalorder %v3107_v52, 2  ;;  %vm3109_vm11 = vcmp.eq.s32.totalorder %v3107_v52, 0 }
 0x29e   :  { %vm3112_vm3 = vcmp.eq.s32.totalorder %v3107_v52, 2  ;;  %v513_v24 = vsel %vm511_vm5, %v10205_v32, %v512_v30  ;;  %v516_v44 = vsel %vm514_vm12, %v515_v55, %v7533_v45  ;;  %v3111_v48 = vsel %vm3109_vm11, %v10205_v32, %v512_v30 }
 0x29f   :  { %v6138_v23 = vadd.s32 4294967294, %v2459_v9  ;;  %v3114_v21 = vsel %vm3112_vm3, %v515_v55, %v7533_v45  ;;  %v517_v15 = vsel %vm510_vm8, %v513_v24, %v516_v44  ;;  %v10206_v16 = vand.u32 2147483647, %v7795_v43 }
 0x2a0   :  { %v10207_v37 = vmov 0  ;;  %vm10016_vm15 = vcmp.lt.s32.totalorder %v7895_v57, 0  ;;  %v2550_v6 = vmul.u32 %v8721_v47, %v2534_v35  ;;  %vm2552_vm5 = vc.u32 %v8768_v8, %v8756_v56  ;;  %v10217_v35 = vld [vmem:[#allocation24_spill] sm:$0xff] }
 0x2a1   :  { %vm8777_vm14 = vcmp.le.f32.partialorder %v10206_v16, 0.7853982  ;;  %v3115_v52 = vsel %vm3108_vm0, %v3111_v48, %v3114_v21  ;;  %vm10210_vm12 = vweird.f32 %v10195_v13  ;;  %v2370_v45 = vmul.f32 %v2369_v27, %v2367_v58  ;;  %v6734_v21 = vld [vmem:[%s9889_s0 + $0x8] sm:$0xff] }
 0x2a2   :  { %v10208_v37 = vsel %vm8777_vm14, 4294967295, %v10207_v37  ;;  %v8787_v41 = vsel %vm10210_vm12, nan, %v517_v15  ;;  %vm6139_vm3 = vcmp.lt.s32.totalorder %v6138_v23, 0  ;;  %v2554_v0 = vsel %vm2552_vm5, %v2553_v61, %v8757_v59  ;;  %vm10212_vm11 = vmmov %vm10210_vm12 }
 0x2a3   :  { %10209 = vst [vmem:[#allocation22_spill] sm:$0xff] %v10208_v37  ;;  %10211 = vst [vmem:[#allocation28_spill] sm:$0xff] %v8787_v41  ;;  %v3116_v49 = vsel %vm10212_vm11, nan, %v3115_v52  ;;  %v2462_v2 = vsel %vm6139_vm3, 0, %v6138_v23  ;;  %v2555_v20 = vadd.s32 %v2554_v0, %v2550_v6  ;;  %v10009_v47 = vand.u32 2147483647, %v8392_v7 }
 0x2a4   :  { %5513 = vrot.lane.b32.xlu0 %v3116_v49, %s6789_s11  ;;  %v2602_v30 = vand.u32 2139095040, %v8392_v7  ;;  %6701 = vcosq.f32 %v8714_v42  ;;  %v2447_v27 = vadd.s32 %v8683_v18, %v8689_v51  ;;  %v2463_v32 = vsub.s32 32, %v2462_v2  ;;  %v10221_v52 = vld [vmem:[#allocation31_spill] sm:$0xff] }
 0x2a5   :  { %v2467_v55 = vsub.s32 4294967266, %v2462_v2  ;;  %6703 = vsinq.f32 %v8714_v42  ;;  %v10213_v13 = vand.u32 2147483647, %v7895_v57  ;;  %v10214_v59 = vmov 0  ;;  %v10225_v37 = vld [vmem:[#allocation7_spill] sm:$0xff] }
 0x2a6   :  { %v2556_v58 = vadd.s32 536870912, %v2555_v20  ;;  %v2603_v60 = vshrl.u32 %v2602_v30, 23  ;;  %v608_v19 = vsel %vm7441_vm2, 0, %v10217_v35  ;;  %v2371_v9 = vxor.u32 2147483648, %v2370_v45 }
 0x2a7   :  { %vm8801_vm8 = vcmp.le.f32.partialorder %v10213_v13, 0.7853982  ;;  %v2465_v61 = vshrl.u32 %v2447_v27, %v2463_v32  ;;  %v2468_v24 = vadd.s32 127, %v2467_v55  ;;  %v612_v18 = vadd.s32 3, %v608_v19  ;;  %v10222_v27 = vld [vmem:[#allocation30_spill] sm:$0xff] }
 0x2a8   :  { %v10215_v59 = vsel %vm8801_vm8, 4294967295, %v10214_v59  ;;  %v10219_v51 = vxor.u32 2147483648, %v8699_v29  ;;  %vm10220_vm0 = vcmp.lt.s32.totalorder %v7795_v43, 0  ;;  %v8813_v44 = vshrl.u32 %v2556_v58, 30  ;;  %5588 = vrot.lane.b32.xlu0 %v6734_v21, %s6788_s10 }
 0x2a9   :  { %10216 = vst [vmem:[#allocation81_spill] sm:$0xff] %v10215_v59  ;;  %v6144_v23 = vadd.s32 4294967169, %v2603_v60  ;;  %v2606_v48 = vand.u32 8388607, %v10009_v47  ;;  %v2464_v15 = vshll.u32 %v8747_v31, %v2462_v2  ;;  %v2469_v16 = vshll.u32 %v2468_v24, 23 }
 0x2aa   :  { %v2268_v42 = vsel %vm10220_vm0, %v10219_v51, %v8699_v29  ;;  %v8822_v6 = vand.u32 3, %v612_v18  ;;  %v10011_v0 = vxor.u32 2147483648, %v10221_v52  ;;  %v2558_v49 = vshll.u32 %v8813_v44, 30 }
 0x2ab   :  { %v2609_v30 = vadd.s32 1, %v6144_v23  ;;  %v10010_v32 = vxor.u32 2147483648, %v10222_v27  ;;  %v8831_v55 = vsel %vm8777_vm14, %v7795_v43, %v2268_v42  ;;  %v2372_v31 = vsel %vm10016_vm15, %v2371_v9, %v2370_v45 }
 0x2ac   :  { %v2466_v2 = vor.u32 %v2465_v61, %v2464_v15  ;;  %v2470_v13 = vor.u32 4788187, %v2469_v16  ;;  %v8835_v58 = vsub.s32 %v2555_v20, %v2558_v49  ;;  %v2607_v60 = vor.u32 8388608, %v2606_v48 }
 0x2ad   :  { %vm2610_vm2 = vcmp.gt.s32.totalorder %v2609_v30, 0  ;;  %vm615_vm5 = vcmp.eq.s32.totalorder %v8822_v6, 0  ;;  %vm618_vm12 = vcmp.eq.s32.totalorder %v8822_v6, 2  ;;  %6705 = vcosq.f32 %v8831_v55 }
 0x2ae   :  { %v2471_v35 = vand.u32 2147483647, %v2470_v13  ;;  %v2611_v26 = vsel %vm2610_vm2, %v2609_v30, 0  ;;  %v8842_v24 = vsel %vm615_vm5, %v10222_v27, %v10011_v0  ;;  %v2561_v45 = vsub.s32 0, %v8835_v58 }
 0x2af   :  { %v2613_v9 = vand.u32 31, %v2611_v26  ;;  %v8849_v20 = vsel %vm618_vm12, %v10010_v32, %v10221_v52  ;;  %v8854_v61 = vsel %vm8801_vm8, %v7895_v57, %v2372_v31  ;;  %v2473_v18 = vcvt.s32.f32 %v2466_v2 }
 0x2b0   :  { %v2551_v42 = vadd.s32 %v8756_v56, %v8768_v8  ;;  %v6141_v23 = vmin.u32 %v2561_v45, %v8835_v58  ;;  %v8860_v21 = vshll.u32 %v2607_v60, 8  ;;  %v3210_v15 = vand.u32 3, %v608_v19 }
 0x2b1   :  { %v2614_v48 = vsub.s32 32, %v2613_v9  ;;  %v8862_v16 = vmul.f32 %v2473_v18, %v2471_v35  ;;  %v2612_v49 = vshrl.u32 %v2611_v26, 5  ;;  %v2616_v30 = vshll.u32 %v10050_v14, %v2613_v9  ;;  %v8866_v13 = vpop.eup %6701 }
 0x2b2   :  { %v2619_v31 = vshll.u32 %v10053_v53, %v2613_v9  ;;  %10223 = vst [vmem:[#allocation24_spill] sm:$0xff] %v8866_v13  ;;  %v2563_v2 = vclz %v6141_v23  ;;  %v2622_v8 = vshll.u32 %v10045_v46, %v2613_v9  ;;  %v8871_v45 = vpop.eup %6703  ;;  %v2625_v60 = vshll.u32 %v10054_v3, %v2613_v9 }
 0x2b3   :  { %v2617_v47 = vshrl.u32 %v10053_v53, %v2614_v48  ;;  %v2620_v56 = vshrl.u32 %v10045_v46, %v2614_v48  ;;  %10224 = vst [vmem:[#allocation25_spill] sm:$0xff] %v8871_v45  ;;  %v2623_v19 = vshrl.u32 %v10054_v3, %v2614_v48  ;;  %v2626_v35 = vshrl.u32 %v10059_v50, %v2614_v48 }
 0x2b4   :  { %v2629_v26 = vshrl.u32 %v10060_v62, %v2614_v48  ;;  %v6142_v18 = vadd.s32 4294967294, %v2563_v2  ;;  %v2628_v51 = vshll.u32 %v10059_v50, %v2613_v9  ;;  %v2475_v41 = vxor.u32 2147483648, %v8862_v16 }
 0x2b5   :  { %v2618_v23 = vor.u32 %v2617_v47, %v2616_v30  ;;  %v2621_v29 = vor.u32 %v2620_v56, %v2619_v31  ;;  %v2624_v32 = vor.u32 %v2623_v19, %v2622_v8  ;;  %v2627_v0 = vor.u32 %v2626_v35, %v2625_v60 }
 0x2b6   :  { %vm6143_vm2 = vcmp.lt.s32.totalorder %v6142_v18, 0  ;;  %v2615_v59 = vshrl.u32 %v10050_v14, %v2614_v48  ;;  %v2630_v43 = vor.u32 %v2629_v26, %v2628_v51  ;;  %vm611_vm5 = vweird.f32 %v10225_v37 }
 0x2b7   :  { %v2566_v2 = vsel %vm6143_vm2, 0, %v6142_v18  ;;  %vm2631_vm15 = vcmp.lt.s32.totalorder %v2612_v49, 1  ;;  %vm2632_vm8 = vcmp.lt.s32.totalorder %v2612_v49, 2  ;;  %vm2634_vm3 = vcmp.lt.s32.totalorder %v2612_v49, 4 }
 0x2b8   :  { %v2567_v47 = vsub.s32 32, %v2566_v2  ;;  %v2571_v9 = vsub.s32 4294967266, %v2566_v2  ;;  %vm2633_vm11 = vcmp.lt.s32.totalorder %v2612_v49, 3  ;;  %v2636_v30 = vsel %vm2634_vm3, %v2624_v32, 2102212464 }
 0x2b9   :  { %v2568_v31 = vshll.u32 %v8835_v58, %v2566_v2  ;;  %v2635_v56 = vsel %vm2631_vm15, %v2615_v59, %v2618_v23  ;;  %v2639_v48 = vsel %vm2631_vm15, %v2618_v23, %v2621_v29  ;;  %v2640_v51 = vsel %vm2634_vm3, %v2627_v0, 920167782 }
 0x2ba   :  { %v2569_v8 = vshrl.u32 %v2551_v42, %v2567_v47  ;;  %v2572_v19 = vadd.s32 127, %v2571_v9  ;;  %v2641_v60 = vsel %vm2633_vm11, %v2624_v32, %v2640_v51  ;;  %v2643_v35 = vsel %vm2631_vm15, %v2621_v29, %v2624_v32  ;;  %v8887_v26 = vpop.eup %6705 }
 0x2bb   :  { %v10226_v18 = vand.u32 2147483647, %v7970_v25  ;;  %v2637_v45 = vsel %vm2633_vm11, %v2621_v29, %v2636_v30  ;;  %v2642_v59 = vsel %vm2632_vm8, %v2639_v48, %v2641_v60  ;;  %v2644_v58 = vsel %vm2634_vm3, %v2630_v43, 1326507024 }
 0x2bc   :  { %v10229_v42 = vxor.u32 2147483648, %v10221_v52  ;;  %vm10230_vm0 = vcmp.eq.s32.totalorder %v3210_v15, 0  ;;  %v2570_v32 = vor.u32 %v2569_v8, %v2568_v31  ;;  %v2573_v2 = vshll.u32 %v2572_v19, 23 }
 0x2bd   :  { %vm8891_vm2 = vcmp.le.f32.partialorder %v10226_v18, 0.7853982  ;;  %v2645_v47 = vsel %vm2633_vm11, %v2627_v0, %v2644_v58  ;;  %v10231_v9 = vxor.u32 2147483648, %v10222_v27  ;;  %vm10232_vm15 = vcmp.eq.s32.totalorder %v3210_v15, 2 }
 0x2be   :  { %v3214_v23 = vsel %vm10230_vm0, %v10222_v27, %v10229_v42  ;;  %vm2497_vm12 = vcmp.lt.s32.totalorder %v8034_v39, 0  ;;  %v2646_v29 = vsel %vm2632_vm8, %v2643_v35, %v2645_v47  ;;  %vm10233_vm3 = vcmp.lt.s32.totalorder %v3210_v15, 2 }
 0x2bf   :  { %v3217_v51 = vsel %vm10232_vm15, %v10231_v9, %v10221_v52  ;;  %v8910_v43 = vmul.u32.u64.low %v8860_v21, %v2642_v59  ;;  %v8911_v30 = vmul.u32.u64.high %v8860_v21, %v2642_v59, %v8910_v43  ;;  %v2574_v60 = vor.u32 4788187, %v2573_v2 }
 0x2c0   :  { %v3218_v48 = vsel %vm10233_vm3, %v3214_v23, %v3217_v51  ;;  %v2638_v31 = vsel %vm2632_vm8, %v2635_v56, %v2637_v45  ;;  %v8916_v0 = vmul.u32.u64.low %v8860_v21, %v2646_v29  ;;  %v8917_v8 = vmul.u32.u64.high %v8860_v21, %v2646_v29, %v8916_v0 }
 0x2c1   :  { %v2577_v27 = vcvt.s32.f32 %v2570_v32  ;;  %v3219_v52 = vsel %vm611_vm5, nan, %v3218_v48  ;;  %vm10234_vm11 = vcmp.lt.s32.totalorder %v8822_v6, 2  ;;  %v10020_v35 = vand.u32 2147483647, %v8530_v22 }
 0x2c2   :  { %v621_v19 = vsel %vm10234_vm11, %v8842_v24, %v8849_v20  ;;  %v2575_v15 = vand.u32 2147483647, %v2574_v60  ;;  %5515 = vrot.lane.b32.xlu1 %v3219_v52, %s6789_s11  ;;  %v2706_v45 = vand.u32 2139095040, %v8530_v22  ;;  %v712_v18 = vsel %vm7550_vm6, 0, %v7668_v33 }
 0x2c3   :  { %v8929_v49 = vsel %vm611_vm5, nan, %v621_v19  ;;  %vm10237_vm8 = vcmp.lt.s32.totalorder %v7970_v25, 0  ;;  %v2581_v24 = vsub.s32 4, %v8813_v44  ;;  %v2657_v20 = vadd.s32 1, %v8911_v30 }
 0x2c4   :  { %10235 = vst [vmem:[#allocation31_spill] sm:$0xff] %v8929_v49  ;;  %v2476_v6 = vsel %vm10237_vm8, %v2475_v41, %v8862_v16  ;;  %v2710_v59 = vand.u32 8388607, %v10020_v35  ;;  %v2578_v37 = vmul.f32 %v2577_v27, %v2575_v15  ;;  %v2654_v58 = vmul.u32 %v8860_v21, %v2638_v31  ;;  %vm10241_vm5 = vmmov %vm10237_vm8 }
 0x2c5   :  { %vm2656_vm0 = vc.u32 %v8917_v8, %v8910_v43  ;;  %v2707_v42 = vshrl.u32 %v2706_v45, 23  ;;  %6707 = vsinq.f32 %v8831_v55  ;;  %v10238_v33 = vsub.s32 4, %v8619_v63  ;;  %v6735_v55 = vld [vmem:[%s9889_s0 + $0x18] sm:$0xff] }
 0x2c6   :  { %vm10239_vm6 = vcmp.lt.s32.totalorder %v7895_v57, 0  ;;  %v2658_v16 = vsel %vm2656_vm0, %v2657_v20, %v8911_v30  ;;  %v716_v23 = vadd.s32 3, %v712_v18  ;;  %6709 = vcosq.f32 %v8854_v61  ;;  %5592 = vrot.lane.b32.xlu1 %v6735_v55, %s6788_s10 }
 0x2c7   :  { %v8950_v41 = vsel %vm10239_vm6, %v10238_v33, %v8619_v63  ;;  %v2479_v21 = vsel %vm8891_vm2, %v7970_v25, %v2476_v6  ;;  %v2659_v32 = vadd.s32 %v2658_v16, %v2654_v58  ;;  %v6148_v2 = vadd.s32 4294967169, %v2707_v42 }
 0x2c8   :  { %6711 = vsinq.f32 %v8854_v61  ;;  %v10240_v63 = vsub.s32 4, %v8737_v38  ;;  %v2579_v9 = vxor.u32 2147483648, %v2578_v37  ;;  %v2711_v51 = vor.u32 8388608, %v2710_v59 }
 0x2c9   :  { %v8972_v29 = vsel %vm2497_vm12, %v2581_v24, %v8813_v44  ;;  %v2660_v30 = vadd.s32 536870912, %v2659_v32  ;;  %v2713_v48 = vadd.s32 1, %v6148_v2  ;;  %v8974_v60 = vand.u32 3, %v716_v23  ;;  %v6736_v44 = vld [vmem:[%s9889_s0 + $0x20] sm:$0xff] }
 0x2ca   :  { %v8967_v47 = vsel %vm10241_vm5, %v10240_v63, %v8737_v38  ;;  %6713 = vcosq.f32 %v2479_v21  ;;  %v720_v61 = vxor.u32 2147483648, %v7751_v36  ;;  %v723_v31 = vxor.u32 2147483648, %v7734_v10  ;;  %5594 = vrot.lane.b32.xlu1 %v6736_v44, %s6788_s10  ;;  %v10242_v2 = vld [vmem:[#allocation8_spill] sm:$0xff] }
 0x2cb   :  { %v8978_v0 = vand.u32 3, %v712_v18  ;;  %6715 = vsinq.f32 %v2479_v21  ;;  %v8981_v38 = vadd.s32 %v8910_v43, %v8917_v8  ;;  %v8983_v27 = vshrl.u32 %v2660_v30, 30 }
 0x2cc   :  { %vm2714_vm15 = vcmp.gt.s32.totalorder %v2713_v48, 0  ;;  %v8991_v52 = vsel %vm2497_vm12, %v2579_v9, %v2578_v37  ;;  %v8993_v15 = vshll.u32 %v2711_v51, 8  ;;  %vm719_vm3 = vcmp.eq.s32.totalorder %v8974_v60, 0  ;;  %v6737_v37 = vld [vmem:[%s9889_s0 + $0x28] sm:$0xff] }
 0x2cd   :  { %v2715_v19 = vsel %vm2714_vm15, %v2713_v48, 0  ;;  %v2662_v43 = vshll.u32 %v8983_v27, 30  ;;  %vm722_vm11 = vcmp.eq.s32.totalorder %v8974_v60, 2  ;;  %vm3315_vm8 = vcmp.eq.s32.totalorder %v8978_v0, 0 }
 0x2ce   :  { %v2717_v8 = vand.u32 31, %v2715_v19  ;;  %vm3318_vm0 = vcmp.eq.s32.totalorder %v8978_v0, 2  ;;  %v9002_v56 = vsel %vm719_vm3, %v7734_v10, %v720_v61  ;;  %v9005_v18 = vsel %vm722_vm11, %v723_v31, %v7751_v36  ;;  %5596 = vrot.lane.b32.xlu1 %v6737_v37, %s6788_s10 }
 0x2cf   :  { %v9007_v6 = vsub.s32 %v2659_v32, %v2662_v43  ;;  %v9009_v24 = vshrl.u32 %v2715_v19, 5  ;;  %vm3314_vm12 = vcmp.lt.s32.totalorder %v8978_v0, 2  ;;  %v3317_v59 = vsel %vm3315_vm8, %v7734_v10, %v720_v61  ;;  %v6738_v43 = vld [vmem:[%s9889_s0 + $0x30] sm:$0xff] }
 0x2d0   :  { %v2718_v20 = vsub.s32 32, %v2717_v8  ;;  %v2720_v58 = vshll.u32 %v10050_v14, %v2717_v8  ;;  %v2723_v42 = vshll.u32 %v10053_v53, %v2717_v8  ;;  %v2726_v33 = vshll.u32 %v10045_v46, %v2717_v8 }
 0x2d1   :  { %v3320_v16 = vsel %vm3318_vm0, %v723_v31, %v7751_v36  ;;  %v2665_v23 = vsub.s32 0, %v9007_v6  ;;  %v2729_v32 = vshll.u32 %v10054_v3, %v2717_v8  ;;  %vm715_vm6 = vweird.f32 %v10242_v2  ;;  %v10249_v2 = vld [vmem:[#allocation35_spill] sm:$0xff] }
 0x2d2   :  { %v2721_v21 = vshrl.u32 %v10053_v53, %v2718_v20  ;;  %v2724_v10 = vshrl.u32 %v10045_v46, %v2718_v20  ;;  %v10243_v55 = vand.u32 2147483647, %v8034_v39  ;;  %v2727_v9 = vshrl.u32 %v10054_v3, %v2718_v20  ;;  %v9037_v48 = vpop.eup %6707  ;;  %5598 = vrot.lane.b32.xlu1 %v6738_v43, %s6788_s10 }
 0x2d3   :  { %v2730_v36 = vshrl.u32 %v10059_v50, %v2718_v20  ;;  %v2732_v51 = vshll.u32 %v10059_v50, %v2717_v8  ;;  %v2733_v30 = vshrl.u32 %v10060_v62, %v2718_v20  ;;  %v6145_v61 = vmin.u32 %v2665_v23, %v9007_v6  ;;  %v9045_v37 = vpop.eup %6709 }
 0x2d4   :  { %vm9028_vm5 = vcmp.le.f32.partialorder %v10243_v55, 0.7853982  ;;  %v2719_v31 = vshrl.u32 %v10050_v14, %v2718_v20  ;;  %v2722_v44 = vor.u32 %v2721_v21, %v2720_v58  ;;  %v2725_v19 = vor.u32 %v2724_v10, %v2723_v42 }
 0x2d5   :  { %v2728_v8 = vor.u32 %v2727_v9, %v2726_v33  ;;  %v2731_v55 = vor.u32 %v2730_v36, %v2729_v32  ;;  %v2734_v35 = vor.u32 %v2733_v30, %v2732_v51  ;;  %vm2735_vm3 = vcmp.lt.s32.totalorder %v9009_v24, 1  ;;  %v9048_v45 = vpop.eup %6711  ;;  %v6739_v51 = vld [vmem:[%s9889_s0 + $0x38] sm:$0xff] }
 0x2d6   :  { %v2667_v23 = vclz %v6145_v61  ;;  %vm2737_vm11 = vcmp.lt.s32.totalorder %v9009_v24, 3  ;;  %vm2738_vm8 = vcmp.lt.s32.totalorder %v9009_v24, 4  ;;  %v2743_v20 = vsel %vm2735_vm3, %v2722_v44, %v2725_v19  ;;  %5600 = vrot.lane.b32.xlu1 %v6739_v51, %s6788_s10 }
 0x2d7   :  { %v2740_v58 = vsel %vm2738_vm8, %v2728_v8, 2102212464  ;;  %v2744_v42 = vsel %vm2738_vm8, %v2731_v55, 920167782  ;;  %v2747_v21 = vsel %vm2735_vm3, %v2725_v19, %v2728_v8  ;;  %v2748_v33 = vsel %vm2738_vm8, %v2734_v35, 1326507024  ;;  %v9056_v10 = vpop.eup %6713 }
 0x2d8   :  { %v6146_v32 = vadd.s32 4294967294, %v2667_v23  ;;  %vm2736_vm0 = vcmp.lt.s32.totalorder %v9009_v24, 2  ;;  %v2745_v9 = vsel %vm2737_vm11, %v2728_v8, %v2744_v42  ;;  %v2749_v36 = vsel %vm2737_vm11, %v2731_v55, %v2748_v33  ;;  %v9067_v30 = vpop.eup %6715 }
 0x2d9   :  { %v2739_v35 = vsel %vm2735_vm3, %v2719_v31, %v2722_v44  ;;  %v2746_v61 = vsel %vm2736_vm0, %v2743_v20, %v2745_v9  ;;  %v2750_v43 = vsel %vm2736_vm0, %v2747_v21, %v2749_v36  ;;  %v3321_v8 = vsel %vm3314_vm12, %v3317_v59, %v3320_v16 }
 0x2da   :  { %vm2601_vm8 = vcmp.lt.s32.totalorder %v8392_v7, 0  ;;  %vm6147_vm15 = vcmp.lt.s32.totalorder %v6146_v32, 0  ;;  %v2741_v55 = vsel %vm2737_vm11, %v2725_v19, %v2740_v58  ;;  %v3322_v21 = vsel %vm715_vm6, nan, %v3321_v8  ;;  %v6740_v58 = vld [vmem:[%s9889_s0 + $0x40] sm:$0xff] }
 0x2db   :  { %v9081_v23 = vmul.u32.u64.low %v8993_v15, %v2750_v43  ;;  %v9082_v42 = vmul.u32.u64.high %v8993_v15, %v2750_v43, %v9081_v23  ;;  %v2670_v31 = vsel %vm6147_vm15, 0, %v6146_v32  ;;  %v2583_v0 = vsel %vm9028_vm5, %v8034_v39, %v8991_v52  ;;  %5517 = vrot.lane.b32.xlu0 %v3322_v21, %s6789_s11  ;;  %5602 = vrot.lane.b32.xlu1 %v6740_v58, %s6788_s10 }
 0x2dc   :  { %v9085_v44 = vmul.u32.u64.low %v8993_v15, %v2746_v61  ;;  %v9086_v20 = vmul.u32.u64.high %v8993_v15, %v2746_v61, %v9085_v44  ;;  %v2671_v59 = vsub.s32 32, %v2670_v31  ;;  %v2675_v16 = vsub.s32 4294967266, %v2670_v31 }
 0x2dd   :  { %vm10246_vm12 = vcmp.lt.s32.totalorder %v8974_v60, 2  ;;  %v2742_v33 = vsel %vm2736_vm0, %v2739_v35, %v2741_v55  ;;  %v2810_v32 = vand.u32 2139095040, %v8641_v5  ;;  %v10248_v9 = vand.u32 2147483647, %v8641_v5 }
 0x2de   :  { %v725_v19 = vsel %vm10246_vm12, %v9002_v56, %v9005_v18  ;;  %v2672_v60 = vshll.u32 %v9007_v6, %v2670_v31  ;;  %v2673_v56 = vshrl.u32 %v8981_v38, %v2671_v59  ;;  %v2676_v18 = vadd.s32 127, %v2675_v16  ;;  %v6741_v38 = vld [vmem:[%s9889_s0 + $0x48] sm:$0xff] }
 0x2df   :  { %v9107_v52 = vsel %vm715_vm6, nan, %v725_v19  ;;  %v2814_v36 = vand.u32 8388607, %v10248_v9  ;;  %vm2760_vm15 = vc.u32 %v9082_v42, %v9085_v44  ;;  %v2685_v51 = vsub.s32 4, %v8983_v27  ;;  %5604 = vrot.lane.b32.xlu1 %v6741_v38, %s6788_s10  ;;  %v10256_v9 = vld [vmem:[#allocation45_spill] sm:$0xff] }
 0x2e0   :  { %10247 = vst [vmem:[#allocation30_spill] sm:$0xff] %v9107_v52  ;;  %v2761_v24 = vadd.s32 1, %v9086_v20  ;;  %v2811_v35 = vshrl.u32 %v2810_v32, 23  ;;  %v816_v43 = vsel %vm7632_vm10, 0, %v10249_v2  ;;  %v2674_v8 = vor.u32 %v2673_v56, %v2672_v60  ;;  %v10261_v52 = vld [vmem:[#allocation9_spill] sm:$0xff] }
 0x2e1   :  { %v2677_v55 = vshll.u32 %v2676_v18, 23  ;;  %v2758_v23 = vmul.u32 %v8993_v15, %v2742_v33  ;;  %v820_v21 = vadd.s32 3, %v816_v43  ;;  %6717 = vcosq.f32 %v2583_v0 }
 0x2e2   :  { %v2762_v6 = vsel %vm2760_vm15, %v2761_v24, %v9086_v20  ;;  %v6152_v31 = vadd.s32 4294967169, %v2811_v35  ;;  %v2815_v59 = vor.u32 8388608, %v2814_v36  ;;  %6719 = vsinq.f32 %v2583_v0  ;;  %v6742_v35 = vld [vmem:[%s9889_s0 + $0x50] sm:$0xff] }
 0x2e3   :  { %v2678_v16 = vor.u32 4788187, %v2677_v55  ;;  %vm10025_vm10 = vcmp.lt.s32.totalorder %v8530_v22, 0  ;;  %v2763_v19 = vadd.s32 %v2762_v6, %v2758_v23  ;;  %v9127_v58 = vand.u32 3, %v820_v21  ;;  %5606 = vrot.lane.b32.xlu1 %v6742_v35, %s6788_s10  ;;  %v10258_v23 = vld [vmem:[#allocation42_spill] sm:$0xff] }
 0x2e4   :  { %v10251_v15 = vand.u32 2147483647, %v8392_v7  ;;  %v10252_v33 = vmov 0  ;;  %v9138_v32 = vsel %vm2601_vm8, %v2685_v51, %v8983_v27  ;;  %v2817_v20 = vadd.s32 1, %v6152_v31  ;;  %v10257_v51 = vld [vmem:[#allocation39_spill] sm:$0xff] }
 0x2e5   :  { %10255 = vst [vmem:[#allocation32_spill] sm:$0xff] %v9138_v32  ;;  %v824_v0 = vxor.u32 2147483648, %v10256_v9  ;;  %v9141_v36 = vand.u32 3, %v816_v43  ;;  %v2679_v60 = vand.u32 2147483647, %v2678_v16  ;;  %v2681_v56 = vcvt.s32.f32 %v2674_v8  ;;  %v6743_v16 = vld [vmem:[%s9889_s0 + $0x58] sm:$0xff] }
 0x2e6   :  { %vm9131_vm6 = vcmp.le.f32.partialorder %v10251_v15, 0.7853982  ;;  %v9144_v18 = vadd.s32 %v9085_v44, %v9082_v42  ;;  %v2764_v24 = vadd.s32 536870912, %v2763_v19  ;;  %vm2818_vm3 = vcmp.gt.s32.totalorder %v2817_v20, 0 }
 0x2e7   :  { %v10253_v33 = vsel %vm9131_vm6, 4294967295, %v10252_v33  ;;  %v9150_v27 = vshll.u32 %v2815_v59, 8  ;;  %vm823_vm11 = vcmp.eq.s32.totalorder %v9127_v58, 0  ;;  %v10021_v2 = vxor.u32 2147483648, %v10257_v51  ;;  %5608 = vrot.lane.b32.xlu1 %v6743_v16, %s6788_s10 }
 0x2e8   :  { %10254 = vst [vmem:[#allocation7_spill] sm:$0xff] %v10253_v33  ;;  %v2682_v61 = vmul.f32 %v2681_v56, %v2679_v60  ;;  %v2765_v43 = vshrl.u32 %v2764_v24, 30  ;;  %v2819_v8 = vsel %vm2818_vm3, %v2817_v20, 0  ;;  %vm3418_vm0 = vcmp.eq.s32.totalorder %v9141_v36, 0 }
 0x2e9   :  { %v2821_v42 = vand.u32 31, %v2819_v8  ;;  %v9156_v44 = vsel %vm3418_vm0, %v10257_v51, %v824_v0  ;;  %v9159_v55 = vsel %vm823_vm11, %v10257_v51, %v824_v0  ;;  %v9164_v38 = vsel %vm7719_vm7, 0, %v10258_v23 }
 0x2ea   :  { %v2683_v6 = vxor.u32 2147483648, %v2682_v61  ;;  %v2766_v31 = vshll.u32 %v2765_v43, 30  ;;  %v2789_v59 = vsub.s32 4, %v2765_v43  ;;  %vm3421_vm12 = vcmp.eq.s32.totalorder %v9141_v36, 2 }
 0x2eb   :  { %v2820_v15 = vshrl.u32 %v2819_v8, 5  ;;  %v2822_v20 = vsub.s32 32, %v2821_v42  ;;  %v2824_v0 = vshll.u32 %v10050_v14, %v2821_v42  ;;  %v3423_v60 = vsel %vm3421_vm12, %v10021_v2, %v10256_v9 }
 0x2ec   :  { %v2684_v56 = vsel %vm2601_vm8, %v2683_v6, %v2682_v61  ;;  %v9177_v24 = vsub.s32 %v2763_v19, %v2766_v31  ;;  %v2827_v35 = vshll.u32 %v10053_v53, %v2821_v42  ;;  %v2830_v23 = vshll.u32 %v10045_v46, %v2821_v42 }
 0x2ed   :  { %vm3417_vm7 = vcmp.lt.s32.totalorder %v9141_v36, 2  ;;  %v9184_v8 = vsel %vm10025_vm10, %v2789_v59, %v2765_v43  ;;  %v2825_v21 = vshrl.u32 %v10053_v53, %v2822_v20  ;;  %v2828_v16 = vshrl.u32 %v10045_v46, %v2822_v20  ;;  %v6744_v53 = vld [vmem:[%s9889_s0 + $0x60] sm:$0xff] }
 0x2ee   :  { %10260 = vst [vmem:[#allocation8_spill] sm:$0xff] %v9184_v8  ;;  %v2833_v2 = vshll.u32 %v10054_v3, %v2821_v42  ;;  %v2687_v19 = vsel %vm9131_vm6, %v8392_v7, %v2684_v56  ;;  %v2769_v61 = vsub.s32 0, %v9177_v24  ;;  %v2831_v6 = vshrl.u32 %v10054_v3, %v2822_v20  ;;  %5610 = vrot.lane.b32.xlu1 %v6744_v53, %s6788_s10  ;;  %v9203_v49 = vpop.eup %6717 }
 0x2ef   :  { %v2834_v31 = vshrl.u32 %v10059_v50, %v2822_v20  ;;  %vm819_vm8 = vweird.f32 %v10261_v52  ;;  %v2823_v46 = vshrl.u32 %v10050_v14, %v2822_v20  ;;  %v2826_v43 = vor.u32 %v2825_v21, %v2824_v0  ;;  %v9208_v32 = vpop.eup %6719  ;;  %v5717_v52 = vld [vmem:[%s9891_s2 + $0x20] sm:$0xff] }
 0x2f0   :  { %v2829_v59 = vor.u32 %v2828_v16, %v2827_v35  ;;  %v2836_v56 = vshll.u32 %v10059_v50, %v2821_v42  ;;  %vm826_vm15 = vcmp.eq.s32.totalorder %v9127_v58, 2  ;;  %v6149_v3 = vmin.u32 %v2769_v61, %v9177_v24  ;;  %v6745_v35 = vld [vmem:[%s9889_s0 + $0x68] sm:$0xff] }
 0x2f1   :  { %v2832_v8 = vor.u32 %v2831_v6, %v2830_v23  ;;  %v2835_v7 = vor.u32 %v2834_v31, %v2833_v2  ;;  %v2837_v33 = vshrl.u32 %v10060_v62, %v2822_v20  ;;  %6721 = vcosq.f32 %v2687_v19 }
 0x2f2   :  { %vm2839_vm11 = vcmp.lt.s32.totalorder %v2820_v15, 1  ;;  %vm2841_vm0 = vcmp.lt.s32.totalorder %v2820_v15, 3  ;;  %vm2842_vm12 = vcmp.lt.s32.totalorder %v2820_v15, 4  ;;  %v2771_v14 = vclz %v6149_v3  ;;  %5612 = vrot.lane.b32.xlu1 %v6745_v35, %s6788_s10  ;;  %v5719_v35 = vld [vmem:[%s9891_s2 + $0x30] sm:$0x7] }
 0x2f3   :  { %v2838_v50 = vor.u32 %v2837_v33, %v2836_v56  ;;  %v2843_v42 = vsel %vm2839_vm11, %v2823_v46, %v2826_v43  ;;  %v2844_v0 = vsel %vm2842_vm12, %v2832_v8, 2102212464  ;;  %v2847_v2 = vsel %vm2839_vm11, %v2826_v43, %v2829_v59 }
 0x2f4   :  { %v2845_v62 = vsel %vm2841_vm0, %v2829_v59, %v2844_v0  ;;  %v2848_v20 = vsel %vm2842_vm12, %v2835_v7, 920167782  ;;  %v2851_v23 = vsel %vm2839_vm11, %v2829_v59, %v2832_v8  ;;  %v6150_v21 = vadd.s32 4294967294, %v2771_v14 }
 0x2f5   :  { %vm2840_vm10 = vcmp.lt.s32.totalorder %v2820_v15, 2  ;;  %v2849_v16 = vsel %vm2841_vm0, %v2832_v8, %v2848_v20  ;;  %v2852_v61 = vsel %vm2842_vm12, %v2838_v50, 1326507024  ;;  %v3424_v53 = vsel %vm3417_vm7, %v9156_v44, %v3423_v60  ;;  %v6746_v8 = vld [vmem:[%s9889_s0 + $0x70] sm:$0xff] }
 0x2f6   :  { %v2846_v6 = vsel %vm2840_vm10, %v2843_v42, %v2845_v62  ;;  %v2850_v33 = vsel %vm2840_vm10, %v2847_v2, %v2849_v16  ;;  %v2853_v31 = vsel %vm2841_vm0, %v2835_v7, %v2852_v61  ;;  %vm6151_vm3 = vcmp.lt.s32.totalorder %v6150_v21, 0  ;;  %5614 = vrot.lane.b32.xlu1 %v6746_v8, %s6788_s10  ;;  %v10266_v20 = vld [vmem:[#allocation46_spill] sm:$0xff] }
 0x2f7   :  { %v2854_v46 = vsel %vm2840_vm10, %v2851_v23, %v2853_v31  ;;  %v9221_v56 = vmul.u32.u64.low %v9150_v27, %v2850_v33  ;;  %v9222_v43 = vmul.u32.u64.high %v9150_v27, %v2850_v33, %v9221_v56  ;;  %v2774_v59 = vsel %vm6151_vm3, 0, %v6150_v21 }
 0x2f8   :  { %v9230_v7 = vmul.u32.u64.low %v9150_v27, %v2854_v46  ;;  %v9231_v15 = vmul.u32.u64.high %v9150_v27, %v2854_v46, %v9230_v7  ;;  %v3425_v36 = vsel %vm819_vm8, nan, %v3424_v53  ;;  %6723 = vsinq.f32 %v2687_v19  ;;  %v5716_v53 = vld [vmem:[%s9891_s2 + $0x18] sm:$0xff] }
 0x2f9   :  { %v2775_v44 = vsub.s32 32, %v2774_v59  ;;  %v2779_v60 = vsub.s32 4294967266, %v2774_v59  ;;  %5519 = vrot.lane.b32.xlu0 %v3425_v36, %s6789_s11  ;;  %v10262_v3 = vxor.u32 2147483648, %v10257_v51  ;;  %v2776_v50 = vshll.u32 %v9177_v24, %v2774_v59  ;;  %v5718_v51 = vld [vmem:[%s9891_s2 + $0x28] sm:$0xff]  ;;  %v6748_v7 = vld [vmem:[%s9889_s0 + $0x80] sm:$0xff] }
 0x2fa   :  { %v2862_v42 = vmul.u32 %v9150_v27, %v2846_v6  ;;  %vm10263_vm10 = vcmp.lt.s32.totalorder %v9127_v58, 2  ;;  %v924_v19 = vadd.s32 3, %v9164_v38  ;;  %v2865_v24 = vadd.s32 1, %v9222_v43  ;;  %v6747_v58 = vld [vmem:[%s9889_s0 + $0x78] sm:$0xff] }
 0x2fb   :  { %v828_v14 = vsel %vm826_vm15, %v10262_v3, %v10256_v9  ;;  %v2777_v9 = vshrl.u32 %v9144_v18, %v2775_v44  ;;  %v2780_v62 = vadd.s32 127, %v2779_v60  ;;  %5616 = vrot.lane.b32.xlu1 %v6747_v58, %s6788_s10  ;;  %vm10264_vm7 = vcmask 1042432   ;;  %v10265_v18 = vld [vmem:[#allocation47_spill] sm:$0xff]  ;;  %v5715_v3 = vld [vmem:[%s9891_s2 + $0x10] sm:$0xff]  ;;  %v5714_v58 = vld [vmem:[%s9891_s2 + $0x8] sm:$0xff] }
 0x2fc   :  { %v829_v0 = vsel %vm10263_vm10, %v9159_v55, %v828_v14  ;;  %6513 = vmatpush3.msk.msra.mxu1 %vm10264_vm7, %v5719_v35  ;;  %vm2864_vm15 = vc.u32 %v9231_v15, %v9221_v56  ;;  %v925_v55 = vand.u32 3, %v924_v19  ;;  %v928_v2 = vxor.u32 2147483648, %v10265_v18 }
 0x2fd   :  { %v9257_v27 = vsel %vm819_vm8, nan, %v829_v0  ;;  %v931_v23 = vxor.u32 2147483648, %v10266_v20  ;;  %v10267_v21 = vmov 0.0   ;;  %vm10268_vm8 = vmmov %vm10264_vm7  ;;  %v2778_v16 = vor.u32 %v2777_v9, %v2776_v50  ;;  %v10272_v0 = vld [vmem:[#allocation43_spill] sm:$0xff]  ;;  %v10274_v9 = vld [vmem:[#allocation10_spill] sm:$0xff] }
 0x2fe   :  { %6507 = vmatprep.subr.mxu1 %v10267_v21  ;;  %6418 = vmatpush3.msk.msra.mxu0 %vm10268_vm8, %v5719_v35  ;;  %v2781_v61 = vshll.u32 %v2780_v62, 23  ;;  %vm2809_vm3 = vcmp.lt.s32.totalorder %v8641_v5, 0  ;;  %v2866_v6 = vsel %vm2864_vm15, %v2865_v24, %v9222_v43  ;;  %v3519_v33 = vand.u32 3, %v9164_v38  ;;  %v9281_v46 = vpop.eup %6721 }
 0x2ff   :  { %6514 = vmatpush3.msra.mxu1 %v5718_v51  ;;  %6419 = vmatprep.subr.mxu0 %v10267_v21  ;;  %v2867_v31 = vadd.s32 %v2866_v6, %v2862_v42  ;;  %vm926_vm11 = vcmp.lt.s32.totalorder %v925_v55, 2  ;;  %vm927_vm0 = vcmp.eq.s32.totalorder %v925_v55, 0  ;;  %vm930_vm12 = vcmp.eq.s32.totalorder %v925_v55, 2  ;;  %v10275_v6 = vld [vmem:[#allocation49_spill] sm:$0xff] }
 0x300   :  { %6508 = vmatprep.subr.mxu1 %v10267_v21  ;;  %6420 = vmatpush3.msra.mxu0 %v5718_v51  ;;  %v10269_v43 = vand.u32 2147483647, %v8530_v22  ;;  %v2782_v8 = vor.u32 4788187, %v2781_v61  ;;  %v2785_v59 = vcvt.s32.f32 %v2778_v16  ;;  %vm3520_vm7 = vcmp.lt.s32.totalorder %v3519_v33, 2 }
 0x301   :  { %vm3521_vm15 = vcmp.eq.s32.totalorder %v3519_v33, 0  ;;  %5618 = vrot.lane.b32.xlu1 %v6748_v7, %s6788_s10  ;;  %6515 = vmatpush3.msra.mxu1 %v5717_v52  ;;  %v2868_v36 = vadd.s32 536870912, %v2867_v31  ;;  %vm3524_vm8 = vcmp.eq.s32.totalorder %v3519_v33, 2  ;;  %v929_v60 = vsel %vm927_vm0, %v10266_v20, %v928_v2 }
 0x302   :  { %vm9285_vm10 = vcmp.le.f32.partialorder %v10269_v43, 0.7853982  ;;  %v3523_v44 = vsel %vm3521_vm15, %v10266_v20, %v928_v2  ;;  %6509 = vmatprep.subr.mxu1 %v10267_v21  ;;  %6421 = vmatprep.subr.mxu0 %v10267_v21  ;;  %v2783_v14 = vand.u32 2147483647, %v2782_v8  ;;  %v3526_v50 = vsel %vm3524_vm8, %v931_v23, %v10265_v18  ;;  %v5713_v43 = vld [vmem:[%s9891_s2] sm:$0xff] }
 0x303   :  { %v932_v42 = vsel %vm930_vm12, %v931_v23, %v10265_v18  ;;  %v1024_v35 = vsel %vm7738_vm13, 0, %v10272_v0  ;;  %6516 = vmatpush3.msra.mxu1 %v5716_v53  ;;  %6422 = vmatpush3.msra.mxu0 %v5717_v52  ;;  %v2869_v51 = vshrl.u32 %v2868_v36, 30  ;;  %vm923_vm0 = vweird.f32 %v10274_v9  ;;  %v6749_v52 = vld [vmem:[%s9889_s0 + $0x88] sm:$0xff]  ;;  %v10276_v36 = vld [vmem:[#allocation44_spill] sm:$0xff] }
 0x304   :  { %v3527_v62 = vsel %vm3520_vm7, %v3523_v44, %v3526_v50  ;;  %v933_v24 = vsel %vm926_vm11, %v929_v60, %v932_v42  ;;  %6510 = vmatprep.subr.mxu1 %v10267_v21  ;;  %6423 = vmatprep.subr.mxu0 %v10267_v21  ;;  %v2786_v18 = vmul.f32 %v2785_v59, %v2783_v14  ;;  %v1028_v23 = vadd.s32 3, %v1024_v35  ;;  %v10278_v50 = vld [vmem:[#allocation11_spill] sm:$0xff]  ;;  %v10279_v42 = vld [vmem:[#allocation48_spill] sm:$0xff] }
 0x305   :  { %v3528_v2 = vsel %vm923_vm0, nan, %v3527_v62  ;;  %v9315_v20 = vsel %vm923_vm0, nan, %v933_v24  ;;  %5620 = vrot.lane.b32.xlu1 %v6749_v52, %s6788_s10  ;;  %6517 = vmatpush3.msra.mxu1 %v5715_v3  ;;  %v9323_v55 = vadd.s32 %v9221_v56, %v9231_v15  ;;  %v2870_v16 = vshll.u32 %v2869_v51, 30  ;;  %v9334_v15 = vpop.eup %6723 }
 0x306   :  { %v2893_v61 = vsub.s32 4, %v2869_v51  ;;  %5521 = vrot.lane.b32.xlu0 %v3528_v2, %s6789_s11  ;;  %v1032_v33 = vxor.u32 2147483648, %v10275_v6  ;;  %6511 = vmatprep.subr.mxu1 %v10267_v21  ;;  %v2787_v8 = vxor.u32 2147483648, %v2786_v18  ;;  %v1029_v59 = vand.u32 3, %v1028_v23 }
 0x307   :  { %v3622_v7 = vand.u32 3, %v1024_v35  ;;  %v1128_v56 = vsel %vm7775_vm4, 0, %v10276_v36  ;;  %6518 = vmatpush3.msra.mxu1 %v5714_v58  ;;  %6424 = vmatpush3.msra.mxu0 %v5716_v53  ;;  %v9336_v60 = vsub.s32 %v2867_v31, %v2870_v16  ;;  %vm1027_vm13 = vweird.f32 %v10278_v50  ;;  %v10281_v53 = vld [vmem:[#allocation12_spill] sm:$0xff]  ;;  %v6750_v35 = vld [vmem:[%s9889_s0 + $0x90] sm:$0xff] }
 0x308   :  { %v9340_v14 = vsel %vm2809_vm3, %v2893_v61, %v2869_v51  ;;  %v1035_v0 = vxor.u32 2147483648, %v10279_v42  ;;  %6512 = vmatprep.subr.mxu1 %v10267_v21  ;;  %6425 = vmatprep.subr.mxu0 %v10267_v21  ;;  %vm10280_vm4 = vcmp.lt.s32.totalorder %v8530_v22, 0  ;;  %vm1030_vm11 = vcmp.lt.s32.totalorder %v1029_v59, 2  ;;  %v10282_v61 = vld [vmem:[#allocation54_spill] sm:$0xff] }
 0x309   :  { %v2788_v19 = vsel %vm10280_vm4, %v2787_v8, %v2786_v18  ;;  %vm1031_vm12 = vcmp.eq.s32.totalorder %v1029_v59, 0  ;;  %vm1131_vm7 = vweird.f32 %v10281_v53  ;;  %v1132_v31 = vadd.s32 3, %v1128_v56  ;;  %5622 = vrot.lane.b32.xlu1 %v6750_v35, %s6788_s10  ;;  %6519 = vmatpush3.msra.mxu1 %v5713_v43 }
 0x30a   :  { %v2791_v51 = vsel %vm9285_vm10, %v8530_v22, %v2788_v19  ;;  %v2873_v9 = vsub.s32 0, %v9336_v60  ;;  %vm1034_vm15 = vcmp.eq.s32.totalorder %v1029_v59, 2  ;;  %vm3624_vm8 = vcmp.eq.s32.totalorder %v3622_v7, 0  ;;  %6426 = vmatpush3.msra.mxu0 %v5715_v3 }
 0x30b   :  { %vm3623_vm0 = vcmp.lt.s32.totalorder %v3622_v7, 2  ;;  %v3626_v62 = vsel %vm3624_vm8, %v10279_v42, %v1032_v33  ;;  %vm3627_vm4 = vcmp.eq.s32.totalorder %v3622_v7, 2  ;;  %v1033_v24 = vsel %vm1031_vm12, %v10279_v42, %v1032_v33  ;;  %6427 = vmatprep.subr.mxu0 %v10267_v21  ;;  %v6751_v33 = vld [vmem:[%s9889_s0 + $0x98] sm:$0xff] }
 0x30c   :  { %6725 = vcosq.f32 %v2791_v51  ;;  %v6153_v18 = vmin.u32 %v2873_v9, %v9336_v60  ;;  %v3629_v2 = vsel %vm3627_vm4, %v1035_v0, %v10275_v6  ;;  %v1036_v23 = vsel %vm1034_vm15, %v1035_v0, %v10275_v6  ;;  %6428 = vmatpush3.msra.mxu0 %v5714_v58  ;;  %v10283_v6 = vld [vmem:[#allocation52_spill] sm:$0xff] }
 0x30d   :  { %v3630_v52 = vsel %vm3623_vm0, %v3626_v62, %v3629_v2  ;;  %v1037_v16 = vsel %vm1030_vm11, %v1033_v24, %v1036_v23  ;;  %v1133_v3 = vand.u32 3, %v1132_v31  ;;  %v1136_v8 = vxor.u32 2147483648, %v10282_v61  ;;  %5624 = vrot.lane.b32.xlu1 %v6751_v33, %s6788_s10  ;;  %6429 = vmatprep.subr.mxu0 %v10267_v21  ;;  %v10284_v31 = vld [vmem:[#allocation50_spill] sm:$0xff]  ;;  %v10286_v33 = vld [vmem:[#allocation13_spill] sm:$0xff] }
 0x30e   :  { %v2875_v7 = vclz %v6153_v18  ;;  %v3631_v36 = vsel %vm1027_vm13, nan, %v3630_v52  ;;  %v9374_v58 = vsel %vm1027_vm13, nan, %v1037_v16  ;;  %v1139_v59 = vxor.u32 2147483648, %v10283_v6  ;;  %6430 = vmatpush3.msra.mxu0 %v5713_v43  ;;  %v6752_v43 = vld [vmem:[%s9889_s0 + $0xa0] sm:$0xff] }
 0x30f   :  { %5523 = vrot.lane.b32.xlu0 %v3631_v36, %s6789_s11  ;;  %vm1134_vm11 = vcmp.lt.s32.totalorder %v1133_v3, 2  ;;  %vm1135_vm12 = vcmp.eq.s32.totalorder %v1133_v3, 0  ;;  %vm1138_vm15 = vcmp.eq.s32.totalorder %v1133_v3, 2  ;;  %v3725_v44 = vand.u32 3, %v1128_v56 }
 0x310   :  { %v6154_v42 = vadd.s32 4294967294, %v2875_v7  ;;  %v1137_v0 = vsel %vm1135_vm12, %v10283_v6, %v1136_v8  ;;  %v1140_v19 = vsel %vm1138_vm15, %v1139_v59, %v10282_v61  ;;  %v1232_v50 = vsel %vm7930_vm1, 0, %v10284_v31 }
 0x311   :  { %vm3726_vm13 = vcmp.lt.s32.totalorder %v3725_v44, 2  ;;  %vm3727_vm8 = vcmp.eq.s32.totalorder %v3725_v44, 0  ;;  %vm3730_vm0 = vcmp.eq.s32.totalorder %v3725_v44, 2  ;;  %v1141_v9 = vsel %vm1134_vm11, %v1137_v0, %v1140_v19  ;;  %5626 = vrot.lane.b32.xlu1 %v6752_v43, %s6788_s10  ;;  %v10287_v44 = vld [vmem:[#allocation51_spill] sm:$0xff] }
 0x312   :  { %vm6155_vm4 = vcmp.lt.s32.totalorder %v6154_v42, 0  ;;  %v3729_v56 = vsel %vm3727_vm8, %v10283_v6, %v1136_v8  ;;  %v3732_v62 = vsel %vm3730_vm0, %v1139_v59, %v10282_v61  ;;  %v9391_v24 = vsel %vm1131_vm7, nan, %v1141_v9 }
 0x313   :  { %6727 = vsinq.f32 %v2791_v51  ;;  %v2878_v18 = vsel %vm6155_vm4, 0, %v6154_v42  ;;  %v3733_v2 = vsel %vm3726_vm13, %v3729_v56, %v3732_v62  ;;  %v1236_v23 = vadd.s32 3, %v1232_v50  ;;  %v6753_v51 = vld [vmem:[%s9889_s0 + $0xa8] sm:$0xff] }
 0x314   :  { %v2879_v52 = vsub.s32 32, %v2878_v18  ;;  %v2883_v16 = vsub.s32 4294967266, %v2878_v18  ;;  %v3734_v3 = vsel %vm1131_vm7, nan, %v3733_v2  ;;  %vm1235_vm1 = vweird.f32 %v10286_v33  ;;  %v10296_v33 = vld [vmem:[#allocation61_spill] sm:$0xff] }
 0x315   :  { %5525 = vrot.lane.b32.xlu0 %v3734_v3, %s6789_s11  ;;  %v1237_v8 = vand.u32 3, %v1236_v23  ;;  %v1240_v61 = vxor.u32 2147483648, %v8184_v4  ;;  %v1243_v7 = vxor.u32 2147483648, %v8180_v11  ;;  %v3828_v36 = vand.u32 3, %v1232_v50  ;;  %5628 = vrot.lane.b32.xlu1 %v6753_v51, %s6788_s10  ;;  %v10291_v3 = vld [vmem:[#allocation58_spill] sm:$0xff]  ;;  %v10293_v51 = vld [vmem:[#allocation55_spill] sm:$0xff] }
 0x316   :  { %v2880_v6 = vshll.u32 %v9336_v60, %v2878_v18  ;;  %v2881_v53 = vshrl.u32 %v9323_v55, %v2879_v52  ;;  %v2884_v59 = vadd.s32 127, %v2883_v16  ;;  %v1336_v42 = vsel %vm8062_vm9, 0, %v10287_v44 }
 0x317   :  { %vm1238_vm7 = vcmp.lt.s32.totalorder %v1237_v8, 2  ;;  %vm1239_vm11 = vcmp.eq.s32.totalorder %v1237_v8, 0  ;;  %vm1242_vm12 = vcmp.eq.s32.totalorder %v1237_v8, 2  ;;  %vm3829_vm15 = vcmp.lt.s32.totalorder %v3828_v36, 2 }
 0x318   :  { %v2882_v0 = vor.u32 %v2881_v53, %v2880_v6  ;;  %v2885_v19 = vshll.u32 %v2884_v59, 23  ;;  %vm3830_vm13 = vcmp.eq.s32.totalorder %v3828_v36, 0  ;;  %vm3833_vm8 = vcmp.eq.s32.totalorder %v3828_v36, 2  ;;  %v10292_v36 = vld [vmem:[#allocation57_spill] sm:$0xff]  ;;  %v10295_v6 = vld [vmem:[#allocation14_spill] sm:$0xff] }
 0x319   :  { %v9408_v31 = vpop.eup %6725  ;;  %v3832_v35 = vsel %vm3830_vm13, %v8180_v11, %v1240_v61  ;;  %v3835_v60 = vsel %vm3833_vm8, %v1243_v7, %v8184_v4  ;;  %v1241_v55 = vsel %vm1239_vm11, %v8180_v11, %v1240_v61  ;;  %v1244_v50 = vsel %vm1242_vm12, %v1243_v7, %v8184_v4  ;;  %5630 = vrot.lane.b32.xlu1 %v6754_v28, %s6788_s10 }
 0x31a   :  { %v10288_v9 = vand.u32 2147483647, %v8641_v5  ;;  %v2886_v56 = vor.u32 4788187, %v2885_v19  ;;  %v2889_v62 = vcvt.s32.f32 %v2882_v0  ;;  %v3836_v18 = vsel %vm3829_vm15, %v3832_v35, %v3835_v60  ;;  %v6755_v0 = vld [vmem:[%s9889_s0 + $0xb8] sm:$0xff] }
 0x31b   :  { %v1245_v2 = vsel %vm1238_vm7, %v1241_v55, %v1244_v50  ;;  %v3837_v4 = vsel %vm1235_vm1, nan, %v3836_v18  ;;  %v1340_v23 = vadd.s32 3, %v1336_v42  ;;  %v1344_v52 = vxor.u32 2147483648, %v8206_v54  ;;  %v10297_v18 = vld [vmem:[#allocation60_spill] sm:$0xff] }
 0x31c   :  { %vm9420_vm9 = vcmp.le.f32.partialorder %v10288_v9, 0.7853982  ;;  %v9429_v11 = vsel %vm1235_vm1, nan, %v1245_v2  ;;  %v2887_v16 = vand.u32 2147483647, %v2886_v56  ;;  %5527 = vrot.lane.b32.xlu0 %v3837_v4, %s6789_s11  ;;  %v1347_v61 = vxor.u32 2147483648, %v10291_v3 }
 0x31d   :  { %v3931_v7 = vand.u32 3, %v1336_v42  ;;  %vm10294_vm0 = vnez %v10293_v51  ;;  %vm1339_vm4 = vweird.f32 %v10295_v6  ;;  %v1341_v53 = vand.u32 3, %v1340_v23  ;;  %5632 = vrot.lane.b32.xlu1 %v6755_v0, %s6788_s10  ;;  %v10299_v6 = vld [vmem:[#allocation62_spill] sm:$0xff] }
 0x31e   :  { %v1440_v8 = vsel %vm10294_vm0, 0, %v10292_v36  ;;  %v1448_v44 = vxor.u32 2147483648, %v10296_v33  ;;  %v2890_v19 = vmul.f32 %v2889_v62, %v2887_v16  ;;  %v1451_v2 = vxor.u32 2147483648, %v10297_v18 }
 0x31f   :  { %v1444_v59 = vadd.s32 3, %v1440_v8  ;;  %vm3932_vm1 = vcmp.lt.s32.totalorder %v3931_v7, 2  ;;  %vm3933_vm7 = vcmp.eq.s32.totalorder %v3931_v7, 0  ;;  %vm3936_vm11 = vcmp.eq.s32.totalorder %v3931_v7, 2 }
 0x320   :  { %vm1342_vm12 = vcmp.lt.s32.totalorder %v1341_v53, 2  ;;  %vm1343_vm15 = vcmp.eq.s32.totalorder %v1341_v53, 0  ;;  %vm1346_vm13 = vcmp.eq.s32.totalorder %v1341_v53, 2  ;;  %v3935_v42 = vsel %vm3933_vm7, %v10291_v3, %v1344_v52  ;;  %v9444_v35 = vpop.eup %6727  ;;  %v10300_v53 = vld [vmem:[#allocation56_spill] sm:$0xff] }
 0x321   :  { %v2891_v60 = vxor.u32 2147483648, %v2890_v19  ;;  %v3938_v55 = vsel %vm3936_vm11, %v1347_v61, %v8206_v54  ;;  %v1345_v50 = vsel %vm1343_vm15, %v10291_v3, %v1344_v52  ;;  %v1348_v28 = vsel %vm1346_vm13, %v1347_v61, %v8206_v54  ;;  %v10298_v52 = vld [vmem:[#allocation16_spill] sm:$0xff] }
 0x322   :  { %v3939_v9 = vsel %vm3932_vm1, %v3935_v42, %v3938_v55  ;;  %v1349_v56 = vsel %vm1342_vm12, %v1345_v50, %v1348_v28  ;;  %v1445_v62 = vand.u32 3, %v1444_v59  ;;  %v4034_v7 = vand.u32 3, %v1440_v8  ;;  %v10303_v50 = vld [vmem:[#allocation64_spill] sm:$0xff] }
 0x323   :  { %v2892_v4 = vsel %vm2809_vm3, %v2891_v60, %v2890_v19  ;;  %v3940_v23 = vsel %vm1339_vm4, nan, %v3939_v9  ;;  %v9456_v16 = vsel %vm1339_vm4, nan, %v1349_v56  ;;  %vm1443_vm8 = vweird.f32 %v10298_v52  ;;  %v10302_v60 = vld [vmem:[#allocation65_spill] sm:$0xff]  ;;  %v10304_v9 = vld [vmem:[#allocation63_spill] sm:$0xff] }
 0x324   :  { %v2895_v54 = vsel %vm9420_vm9, %v8641_v5, %v2892_v4  ;;  %5529 = vrot.lane.b32.xlu0 %v3940_v23, %s6789_s11  ;;  %vm1446_vm0 = vcmp.lt.s32.totalorder %v1445_v62, 2  ;;  %vm1447_vm1 = vcmp.eq.s32.totalorder %v1445_v62, 0  ;;  %vm1450_vm3 = vcmp.eq.s32.totalorder %v1445_v62, 2  ;;  %v10305_v56 = vld [vmem:[#allocation59_spill] sm:$0xff] }
 0x325   :  { %6729 = vcosq.f32 %v2895_v54  ;;  %vm4036_vm7 = vcmp.eq.s32.totalorder %v4034_v7, 0  ;;  %vm4039_vm11 = vcmp.eq.s32.totalorder %v4034_v7, 2  ;;  %vm4035_vm12 = vcmp.lt.s32.totalorder %v4034_v7, 2 }
 0x326   :  { %v4038_v3 = vsel %vm4036_vm7, %v10297_v18, %v1448_v44  ;;  %v4041_v61 = vsel %vm4039_vm11, %v1451_v2, %v10296_v33  ;;  %v1449_v36 = vsel %vm1447_vm1, %v10297_v18, %v1448_v44  ;;  %6731 = vsinq.f32 %v2895_v54  ;;  %v10307_v18 = vld [vmem:[#allocation17_spill] sm:$0xff] }
 0x327   :  { %v4042_v51 = vsel %vm4035_vm12, %v4038_v3, %v4041_v61  ;;  %v1452_v8 = vsel %vm1450_vm3, %v1451_v2, %v10296_v33  ;;  %vm10301_vm4 = vnez %v10300_v53  ;;  %v1552_v55 = vxor.u32 2147483648, %v10302_v60  ;;  %v10308_v53 = vld [vmem:[#allocation68_spill] sm:$0xff] }
 0x328   :  { %v1544_v59 = vsel %vm10301_vm4, 0, %v10299_v6  ;;  %v4043_v0 = vsel %vm1443_vm8, nan, %v4042_v51  ;;  %v1453_v19 = vsel %vm1446_vm0, %v1449_v36, %v1452_v8  ;;  %v1555_v28 = vxor.u32 2147483648, %v10303_v50 }
 0x329   :  { %v1548_v42 = vadd.s32 3, %v1544_v59  ;;  %5531 = vrot.lane.b32.xlu0 %v4043_v0, %s6789_s11  ;;  %v9476_v44 = vsel %vm1443_vm8, nan, %v1453_v19  ;;  %v4137_v33 = vand.u32 3, %v1544_v59  ;;  %vm10306_vm15 = vnez %v10305_v56  ;;  %v10309_v59 = vld [vmem:[#allocation66_spill] sm:$0xff] }
 0x32a   :  { %v1648_v62 = vsel %vm10306_vm15, 0, %v10304_v9  ;;  %vm1547_vm13 = vweird.f32 %v10307_v18  ;;  %v1656_v23 = vxor.u32 2147483648, %v8459_v40  ;;  %v1659_v7 = vxor.u32 2147483648, %v8354_v17  ;;  %v10311_v9 = vld [vmem:[#allocation18_spill] sm:$0xff] }
 0x32b   :  { %v1549_v2 = vand.u32 3, %v1548_v42  ;;  %v1652_v4 = vadd.s32 3, %v1648_v62  ;;  %vm4138_vm0 = vcmp.lt.s32.totalorder %v4137_v33, 2  ;;  %vm4139_vm1 = vcmp.eq.s32.totalorder %v4137_v33, 0 }
 0x32c   :  { %vm4142_vm3 = vcmp.eq.s32.totalorder %v4137_v33, 2  ;;  %v4141_v54 = vsel %vm4139_vm1, %v10303_v50, %v1552_v55  ;;  %v4240_v6 = vand.u32 3, %v1648_v62  ;;  %vm10310_vm12 = vnez %v10309_v59  ;;  %v10318_v59 = vld [vmem:[#allocation75_spill] sm:$0xff] }
 0x32d   :  { %vm1550_vm8 = vcmp.lt.s32.totalorder %v1549_v2, 2  ;;  %vm1551_vm7 = vcmp.eq.s32.totalorder %v1549_v2, 0  ;;  %vm1554_vm11 = vcmp.eq.s32.totalorder %v1549_v2, 2  ;;  %v4144_v52 = vsel %vm4142_vm3, %v1555_v28, %v10302_v60 }
 0x32e   :  { %v1553_v3 = vsel %vm1551_vm7, %v10303_v50, %v1552_v55  ;;  %v1556_v61 = vsel %vm1554_vm11, %v1555_v28, %v10302_v60  ;;  %v1653_v36 = vand.u32 3, %v1652_v4  ;;  %v4145_v51 = vsel %vm4138_vm0, %v4141_v54, %v4144_v52  ;;  %v10312_v52 = vld [vmem:[#allocation73_spill] sm:$0xff] }
 0x32f   :  { %v1557_v8 = vsel %vm1550_vm8, %v1553_v3, %v1556_v61  ;;  %v1752_v0 = vsel %vm10310_vm12, 0, %v10308_v53  ;;  %v4146_v19 = vsel %vm1547_vm13, nan, %v4145_v51  ;;  %vm4241_vm3 = vcmp.lt.s32.totalorder %v4240_v6, 2 }
 0x330   :  { %v9496_v42 = vsel %vm1547_vm13, nan, %v1557_v8  ;;  %vm1654_vm4 = vcmp.lt.s32.totalorder %v1653_v36, 2  ;;  %vm1655_vm15 = vcmp.eq.s32.totalorder %v1653_v36, 0  ;;  %5533 = vrot.lane.b32.xlu0 %v4146_v19, %s6789_s11  ;;  %vm1658_vm1 = vcmp.eq.s32.totalorder %v1653_v36, 2  ;;  %v10315_v36 = vld [vmem:[#allocation70_spill] sm:$0xff] }
 0x331   :  { %vm4242_vm0 = vcmp.eq.s32.totalorder %v4240_v6, 0  ;;  %vm4245_vm8 = vcmp.eq.s32.totalorder %v4240_v6, 2  ;;  %v1657_v50 = vsel %vm1655_vm15, %v8354_v17, %v1656_v23  ;;  %v1660_v28 = vsel %vm1658_vm1, %v1659_v7, %v8459_v40  ;;  %v10317_v6 = vld [vmem:[#allocation76_spill] sm:$0xff] }
 0x332   :  { %v4244_v60 = vsel %vm4242_vm0, %v8354_v17, %v1656_v23  ;;  %v4247_v55 = vsel %vm4245_vm8, %v1659_v7, %v8459_v40  ;;  %v9503_v33 = vpop.eup %6729  ;;  %vm1651_vm13 = vweird.f32 %v10311_v9  ;;  %v1661_v62 = vsel %vm1654_vm4, %v1657_v50, %v1660_v28  ;;  %v10313_v17 = vld [vmem:[#allocation21_spill] sm:$0xff] }
 0x333   :  { %v4248_v56 = vsel %vm4241_vm3, %v4244_v60, %v4247_v55  ;;  %v1756_v18 = vadd.s32 3, %v1752_v0  ;;  %v9506_v4 = vsel %vm1651_vm13, nan, %v1661_v62  ;;  %v1760_v54 = vxor.u32 2147483648, %v8540_v34  ;;  %v9510_v61 = vpop.eup %6731  ;;  %v10314_v7 = vld [vmem:[#allocation69_spill] sm:$0xff] }
 0x334   :  { %v4249_v2 = vsel %vm1651_vm13, nan, %v4248_v56  ;;  %v1763_v3 = vxor.u32 2147483648, %v10312_v52  ;;  %vm1755_vm7 = vweird.f32 %v10313_v17  ;;  %v4343_v23 = vand.u32 3, %v1752_v0 }
 0x335   :  { %5535 = vrot.lane.b32.xlu0 %v4249_v2, %s6789_s11  ;;  %v1757_v40 = vand.u32 3, %v1756_v18  ;;  %vm10316_vm11 = vnez %v10315_v36  ;;  %v1864_v53 = vxor.u32 2147483648, %v10317_v6  ;;  %v1867_v19 = vxor.u32 2147483648, %v10318_v59  ;;  %v10319_v2 = vld [vmem:[#allocation23_spill] sm:$0xff] }
 0x336   :  { %v1856_v51 = vsel %vm10316_vm11, 0, %v10314_v7  ;;  %vm4344_vm1 = vcmp.lt.s32.totalorder %v4343_v23, 2  ;;  %vm4345_vm3 = vcmp.eq.s32.totalorder %v4343_v23, 0  ;;  %vm4348_vm0 = vcmp.eq.s32.totalorder %v4343_v23, 2  ;;  %v10320_v7 = vld [vmem:[#allocation72_spill] sm:$0xff]  ;;  %v10321_v36 = vld [vmem:[#allocation71_spill] sm:$0xff] }
 0x337   :  { %v1860_v8 = vadd.s32 3, %v1856_v51  ;;  %v4446_v60 = vand.u32 3, %v1856_v51  ;;  %vm1758_vm12 = vcmp.lt.s32.totalorder %v1757_v40, 2  ;;  %vm1759_vm4 = vcmp.eq.s32.totalorder %v1757_v40, 0 }
 0x338   :  { %vm1762_vm15 = vcmp.eq.s32.totalorder %v1757_v40, 2  ;;  %v1761_v55 = vsel %vm1759_vm4, %v10312_v52, %v1760_v54  ;;  %v4347_v50 = vsel %vm4345_vm3, %v10312_v52, %v1760_v54  ;;  %v4350_v28 = vsel %vm4348_vm0, %v1763_v3, %v8540_v34 }
 0x339   :  { %v1764_v0 = vsel %vm1762_vm15, %v1763_v3, %v8540_v34  ;;  %v1861_v56 = vand.u32 3, %v1860_v8  ;;  %v4351_v62 = vsel %vm4344_vm1, %v4347_v50, %v4350_v28  ;;  %vm1859_vm8 = vweird.f32 %v10319_v2  ;;  %v10328_v2 = vld [vmem:[#allocation6_spill] sm:$0xff] }
 0x33a   :  { %v1765_v9 = vsel %vm1758_vm12, %v1761_v55, %v1764_v0  ;;  %vm4448_vm13 = vcmp.eq.s32.totalorder %v4446_v60, 0  ;;  %v4352_v40 = vsel %vm1755_vm7, nan, %v4351_v62  ;;  %vm4451_vm12 = vcmp.eq.s32.totalorder %v4446_v60, 2 }
 0x33b   :  { %v9525_v18 = vsel %vm1755_vm7, nan, %v1765_v9  ;;  %vm1862_vm11 = vcmp.lt.s32.totalorder %v1861_v56, 2  ;;  %vm1863_vm4 = vcmp.eq.s32.totalorder %v1861_v56, 0  ;;  %vm1866_vm15 = vcmp.eq.s32.totalorder %v1861_v56, 2  ;;  %5537 = vrot.lane.b32.xlu0 %v4352_v40, %s6789_s11  ;;  %v10327_v9 = vld [vmem:[#allocation29_spill] sm:$0xff] }
 0x33c   :  { %v4450_v34 = vsel %vm4448_vm13, %v10318_v59, %v1864_v53  ;;  %v1865_v54 = vsel %vm1863_vm4, %v10318_v59, %v1864_v53  ;;  %v1868_v52 = vsel %vm1866_vm15, %v1867_v19, %v10317_v6  ;;  %vm4447_vm1 = vcmp.lt.s32.totalorder %v4446_v60, 2  ;;  %v10323_v59 = vld [vmem:[#allocation15_spill] sm:$0xff] }
 0x33d   :  { %v4453_v3 = vsel %vm4451_vm12, %v1867_v19, %v10317_v6  ;;  %v1869_v23 = vsel %vm1862_vm11, %v1865_v54, %v1868_v52  ;;  %vm10322_vm3 = vnez %v10321_v36  ;;  %v1968_v0 = vxor.u32 2147483648, %v8634_v12  ;;  %v10324_v6 = vld [vmem:[#allocation77_spill] sm:$0xff]  ;;  %v10325_v19 = vld [vmem:[#allocation74_spill] sm:$0xff] }
 0x33e   :  { %v1960_v17 = vsel %vm10322_vm3, 0, %v10320_v7  ;;  %v4454_v51 = vsel %vm4447_vm1, %v4450_v34, %v4453_v3  ;;  %v9540_v8 = vsel %vm1859_vm8, nan, %v1869_v23  ;;  %v1971_v60 = vxor.u32 2147483648, %v10323_v59 }
 0x33f   :  { %v1964_v55 = vadd.s32 3, %v1960_v17  ;;  %v4455_v53 = vsel %vm1859_vm8, nan, %v4454_v51  ;;  %v4549_v50 = vand.u32 3, %v1960_v17  ;;  %vm10326_vm7 = vnez %v10325_v19 }
 0x340   :  { %v2064_v28 = vsel %vm10326_vm7, 0, %v10324_v6  ;;  %5539 = vrot.lane.b32.xlu0 %v4455_v53, %s6789_s11  ;;  %vm1963_vm0 = vweird.f32 %v10327_v9  ;;  %v2072_v40 = vxor.u32 2147483648, %v8743_v1  ;;  %v2075_v34 = vxor.u32 2147483648, %v10328_v2  ;;  %v10330_v53 = vld [vmem:[#allocation78_spill] sm:$0xff] }
 0x341   :  { %v1965_v56 = vand.u32 3, %v1964_v55  ;;  %v2068_v62 = vadd.s32 3, %v2064_v28  ;;  %vm4550_vm13 = vcmp.lt.s32.totalorder %v4549_v50, 2  ;;  %vm4551_vm11 = vcmp.eq.s32.totalorder %v4549_v50, 0  ;;  %v10329_v55 = vld [vmem:[#allocation79_spill] sm:$0xff] }
 0x342   :  { %vm4554_vm4 = vcmp.eq.s32.totalorder %v4549_v50, 2  ;;  %v4553_v54 = vsel %vm4551_vm11, %v10323_v59, %v1968_v0  ;;  %v4652_v51 = vand.u32 3, %v2064_v28  ;;  %vm10331_vm1 = vnez %v10330_v53  ;;  %v10332_v28 = vld [vmem:[#allocation33_spill] sm:$0xff] }
 0x343   :  { %vm1966_vm8 = vcmp.lt.s32.totalorder %v1965_v56, 2  ;;  %vm1967_vm15 = vcmp.eq.s32.totalorder %v1965_v56, 0  ;;  %vm1970_vm12 = vcmp.eq.s32.totalorder %v1965_v56, 2  ;;  %v4556_v52 = vsel %vm4554_vm4, %v1971_v60, %v8634_v12 }
 0x344   :  { %v1969_v3 = vsel %vm1967_vm15, %v10323_v59, %v1968_v0  ;;  %v1972_v23 = vsel %vm1970_vm12, %v1971_v60, %v8634_v12  ;;  %v2069_v7 = vand.u32 3, %v2068_v62  ;;  %v4557_v36 = vsel %vm4550_vm13, %v4553_v54, %v4556_v52 }
 0x345   :  { %v1973_v17 = vsel %vm1966_vm8, %v1969_v3, %v1972_v23  ;;  %v2168_v50 = vsel %vm10331_vm1, 0, %v10329_v55  ;;  %v4558_v6 = vsel %vm1963_vm0, nan, %v4557_v36  ;;  %vm4653_vm4 = vcmp.lt.s32.totalorder %v4652_v51, 2  ;;  %v10333_v3 = vld [vmem:[#allocation25_spill] sm:$0xff] }
 0x346   :  { %v9564_v19 = vsel %vm1963_vm0, nan, %v1973_v17  ;;  %vm2070_vm3 = vcmp.lt.s32.totalorder %v2069_v7, 2  ;;  %vm2071_vm7 = vcmp.eq.s32.totalorder %v2069_v7, 0  ;;  %5541 = vrot.lane.b32.xlu0 %v4558_v6, %s6789_s11  ;;  %vm2074_vm11 = vcmp.eq.s32.totalorder %v2069_v7, 2  ;;  %v10334_v7 = vld [vmem:[#allocation24_spill] sm:$0xff] }
 0x347   :  { %vm4654_vm13 = vcmp.eq.s32.totalorder %v4652_v51, 0  ;;  %vm4657_vm8 = vcmp.eq.s32.totalorder %v4652_v51, 2  ;;  %v2073_v59 = vsel %vm2071_vm7, %v10328_v2, %v2072_v40  ;;  %v2076_v60 = vsel %vm2074_vm11, %v2075_v34, %v8743_v1  ;;  %v10335_v17 = vld [vmem:[#allocation36_spill] sm:$0xff] }
 0x348   :  { %v4656_v12 = vsel %vm4654_vm13, %v10328_v2, %v2072_v40  ;;  %v4659_v0 = vsel %vm4657_vm8, %v2075_v34, %v8743_v1  ;;  %vm2067_vm15 = vweird.f32 %v10332_v28  ;;  %v2077_v56 = vsel %vm2070_vm3, %v2073_v59, %v2076_v60  ;;  %v10336_v2 = vld [vmem:[#allocation80_spill] sm:$0xff] }
 0x349   :  { %v4660_v9 = vsel %vm4653_vm4, %v4656_v12, %v4659_v0  ;;  %v2172_v62 = vadd.s32 3, %v2168_v50  ;;  %v9572_v52 = vsel %vm2067_vm15, nan, %v2077_v56  ;;  %v2176_v23 = vxor.u32 2147483648, %v10333_v3 }
 0x34a   :  { %v4661_v54 = vsel %vm2067_vm15, nan, %v4660_v9  ;;  %v2179_v36 = vxor.u32 2147483648, %v10334_v7  ;;  %vm2171_vm0 = vweird.f32 %v10335_v17  ;;  %v4755_v40 = vand.u32 3, %v2168_v50 }
 0x34b   :  { %5543 = vrot.lane.b32.xlu0 %v4661_v54, %s6789_s11  ;;  %v2173_v51 = vand.u32 3, %v2172_v62  ;;  %v2272_v34 = vsel %vm8777_vm14, 0, %v10336_v2  ;;  %v2280_v53 = vxor.u32 2147483648, %v9037_v48  ;;  %v2283_v6 = vxor.u32 2147483648, %v8887_v26  ;;  %v10338_v54 = vld [vmem:[#allocation41_spill] sm:$0xff] }
 0x34c   :  { %v2276_v55 = vadd.s32 3, %v2272_v34  ;;  %v4858_v12 = vand.u32 3, %v2272_v34  ;;  %vm4756_vm7 = vcmp.lt.s32.totalorder %v4755_v40, 2  ;;  %vm4757_vm11 = vcmp.eq.s32.totalorder %v4755_v40, 0  ;;  %v10339_v2 = vld [vmem:[#allocation81_spill] sm:$0xff] }
 0x34d   :  { %vm2174_vm12 = vcmp.lt.s32.totalorder %v2173_v51, 2  ;;  %vm2175_vm1 = vcmp.eq.s32.totalorder %v2173_v51, 0  ;;  %vm2178_vm3 = vcmp.eq.s32.totalorder %v2173_v51, 2  ;;  %vm4760_vm4 = vcmp.eq.s32.totalorder %v4755_v40, 2 }
 0x34e   :  { %v2177_v0 = vsel %vm2175_vm1, %v10334_v7, %v2176_v23  ;;  %v2180_v50 = vsel %vm2178_vm3, %v2179_v36, %v10333_v3  ;;  %v4759_v59 = vsel %vm4757_vm11, %v10334_v7, %v2176_v23  ;;  %v4762_v60 = vsel %vm4760_vm4, %v2179_v36, %v10333_v3 }
 0x34f   :  { %v2181_v28 = vsel %vm2174_vm12, %v2177_v0, %v2180_v50  ;;  %v2277_v9 = vand.u32 3, %v2276_v55  ;;  %v4763_v56 = vsel %vm4756_vm7, %v4759_v59, %v4762_v60  ;;  %vm2275_vm14 = vweird.f32 %v10338_v54 }
 0x350   :  { %v9589_v62 = vsel %vm2171_vm0, nan, %v2181_v28  ;;  %vm4860_vm13 = vcmp.eq.s32.totalorder %v4858_v12, 0  ;;  %v4764_v51 = vsel %vm2171_vm0, nan, %v4763_v56  ;;  %vm4863_vm12 = vcmp.eq.s32.totalorder %v4858_v12, 2 }
 0x351   :  { %vm2278_vm8 = vcmp.lt.s32.totalorder %v2277_v9, 2  ;;  %vm2279_vm15 = vcmp.eq.s32.totalorder %v2277_v9, 0  ;;  %vm2282_vm1 = vcmp.eq.s32.totalorder %v2277_v9, 2  ;;  %5545 = vrot.lane.b32.xlu0 %v4764_v51, %s6789_s11  ;;  %v4862_v3 = vsel %vm4860_vm13, %v8887_v26, %v2280_v53 }
 0x352   :  { %v2281_v23 = vsel %vm2279_vm15, %v8887_v26, %v2280_v53  ;;  %v2284_v7 = vsel %vm2282_vm1, %v2283_v6, %v9037_v48  ;;  %vm4859_vm3 = vcmp.lt.s32.totalorder %v4858_v12, 2  ;;  %v4865_v36 = vsel %vm4863_vm12, %v2283_v6, %v9037_v48 }
 0x353   :  { %v2285_v40 = vsel %vm2278_vm8, %v2281_v23, %v2284_v7  ;;  %vm10340_vm7 = vnez %v10339_v2  ;;  %v4866_v1 = vsel %vm4859_vm3, %v4862_v3, %v4865_v36  ;;  %v2384_v0 = vxor.u32 2147483648, %v9048_v45  ;;  %v9636_v2 = vpop.permute.xlu1 %5590 }
 0x354   :  { %v2376_v17 = vsel %vm10340_vm7, 0, %v8950_v41  ;;  %v9604_v34 = vsel %vm2275_vm14, nan, %v2285_v40  ;;  %v4867_v26 = vsel %vm2275_vm14, nan, %v4866_v1  ;;  %v2387_v53 = vxor.u32 2147483648, %v9045_v37 }
 0x355   :  { %v2380_v55 = vadd.s32 3, %v2376_v17  ;;  %v4961_v12 = vand.u32 3, %v2376_v17  ;;  %v2480_v48 = vsel %vm8891_vm2, 0, %v8967_v47  ;;  %5547 = vrot.lane.b32.xlu0 %v4867_v26, %s6789_s11  ;;  %vm2379_vm0 = vweird.f32 %v7895_v57  ;;  %v10341_v26 = vld [vmem:[#allocation32_spill] sm:$0xff] }
 0x356   :  { %v2484_v6 = vadd.s32 3, %v2480_v48  ;;  %v2488_v50 = vxor.u32 2147483648, %v9067_v30  ;;  %v2491_v59 = vxor.u32 2147483648, %v9056_v10  ;;  %v5064_v51 = vand.u32 3, %v2480_v48 }
 0x357   :  { %v2381_v41 = vand.u32 3, %v2380_v55  ;;  %vm4962_vm11 = vcmp.lt.s32.totalorder %v4961_v12, 2  ;;  %vm4963_vm4 = vcmp.eq.s32.totalorder %v4961_v12, 0  ;;  %vm4966_vm13 = vcmp.eq.s32.totalorder %v4961_v12, 2 }
 0x358   :  { %v4965_v60 = vsel %vm4963_vm4, %v9045_v37, %v2384_v0  ;;  %v4968_v13 = vsel %vm4966_vm13, %v2387_v53, %v9048_v45  ;;  %v2485_v9 = vand.u32 3, %v2484_v6  ;;  %v2584_v3 = vsel %vm9028_vm5, 0, %v8972_v29 }
 0x359   :  { %vm2382_vm14 = vcmp.lt.s32.totalorder %v2381_v41, 2  ;;  %vm2383_vm8 = vcmp.eq.s32.totalorder %v2381_v41, 0  ;;  %vm2386_vm15 = vcmp.eq.s32.totalorder %v2381_v41, 2  ;;  %v4969_v56 = vsel %vm4962_vm11, %v4965_v60, %v4968_v13 }
 0x35a   :  { %v2385_v47 = vsel %vm2383_vm8, %v9045_v37, %v2384_v0  ;;  %v2388_v28 = vsel %vm2386_vm15, %v2387_v53, %v9048_v45  ;;  %v4970_v23 = vsel %vm2379_vm0, nan, %v4969_v56  ;;  %vm2486_vm2 = vcmp.lt.s32.totalorder %v2485_v9, 2 }
 0x35b   :  { %v2389_v54 = vsel %vm2382_vm14, %v2385_v47, %v2388_v28  ;;  %vm2487_vm1 = vcmp.eq.s32.totalorder %v2485_v9, 0  ;;  %5549 = vrot.lane.b32.xlu0 %v4970_v23, %s6789_s11  ;;  %vm2490_vm12 = vcmp.eq.s32.totalorder %v2485_v9, 2  ;;  %vm5065_vm3 = vcmp.lt.s32.totalorder %v5064_v51, 2  ;;  %v9653_v9 = vpop.permute.xlu1 %5515 }
 0x35c   :  { %v9628_v7 = vsel %vm2379_vm0, nan, %v2389_v54  ;;  %vm5066_vm7 = vcmp.eq.s32.totalorder %v5064_v51, 0  ;;  %vm5069_vm11 = vcmp.eq.s32.totalorder %v5064_v51, 2  ;;  %v2489_v29 = vsel %vm2487_vm1, %v9056_v10, %v2488_v50  ;;  %v10343_v51 = vld [vmem:[#allocation67_spill] sm:$0xff] }
 0x35d   :  { %v5068_v45 = vsel %vm5066_vm7, %v9056_v10, %v2488_v50  ;;  %v5071_v63 = vsel %vm5069_vm11, %v2491_v59, %v9067_v30  ;;  %v2492_v37 = vsel %vm2490_vm12, %v2491_v59, %v9067_v30  ;;  %vm2483_vm5 = vweird.f32 %v7970_v25 }
 0x35e   :  { %v5072_v57 = vsel %vm5065_vm3, %v5068_v45, %v5071_v63  ;;  %v2493_v36 = vsel %vm2486_vm2, %v2489_v29, %v2492_v37  ;;  %v2588_v40 = vadd.s32 3, %v2584_v3  ;;  %v2592_v55 = vxor.u32 2147483648, %v9208_v32  ;;  %v9666_v45 = vpop.permute.xlu0 %5513 }
 0x35f   :  { %v5073_v17 = vsel %vm2483_vm5, nan, %v5072_v57  ;;  %v9638_v1 = vsel %vm2483_vm5, nan, %v2493_v36  ;;  %v2595_v0 = vxor.u32 2147483648, %v9203_v49  ;;  %vm2587_vm0 = vweird.f32 %v8034_v39  ;;  %v10344_v39 = vld [vmem:[#allocation8_spill] sm:$0xff]  ;;  %v9683_v38 = vpop.permute.xlu1 %5592 }
 0x360   :  { %5551 = vrot.lane.b32.xlu0 %v5073_v17, %s6789_s11  ;;  %v2589_v10 = vand.u32 3, %v2588_v40  ;;  %v5167_v30 = vand.u32 3, %v2584_v3  ;;  %v2688_v53 = vsel %vm9131_vm6, 0, %v10341_v26  ;;  %v2696_v48 = vxor.u32 2147483648, %v9334_v15 }
 0x361   :  { %v2692_v12 = vadd.s32 3, %v2688_v53  ;;  %v2699_v41 = vxor.u32 2147483648, %v9281_v46  ;;  %v5270_v6 = vand.u32 3, %v2688_v53  ;;  %vm2691_vm6 = vweird.f32 %v10343_v51  ;;  %v10348_v53 = vld [vmem:[#allocation27_spill] sm:$0xff]  ;;  %v10350_v51 = vld [vmem:[#allocation5_spill] sm:$0xff] }
 0x362   :  { %vm2590_vm4 = vcmp.lt.s32.totalorder %v2589_v10, 2  ;;  %vm2591_vm13 = vcmp.eq.s32.totalorder %v2589_v10, 0  ;;  %vm2594_vm14 = vcmp.eq.s32.totalorder %v2589_v10, 2  ;;  %vm5168_vm8 = vcmp.lt.s32.totalorder %v5167_v30, 2  ;;  %v10346_v10 = vld [vmem:[#allocation19_spill] sm:$0xff] }
 0x363   :  { %vm5169_vm15 = vcmp.eq.s32.totalorder %v5167_v30, 0  ;;  %vm5172_vm2 = vcmp.eq.s32.totalorder %v5167_v30, 2  ;;  %v2593_v50 = vsel %vm2591_vm13, %v9203_v49, %v2592_v55  ;;  %v2596_v59 = vsel %vm2594_vm14, %v2595_v0, %v9208_v32 }
 0x364   :  { %v5171_v60 = vsel %vm5169_vm15, %v9203_v49, %v2592_v55  ;;  %v5174_v13 = vsel %vm5172_vm2, %v2595_v0, %v9208_v32  ;;  %v2597_v47 = vsel %vm2590_vm4, %v2593_v50, %v2596_v59  ;;  %v2693_v28 = vand.u32 3, %v2692_v12  ;;  %v5589_v50 = vpop.permute.xlu0 %5588 }
 0x365   :  { %v5175_v56 = vsel %vm5168_vm8, %v5171_v60, %v5174_v13  ;;  %v9657_v54 = vsel %vm2587_vm0, nan, %v2597_v47  ;;  %vm5272_vm1 = vcmp.eq.s32.totalorder %v5270_v6, 0  ;;  %vm5275_vm11 = vcmp.eq.s32.totalorder %v5270_v6, 2 }
 0x366   :  { %v5176_v3 = vsel %vm2587_vm0, nan, %v5175_v56  ;;  %vm2694_vm12 = vcmp.lt.s32.totalorder %v2693_v28, 2  ;;  %vm2695_vm3 = vcmp.eq.s32.totalorder %v2693_v28, 0  ;;  %vm2698_vm7 = vcmp.eq.s32.totalorder %v2693_v28, 2 }
 0x367   :  { %5553 = vrot.lane.b32.xlu0 %v5176_v3, %s6789_s11  ;;  %v5274_v49 = vsel %vm5272_vm1, %v9281_v46, %v2696_v48  ;;  %v2697_v32 = vsel %vm2695_vm3, %v9281_v46, %v2696_v48  ;;  %v2700_v23 = vsel %vm2698_vm7, %v2699_v41, %v9334_v15  ;;  %vm5271_vm5 = vcmp.lt.s32.totalorder %v5270_v6, 2  ;;  %v10349_v48 = vld [vmem:[#allocation26_spill] sm:$0xff] }
 0x368   :  { %v5277_v63 = vsel %vm5275_vm11, %v2699_v41, %v9334_v15  ;;  %v2701_v29 = vsel %vm2694_vm12, %v2697_v32, %v2700_v23  ;;  %v2792_v37 = vsel %vm9285_vm10, 0, %v10344_v39  ;;  %v2800_v46 = vxor.u32 2147483648, %v9444_v35  ;;  %v10345_v15 = vld [vmem:[#allocation20_spill] sm:$0xff]  ;;  %v9703_v23 = vpop.permute.xlu1 %5594 }
 0x369   :  { %v5278_v57 = vsel %vm5271_vm5, %v5274_v49, %v5277_v63  ;;  %v9674_v36 = vsel %vm2691_vm6, nan, %v2701_v29  ;;  %v2796_v40 = vadd.s32 3, %v2792_v37  ;;  %v2803_v55 = vxor.u32 2147483648, %v9408_v31 }
 0x36a   :  { %v5279_v17 = vsel %vm2691_vm6, nan, %v5278_v57  ;;  %v5373_v0 = vand.u32 3, %v2792_v37  ;;  %vm10347_vm0 = vnez %v10346_v10  ;;  %vm2795_vm10 = vweird.f32 %v8530_v22  ;;  %v5518_v37 = vpop.permute.xlu0 %5517 }
 0x36b   :  { %v400_v30 = vsel %vm10347_vm0, 0, %v10345_v15  ;;  %5555 = vrot.lane.b32.xlu0 %v5279_v17, %s6789_s11  ;;  %v2797_v26 = vand.u32 3, %v2796_v40  ;;  %v408_v12 = vxor.u32 2147483648, %v10348_v53  ;;  %v411_v41 = vxor.u32 2147483648, %v10349_v48  ;;  %v10351_v15 = vld [vmem:[#allocation28_spill] sm:$0xff] }
 0x36c   :  { %v404_v25 = vadd.s32 3, %v400_v30  ;;  %vm5374_vm4 = vcmp.lt.s32.totalorder %v5373_v0, 2  ;;  %vm5375_vm13 = vcmp.eq.s32.totalorder %v5373_v0, 0  ;;  %vm5378_vm14 = vcmp.eq.s32.totalorder %v5373_v0, 2 }
 0x36d   :  { %vm2798_vm8 = vcmp.lt.s32.totalorder %v2797_v26, 2  ;;  %vm2799_vm15 = vcmp.eq.s32.totalorder %v2797_v26, 0  ;;  %vm2802_vm2 = vcmp.eq.s32.totalorder %v2797_v26, 2  ;;  %v5377_v6 = vsel %vm5375_vm13, %v9408_v31, %v2800_v46 }
 0x36e   :  { %v5380_v59 = vsel %vm5378_vm14, %v2803_v55, %v9444_v35  ;;  %v2801_v60 = vsel %vm2799_vm15, %v9408_v31, %v2800_v46  ;;  %v2804_v13 = vsel %vm2802_vm2, %v2803_v55, %v9444_v35  ;;  %v405_v47 = vand.u32 3, %v404_v25 }
 0x36f   :  { %v5381_v28 = vsel %vm5374_vm4, %v5377_v6, %v5380_v59  ;;  %v2805_v56 = vsel %vm2798_vm8, %v2801_v60, %v2804_v13  ;;  %vm403_vm6 = vweird.f32 %v10350_v51  ;;  %v3004_v3 = vand.u32 3, %v400_v30  ;;  %v5597_v30 = vpop.permute.xlu1 %5596  ;;  %v6756_v13 = vld [vmem:[%s9889_s0] sm:$0xff] }
 0x370   :  { %v5382_v49 = vsel %vm2795_vm10, nan, %v5381_v28  ;;  %v9698_v32 = vsel %vm2795_vm10, nan, %v2805_v56  ;;  %vm407_vm1 = vcmp.eq.s32.totalorder %v405_v47, 0  ;;  %v2896_v31 = vsel %vm9420_vm9, 0, %v9340_v14 }
 0x371   :  { %5557 = vrot.lane.b32.xlu0 %v5382_v49, %s6789_s11  ;;  %vm406_vm12 = vcmp.lt.s32.totalorder %v405_v47, 2  ;;  %v409_v35 = vsel %vm407_vm1, %v10349_v48, %v408_v12  ;;  %vm410_vm3 = vcmp.eq.s32.totalorder %v405_v47, 2  ;;  %vm3006_vm7 = vcmp.eq.s32.totalorder %v3004_v3, 0  ;;  %v10354_v47 = vld [vmem:[#allocation30_spill] sm:$0xff] }
 0x372   :  { %v412_v63 = vsel %vm410_vm3, %v411_v41, %v10348_v53  ;;  %vm3005_vm11 = vcmp.lt.s32.totalorder %v3004_v3, 2  ;;  %v3008_v22 = vsel %vm3006_vm7, %v10349_v48, %v408_v12  ;;  %vm3009_vm5 = vcmp.eq.s32.totalorder %v3004_v3, 2 }
 0x373   :  { %v413_v29 = vsel %vm406_vm12, %v409_v35, %v412_v63  ;;  %v3011_v39 = vsel %vm3009_vm5, %v411_v41, %v10348_v53  ;;  %v2900_v43 = vadd.s32 3, %v2896_v31  ;;  %v2904_v14 = vxor.u32 2147483648, %v9510_v61 }
 0x374   :  { %v9713_v57 = vsel %vm403_vm6, nan, %v413_v29  ;;  %v3012_v40 = vsel %vm3005_vm11, %v3008_v22, %v3011_v39  ;;  %v2907_v46 = vxor.u32 2147483648, %v9503_v33  ;;  %v5476_v17 = vand.u32 3, %v2896_v31 }
 0x375   :  { %v3013_v55 = vsel %vm403_vm6, nan, %v3012_v40  ;;  %v2901_v0 = vand.u32 3, %v2900_v43  ;;  %vm5661_vm9 = vcmask 195584   ;;  %vm5687_vm0 = vcmask 392192  }
 0x376   :  { %5511 = vrot.lane.b32.xlu0 %v3013_v55, %s6789_s11  ;;  %vm5477_vm10 = vcmp.lt.s32.totalorder %v5476_v17, 2  ;;  %vm5478_vm4 = vcmp.eq.s32.totalorder %v5476_v17, 0  ;;  %vm5481_vm13 = vcmp.eq.s32.totalorder %v5476_v17, 2  ;;  %v5663_v10 = vsel %vm5661_vm9, %v10351_v15, %v9666_v45  ;;  %v5520_v45 = vpop.permute.xlu0 %5519 }
 0x377   :  { %vm2902_vm14 = vcmp.lt.s32.totalorder %v2901_v0, 2  ;;  %vm2903_vm8 = vcmp.eq.s32.totalorder %v2901_v0, 0  ;;  %vm2906_vm15 = vcmp.eq.s32.totalorder %v2901_v0, 2  ;;  %v5480_v26 = vsel %vm5478_vm4, %v9503_v33, %v2904_v14 }
 0x378   :  { %v5483_v25 = vsel %vm5481_vm13, %v2907_v46, %v9510_v61  ;;  %v2905_v53 = vsel %vm2903_vm8, %v9503_v33, %v2904_v14  ;;  %v2908_v12 = vsel %vm2906_vm15, %v2907_v46, %v9510_v61  ;;  %v5689_v48 = vsel %vm5687_vm0, %v5663_v10, %v5589_v50  ;;  %v10352_v33 = vld [vmem:[#allocation31_spill] sm:$0xff] }
 0x379   :  { %vm2899_vm2 = vweird.f32 %v8641_v5  ;;  %v5484_v41 = vsel %vm5477_vm10, %v5480_v26, %v5483_v25  ;;  %v2909_v6 = vsel %vm2902_vm14, %v2905_v53, %v2908_v12  ;;  %vm5720_vm6 = vcmask 416768   ;;  %v5599_v5 = vpop.permute.xlu1 %5598 }
 0x37a   :  { %v5485_v59 = vsel %vm2899_vm2, nan, %v5484_v41  ;;  %v9728_v60 = vsel %vm2899_vm2, nan, %v2909_v6  ;;  %5586 = vrot.lane.b32.xlu0 %v6756_v13, %s6788_s10  ;;  %v5664_v61 = vsel %vm5661_vm9, %v10352_v33, %v9653_v9  ;;  %6435 = vmatmul.mubr.msk.f32.vlgmr.msra.gmra.mxu1 %vm5720_vm6, %v5689_v48  ;;  %vm10353_vm1 = vmmov 0   ;;  %v6757_v9 = vld [vmem:[%s9889_s0 + $0xc0] sm:$0xff]  ;;  %v5522_v56 = vpop.permute.xlu0 %5521  ;;  %s6790_s0 = smov [#allocation2]  }
 0x37b   :  { %5559 = vrot.lane.b32.xlu1 %v5485_v59, %s6789_s11  ;;  %6437 = vmatprep.mubr.msk.f32.mxu1 %vm10353_vm1, %v10267_v21  ;;  %v5690_v50 = vsel %vm5687_vm0, %v5664_v61, %v9636_v2  ;;  %v5665_v28 = vsel %vm5661_vm9, %v10354_v47, %v5518_v37  ;;  %v5666_v2 = vsel %vm5661_vm9, %v9257_v27, %v5520_v45 }
 0x37c   :  { %v5691_v51 = vsel %vm5687_vm0, %v5665_v28, %v9683_v38  ;;  %v5692_v49 = vsel %vm5687_vm0, %v5666_v2, %v9703_v23  ;;  %v5667_v35 = vsel %vm5661_vm9, %v9315_v20, %v5522_v56 }
 0x37d   :  { %v5601_v3 = vpop.permute.xlu1 %5600  ;;  %v5693_v27 = vsel %vm5687_vm0, %v5667_v35, %v5597_v30 }
 0x37e   :  { %6438 = vmatmul.mubr.msk.f32.gmra.mxu1 %vm5720_vm6, %v5690_v50 }
 0x37f   :  { %5634 = vrot.lane.b32.xlu1 %v6757_v9, %s6788_s10  ;;  %6440 = vmatprep.mubr.msk.f32.mxu1 %vm10353_vm1, %v10267_v21  ;;  %s6019_s10 = sshll.u32 %s6790_s0, 4  ;;  %s6020_s10 = int_to_ptr.vmem [resolvable:$true] %s6019_s10 }
 0x380   :  { %s6758_s11 = scalar_lea.vmem %s6020_s10, 3200  ;;  %p6763_p1 = scmp.lt.s32.totalorder %s6020_s10, %s6020_s10 }
 0x381   :  { %v5524_v31 = vpop.permute.xlu0 %5523  ;;  %v5603_v38 = vpop.permute.xlu1 %5602  ;;  %p6759_p0 = scmp.ne.s32.totalorder %s6020_s10, %s6758_s11  ;;  %p6764_p2 = scmp.lt.s32.totalorder %s6758_s11, %s6758_s11 }
 0x382   :  { %6441 = vmatmul.mubr.msk.f32.gmra.mxu1 %vm5720_vm6, %v5691_v51  ;;  %v5668_v63 = vsel %vm5661_vm9, %v9374_v58, %v5524_v31 }
 0x383   :  { %6443 = vmatprep.mubr.msk.f32.mxu1 %vm10353_vm1, %v10267_v21  ;;  %v5694_v23 = vsel %vm5687_vm0, %v5668_v63, %v5599_v5  ;;  %p6765_p3 = por %p6764_p2, %p6763_p1 }
 0x385   :  { %v5605_v29 = vpop.permute.xlu1 %5604  ;;  %p6766_p4 = pnand %p6765_p3, %p6759_p0 }
 0x386   :  { %6444 = vmatmul.mubr.msk.f32.gmra.mxu1 %vm5720_vm6, %v5692_v49 }
 0x387   :  { %6446 = vmatprep.mubr.msk.f32.mxu1 %vm10353_vm1, %v10267_v21  ;;  %v5526_v22 = vpop.permute.xlu0 %5525 }
 0x388   :  { %v5669_v20 = vsel %vm5661_vm9, %v9391_v24, %v5526_v22 }
 0x389   :  { %v5695_v58 = vsel %vm5687_vm0, %v5669_v20, %v5601_v3  ;;  %v5607_v14 = vpop.permute.xlu1 %5606 }
 0x38a   :  { %6447 = vmatmul.mubr.msk.f32.gmra.mxu1 %vm5720_vm6, %v5693_v27 }
 0x38b   :  { %6449 = vmatprep.mubr.msk.f32.mxu1 %vm10353_vm1, %v10267_v21 }
 0x38e   :  { %6450 = vmatmul.mubr.msk.f32.gmra.mxu1 %vm5720_vm6, %v5694_v23  ;;  %v5528_v39 = vpop.permute.xlu0 %5527 }
 0x38f   :  { %6452 = vmatprep.mubr.msk.f32.mxu1 %vm10353_vm1, %v10267_v21  ;;  %v5670_v43 = vsel %vm5661_vm9, %v9429_v11, %v5528_v39  ;;  %v5609_v11 = vpop.permute.xlu1 %5608 }
 0x390   :  { %v5696_v24 = vsel %vm5687_vm0, %v5670_v43, %v5603_v38 }
 0x392   :  { %6453 = vmatmul.mubr.msk.f32.gmra.mxu1 %vm5720_vm6, %v5695_v58 }
 0x393   :  { %6455 = vmatprep.mubr.msk.f32.mxu1 %vm10353_vm1, %v10267_v21  ;;  %v5611_v15 = vpop.permute.xlu1 %5610 }
 0x396   :  { %6456 = vmatmul.mubr.msk.f32.gmra.mxu1 %vm5720_vm6, %v5696_v24  ;;  %v5530_v37 = vpop.permute.xlu0 %5529 }
 0x397   :  { %6458 = vmatprep.mubr.msk.f32.mxu1 %vm10353_vm1, %v10267_v21  ;;  %v5671_v40 = vsel %vm5661_vm9, %v9456_v16, %v5530_v37  ;;  %v5613_v26 = vpop.permute.xlu1 %5612 }
 0x398   :  { %v5697_v46 = vsel %vm5687_vm0, %v5671_v40, %v5605_v29 }
 0x39a   :  { %6459 = vmatmul.mubr.msk.f32.gmra.mxu1 %vm5720_vm6, %v5697_v46 }
 0x39b   :  { %6461 = vmatprep.mubr.msk.f32.mxu1 %vm10353_vm1, %v10267_v21  ;;  %v5532_v17 = vpop.permute.xlu0 %5531  ;;  %v5615_v12 = vpop.permute.xlu1 %5614 }
 0x39c   :  { %v5672_v55 = vsel %vm5661_vm9, %v9476_v44, %v5532_v17 }
 0x39d   :  { %v5698_v0 = vsel %vm5687_vm0, %v5672_v55, %v5607_v14 }
 0x39e   :  { %6462 = vmatmul.mubr.msk.f32.gmra.mxu1 %vm5720_vm6, %v5698_v0 }
 0x39f   :  { %6464 = vmatprep.mubr.msk.f32.mxu1 %vm10353_vm1, %v10267_v21  ;;  %v5617_v6 = vpop.permute.xlu1 %5616 }
 0x3a2   :  { %v5534_v16 = vpop.permute.xlu0 %5533 }
 0x3a3   :  { %v5673_v10 = vsel %vm5661_vm9, %v9496_v42, %v5534_v16 }
 0x3a4   :  { %v5699_v30 = vsel %vm5687_vm0, %v5673_v10, %v5609_v11 }
 0x3a5   :  { %6465 = vmatmul.mubr.msk.f32.gmra.mxu1 %vm5720_vm6, %v5699_v30 }
 0x3a6   :  { %6467 = vmatprep.mubr.msk.f32.mxu1 %vm10353_vm1, %v10267_v21 }
 0x3a7   :  { %v5536_v25 = vpop.permute.xlu0 %5535 }
 0x3a8   :  { %v5674_v44 = vsel %vm5661_vm9, %v9506_v4, %v5536_v25 }
 0x3a9   :  { %v5700_v53 = vsel %vm5687_vm0, %v5674_v44, %v5611_v15 }
 0x3aa   :  { %6468 = vmatmul.mubr.msk.f32.gmra.mxu1 %vm5720_vm6, %v5700_v53 }
 0x3ab   :  { %6470 = vmatprep.mubr.msk.f32.mxu1 %vm10353_vm1, %v10267_v21 }
 0x3ad   :  { %v5538_v42 = vpop.permute.xlu0 %5537 }
 0x3ae   :  { %v5675_v48 = vsel %vm5661_vm9, %v9525_v18, %v5538_v42  ;;  %v5619_v18 = vpop.permute.xlu1 %5618 }
 0x3af   :  { %v5701_v41 = vsel %vm5687_vm0, %v5675_v48, %v5613_v26 }
 0x3b0   :  { %6471 = vmatmul.mubr.msk.f32.gmra.mxu1 %vm5720_vm6, %v5701_v41 }
 0x3b1   :  { %6473 = vmatprep.mubr.msk.f32.mxu1 %vm10353_vm1, %v10267_v21 }
 0x3b2   :  { %v5540_v45 = vpop.permute.xlu0 %5539  ;;  %v5621_v50 = vpop.permute.xlu1 %5620 }
 0x3b3   :  { %v5676_v4 = vsel %vm5661_vm9, %v9540_v8, %v5540_v45 }
 0x3b4   :  { %v5702_v59 = vsel %vm5687_vm0, %v5676_v4, %v5615_v12 }
 0x3b5   :  { %6474 = vmatmul.mubr.msk.f32.gmra.mxu1 %vm5720_vm6, %v5702_v59 }
 0x3b6   :  { %6476 = vmatprep.mubr.msk.f32.mxu1 %vm10353_vm1, %v10267_v21  ;;  %v5623_v28 = vpop.permute.xlu1 %5622 }
 0x3b8   :  { %v5542_v13 = vpop.permute.xlu0 %5541 }
 0x3b9   :  { %v5677_v33 = vsel %vm5661_vm9, %v9564_v19, %v5542_v13 }
 0x3ba   :  { %v5703_v61 = vsel %vm5687_vm0, %v5677_v33, %v5617_v6  ;;  %v5625_v2 = vpop.permute.xlu1 %5624 }
 0x3bb   :  { %6477 = vmatmul.mubr.msk.f32.gmra.mxu1 %vm5720_vm6, %v5703_v61 }
 0x3bc   :  { %6479 = vmatprep.mubr.msk.f32.mxu1 %vm10353_vm1, %v10267_v21 }
 0x3bd   :  { %v5544_v5 = vpop.permute.xlu0 %5543 }
 0x3be   :  { %v5678_v8 = vsel %vm5661_vm9, %v9572_v52, %v5544_v5  ;;  %v5627_v31 = vpop.permute.xlu1 %5626 }
 0x3bf   :  { %v5704_v47 = vsel %vm5687_vm0, %v5678_v8, %v5619_v18 }
 0x3c0   :  { %6480 = vmatmul.mubr.msk.f32.gmra.mxu1 %vm5720_vm6, %v5704_v47 }
 0x3c1   :  { %6482 = vmatprep.mubr.msk.f32.mxu1 %vm10353_vm1, %v10267_v21 }
 0x3c2   :  { %v5629_v63 = vpop.permute.xlu1 %5628 }
 0x3c3   :  { %v5546_v19 = vpop.permute.xlu0 %5545 }
 0x3c4   :  { %v5679_v9 = vsel %vm5661_vm9, %v9589_v62, %v5546_v19 }
 0x3c5   :  { %v5705_v56 = vsel %vm5687_vm0, %v5679_v9, %v5621_v50 }
 0x3c6   :  { %6483 = vmatmul.mubr.msk.f32.gmra.mxu1 %vm5720_vm6, %v5705_v56  ;;  %v5631_v20 = vpop.permute.xlu1 %5630 }
 0x3c7   :  { %v5548_v51 = vpop.permute.xlu0 %5547  ;;  %6485 = vmatprep.mubr.msk.f32.mxu1 %vm10353_vm1, %v10267_v21 }
 0x3c8   :  { %v5680_v52 = vsel %vm5661_vm9, %v9604_v34, %v5548_v51 }
 0x3c9   :  { %v5706_v3 = vsel %vm5687_vm0, %v5680_v52, %v5623_v28 }
 0x3ca   :  { %6486 = vmatmul.mubr.msk.f32.gmra.mxu1 %vm5720_vm6, %v5706_v3 }
 0x3cb   :  { %6488 = vmatprep.mubr.msk.f32.mxu1 %vm10353_vm1, %v10267_v21 }
 0x3cd   :  { %v5550_v62 = vpop.permute.xlu0 %5549 }
 0x3ce   :  { %v5681_v49 = vsel %vm5661_vm9, %v9628_v7, %v5550_v62 }
 0x3cf   :  { %v5707_v35 = vsel %vm5687_vm0, %v5681_v49, %v5625_v2 }
 0x3d0   :  { %6489 = vmatmul.mubr.msk.f32.gmra.mxu1 %vm5720_vm6, %v5707_v35 }
 0x3d1   :  { %6491 = vmatprep.mubr.msk.f32.mxu1 %vm10353_vm1, %v10267_v21 }
 0x3d2   :  { %v5552_v38 = vpop.permute.xlu0 %5551 }
 0x3d3   :  { %v5682_v34 = vsel %vm5661_vm9, %v9638_v1, %v5552_v38 }
 0x3d4   :  { %v5708_v27 = vsel %vm5687_vm0, %v5682_v34, %v5627_v31 }
 0x3d5   :  { %6492 = vmatmul.mubr.msk.f32.gmra.mxu1 %vm5720_vm6, %v5708_v27 }
 0x3d6   :  { %6494 = vmatprep.mubr.msk.f32.mxu1 %vm10353_vm1, %v10267_v21 }
 0x3d9   :  { %v5554_v7 = vpop.permute.xlu0 %5553 }
 0x3da   :  { %v5683_v22 = vsel %vm5661_vm9, %v9657_v54, %v5554_v7  ;;  %v5633_v54 = vpop.permute.xlu1 %5632 }
 0x3db   :  { %v5709_v23 = vsel %vm5687_vm0, %v5683_v22, %v5629_v63 }
 0x3dc   :  { %6495 = vmatmul.mubr.msk.f32.gmra.mxu1 %vm5720_vm6, %v5709_v23 }
 0x3dd   :  { %v5556_v29 = vpop.permute.xlu0 %5555  ;;  %6497 = vmatprep.mubr.msk.f32.mxu1 %vm10353_vm1, %v10267_v21 }
 0x3de   :  { %v5684_v1 = vsel %vm5661_vm9, %v9674_v36, %v5556_v29 }
 0x3df   :  { %v5710_v39 = vsel %vm5687_vm0, %v5684_v1, %v5631_v20 }
 0x3e0   :  { %6498 = vmatmul.mubr.msk.f32.gmra.mxu1 %vm5720_vm6, %v5710_v39 }
 0x3e1   :  { %6500 = vmatprep.mubr.msk.f32.mxu1 %vm10353_vm1, %v10267_v21 }
 0x3e3   :  { %v5558_v58 = vpop.permute.xlu0 %5557 }
 0x3e4   :  { %v5685_v43 = vsel %vm5661_vm9, %v9698_v32, %v5558_v58 }
 0x3e5   :  { %v5711_v14 = vsel %vm5687_vm0, %v5685_v43, %v5633_v54 }
 0x3e6   :  { %6501 = vmatmul.mubr.msk.f32.gmra.mxu1 %vm5720_vm6, %v5711_v14 }
 0x3e7   :  { %6503 = vmatprep.mubr.msk.f32.mxu1 %vm10353_vm1, %v10267_v21 }
 0x3e8   :  { %v5512_v36 = vpop.permute.xlu0 %5511 }
 0x3e9   :  { %v5662_v24 = vsel %vm5661_vm9, %v9713_v57, %v5512_v36 }
 0x3ec   :  { %v5587_v37 = vpop.permute.xlu0 %5586 }
 0x3ed   :  { %v5560_v40 = vpop.permute.xlu1 %5559  ;;  %v5688_v46 = vsel %vm5687_vm0, %v5662_v24, %v5587_v37 }
 0x3ee   :  { %6432 = vmatmul.mubr.msk.f32.vlgmr.msra.gmra.mxu0 %vm5720_vm6, %v5688_v46  ;;  %v5686_v32 = vsel %vm5661_vm9, %v9728_v60, %v5560_v40 }
 0x3f1   :  { %v5635_v11 = vpop.permute.xlu1 %5634 }
 0x3f2   :  { %v5712_v17 = vsel %vm5687_vm0, %v5686_v32, %v5635_v11 }
 0x3f3   :  { %6504 = vmatmul.mubr.msk.f32.gmra.mxu1 %vm5720_vm6, %v5712_v17 }
 0x43a   :  { %v5870_v55 = vpop.f32.mrf.mxu1 }
 0x43b   :  { %5990 = vst [vmem:[#allocation2 + $0x8] sm:$0xff] %v5870_v55 }
 0x43c   :  { %v6436_v21 = vpop.f32.mrf.mxu1 }
 0x43e   :  { %v5875_v0 = vpop.f32.mrf.mxu1 }
 0x43f   :  { %5991 = vst [vmem:[#allocation2 + $0x10] sm:$0xff] %v5875_v0 }
 0x440   :  { %v6439_v57 = vpop.f32.mrf.mxu1 }
 0x442   :  { %v5880_v15 = vpop.f32.mrf.mxu1 }
 0x443   :  { %5992 = vst [vmem:[#allocation2 + $0x18] sm:$0xff] %v5880_v15 }
 0x444   :  { %v6442_v16 = vpop.f32.mrf.mxu1 }
 0x446   :  { %v5885_v10 = vpop.f32.mrf.mxu1 }
 0x447   :  { %5993 = vst [vmem:[#allocation2 + $0x20] sm:$0xff] %v5885_v10 }
 0x448   :  { %v6445_v30 = vpop.f32.mrf.mxu1 }
 0x44a   :  { %v5890_v26 = vpop.f32.mrf.mxu1 }
 0x44b   :  { %5994 = vst [vmem:[#allocation2 + $0x28] sm:$0xff] %v5890_v26 }
 0x44c   :  { %v6448_v60 = vpop.f32.mrf.mxu1 }
 0x44e   :  { %v5895_v25 = vpop.f32.mrf.mxu1 }
 0x44f   :  { %5995 = vst [vmem:[#allocation2 + $0x30] sm:$0xff] %v5895_v25 }
 0x450   :  { %v6451_v44 = vpop.f32.mrf.mxu1 }
 0x452   :  { %v5900_v53 = vpop.f32.mrf.mxu1 }
 0x453   :  { %5996 = vst [vmem:[#allocation2 + $0x38] sm:$0xff] %v5900_v53 }
 0x454   :  { %v6454_v12 = vpop.f32.mrf.mxu1 }
 0x456   :  { %v5905_v42 = vpop.f32.mrf.mxu1 }
 0x457   :  { %5997 = vst [vmem:[#allocation2 + $0x40] sm:$0xff] %v5905_v42 }
 0x458   :  { %v6457_v48 = vpop.f32.mrf.mxu1 }
 0x45a   :  { %v5910_v41 = vpop.f32.mrf.mxu1 }
 0x45b   :  { %5998 = vst [vmem:[#allocation2 + $0x48] sm:$0xff] %v5910_v41 }
 0x45c   :  { %v6460_v6 = vpop.f32.mrf.mxu1 }
 0x45e   :  { %v5915_v45 = vpop.f32.mrf.mxu1 }
 0x45f   :  { %5999 = vst [vmem:[#allocation2 + $0x50] sm:$0xff] %v5915_v45 }
 0x460   :  { %v6463_v4 = vpop.f32.mrf.mxu1 }
 0x465   :  { %v5920_v59 = vpop.f32.mrf.mxu1 }
 0x466   :  { %6000 = vst [vmem:[#allocation2 + $0x58] sm:$0xff] %v5920_v59 }
 0x467   :  { %v6466_v18 = vpop.f32.mrf.mxu1 }
 0x46a   :  { %v5925_v13 = vpop.f32.mrf.mxu1 }
 0x46b   :  { %6001 = vst [vmem:[#allocation2 + $0x60] sm:$0xff] %v5925_v13 }
 0x46c   :  { %v6469_v33 = vpop.f32.mrf.mxu1 }
 0x470   :  { %v5930_v61 = vpop.f32.mrf.mxu1 }
 0x471   :  { %6002 = vst [vmem:[#allocation2 + $0x68] sm:$0xff] %v5930_v61 }
 0x472   :  { %v6472_v5 = vpop.f32.mrf.mxu1 }
 0x475   :  { %v5935_v8 = vpop.f32.mrf.mxu1 }
 0x476   :  { %6003 = vst [vmem:[#allocation2 + $0x70] sm:$0xff] %v5935_v8 }
 0x477   :  { %v6475_v50 = vpop.f32.mrf.mxu1 }
 0x47b   :  { %v5940_v47 = vpop.f32.mrf.mxu1 }
 0x47c   :  { %6004 = vst [vmem:[#allocation2 + $0x78] sm:$0xff] %v5940_v47 }
 0x47d   :  { %v6478_v19 = vpop.f32.mrf.mxu1 }
 0x480   :  { %v5945_v28 = vpop.f32.mrf.mxu1 }
 0x481   :  { %6005 = vst [vmem:[#allocation2 + $0x80] sm:$0xff] %v5945_v28 }
 0x482   :  { %v6481_v9 = vpop.f32.mrf.mxu1 }
 0x486   :  { %v5950_v56 = vpop.f32.mrf.mxu1 }
 0x487   :  { %6006 = vst [vmem:[#allocation2 + $0x88] sm:$0xff] %v5950_v56 }
 0x488   :  { %v6484_v51 = vpop.f32.mrf.mxu1 }
 0x48a   :  { %v5955_v52 = vpop.f32.mrf.mxu1 }
 0x48b   :  { %6007 = vst [vmem:[#allocation2 + $0x90] sm:$0xff] %v5955_v52 }
 0x48c   :  { %v6487_v2 = vpop.f32.mrf.mxu1 }
 0x490   :  { %v5960_v3 = vpop.f32.mrf.mxu1 }
 0x491   :  { %6008 = vst [vmem:[#allocation2 + $0x98] sm:$0xff] %v5960_v3 }
 0x492   :  { %v6490_v62 = vpop.f32.mrf.mxu1 }
 0x495   :  { %v5965_v49 = vpop.f32.mrf.mxu1 }
 0x496   :  { %6009 = vst [vmem:[#allocation2 + $0xa0] sm:$0xff] %v5965_v49 }
 0x497   :  { %v6493_v31 = vpop.f32.mrf.mxu1 }
 0x49c   :  { %v5970_v35 = vpop.f32.mrf.mxu1 }
 0x49d   :  { %6010 = vst [vmem:[#allocation2 + $0xa8] sm:$0xff] %v5970_v35 }
 0x49e   :  { %v6496_v38 = vpop.f32.mrf.mxu1 }
 0x4a0   :  { %v5975_v34 = vpop.f32.mrf.mxu1 }
 0x4a1   :  { %6011 = vst [vmem:[#allocation2 + $0xb0] sm:$0xff] %v5975_v34 }
 0x4a2   :  { %v6499_v27 = vpop.f32.mrf.mxu1 }
 0x4a6   :  { %v5980_v63 = vpop.f32.mrf.mxu1 }
 0x4a7   :  { %6012 = vst [vmem:[#allocation2 + $0xb8] sm:$0xff] %v5980_v63 }
 0x4a8   :  { %v6502_v7 = vpop.f32.mrf.mxu1 }
 0x4ae   :  { %v5865_v22 = vpop.f32.mrf.mxu0 }
 0x4af   :  { %5989 = vst [vmem:[#allocation2] sm:$0xff] %v5865_v22 }
 0x4b0   :  { %v6433_v23 = vpop.f32.mrf.mxu0 }
 0x4b3   :  { %v5985_v20 = vpop.f32.mrf.mxu1 }
 0x4b4   :  { %6013 = vst [vmem:[#allocation2 + $0xc0] sm:$0xff] %v5985_v20 }
 0x4b5   :  { %v6505_v29 = vpop.f32.mrf.mxu1 }
 0x4b6   :  { %6769 = shalt.err (!%p6766_p4)
}
 0x4b7   :  { %s6791_s20 = smov 128   ;;  %s6792_s21 = smov 8  }
 0x4b8   :  { %6025 = dma.vmem_to_hbm [thread:$0]  %s6020_s10, 3200, %s9892_s3, [#allocation3], %s6791_s20, %s6791_s20, %s6792_s21  }
 0x4b9   :  { %6778 = dma.done.wait [#allocation3], 3200  }
 0x4ba   :  { %6779 = vsyncadd [#allocation3], 4294964096 }
 0x4bb   :  { %6029 = vsyncpa [#allocation3], 1 }

</bundles_post_ra>
